<compile_context>
chip_gen: v7x
topology: tpu7x:2x2x1
jax: 0.10.0
libtpu: 0.0.40
codegen_flags: <defaults>
</compile_context>

<pallas_src>
import functools

import jax
import jax.numpy as jnp
from jax.experimental import pallas as pl
from jax.experimental.pallas import tpu as pltpu

LEAKY_SLOPE = 0.01

CFG = dict(h=16, w=16, ratio=1, scale=16, dim=32,
           num_heads1=2, num_heads2=2, mlp_ratio=1)


# ----------------------------- in-kernel helpers -----------------------------

def _leaky(x):
    return jnp.where(x >= 0.0, x, LEAKY_SLOPE * x)


def _sigmoid(x):
    e = jnp.exp(-jnp.abs(x))
    return jnp.where(x >= 0.0, 1.0 / (1.0 + e), e / (1.0 + e))


def _gelu(x):
    # tanh-approx GELU: routes the transcendental onto the (otherwise idle)
    # EUP slot instead of ~10 VALU ops per element.
    c = 0.7978845608028654  # sqrt(2/pi)
    return 0.5 * x * (1.0 + jnp.tanh(c * (x + 0.044715 * x * x * x)))


# ------------------------------ weight packing --------------------------------

def _make_layout(dim, conv_dim, trans_dim, d, hidden, KK):
    """Static layout of the two packed weight slabs."""
    w_entries = [                                  # bf16 matmul weights
        ('pw_w', conv_dim, conv_dim), ('p0_w', conv_dim, conv_dim),
        ('p1_w', conv_dim, conv_dim), ('qkv_w', 3 * trans_dim, trans_dim),
        ('out_w', trans_dim, trans_dim), ('fc_w', d, dim),
        ('fca_w', conv_dim, d), ('fcb_w', trans_dim, d),
        ('mlp_w1', hidden, dim), ('mlp_w2', dim, hidden),
    ]
    a_entries = [                                  # f32: depthwise taps + biases
        ('dw_w', conv_dim, KK),
        ('pw_b', conv_dim, 1), ('dw_b', conv_dim, 1), ('p0_b', conv_dim, 1),
        ('p1_b', conv_dim, 1), ('qkv_b', 3 * trans_dim, 1), ('out_b', trans_dim, 1),
        ('fca_b', conv_dim, 1), ('fcb_b', trans_dim, 1), ('mlp_b1', hidden, 1),
    ]

    def build(entries, align):
        off, layout = 0, {}
        for name, r, c in entries:
            layout[name] = (off, r, c)
            off += -(-r // align) * align          # keep row offsets tile-aligned
        return layout, off

    w_layout, w_rows = build(w_entries, 16)        # bf16 sublane packing = 16 rows
    a_layout, a_rows = build(a_entries, 8)         # f32 sublane tile = 8 rows
    w_cols = max(c for _, _, c in w_entries)
    a_cols = max(c for _, _, c in a_entries)
    return (w_layout, w_rows, w_cols), (a_layout, a_rows, a_cols)


def pack_params(p):
    """Fold LayerNorm affines into the consuming matmuls and pack 2 slabs."""
    dim = CFG['dim']
    conv_dim = int(dim - dim / (CFG['ratio'] + 1))
    trans_dim = dim - conv_dim
    d = max(int(dim / 4), 64)
    hidden = int(dim * CFG['mlp_ratio'])
    nh1 = CFG['num_heads1']
    K = 3 + 2 * (nh1 - 1)

    g1, b1 = p['ln1_g'][:, 0], p['ln1_b'][:, 0]
    g2, b2 = p['ln2_g'][:, 0], p['ln2_b'][:, 0]
    gc, bc = g1[:conv_dim], b1[:conv_dim]
    gt, bt = g1[conv_dim:], b1[conv_dim:]

    folded = dict(p)
    # LN1 affine -> conv-branch 1x1 (pw) and trans-branch qkv (adds a bias).
    folded['pw_w'] = p['pw_w'] * gc[None, :]
    folded['pw_b'] = p['pw_b'] + p['pw_w'] @ bc[:, None]
    folded['qkv_w'] = p['qkv_w'] * gt[None, :]
    folded['qkv_b'] = p['qkv_w'] @ bt[:, None]
    # LN2 affine -> first MLP 1x1 (adds a bias).
    folded['mlp_w1'] = p['mlp_w1'] * g2[None, :]
    folded['mlp_b1'] = p['mlp_w1'] @ b2[:, None]

    (w_layout, w_rows, w_cols), (a_layout, a_rows, a_cols) = _make_layout(
        dim, conv_dim, trans_dim, d, hidden, K * K)

    w_slab = jnp.zeros((w_rows, w_cols), jnp.float32)
    for name, (off, r, c) in w_layout.items():
        w_slab = w_slab.at[off:off + r, 0:c].set(folded[name])
    a_slab = jnp.zeros((a_rows, a_cols), jnp.float32)
    for name, (off, r, c) in a_layout.items():
        a_slab = a_slab.at[off:off + r, 0:c].set(folded[name])
    return w_slab.astype(jnp.bfloat16), a_slab


# ------------------------------ fused kernel ---------------------------------

def encoder_kernel(x_ref, w_ref, a_ref, o_ref, *,
                   H, W, conv_dim, trans_dim, nh1, nh2, K,
                   w_layout, a_layout):
    N = H * W
    f32 = jnp.float32
    bf16 = jnp.bfloat16

    def wld(name):                                 # bf16 matmul weight
        off, r, c = w_layout[name]
        return w_ref[off:off + r, 0:c]

    def ald(name):                                 # f32 taps / bias
        off, r, c = a_layout[name]
        return a_ref[off:off + r, 0:c]

    def mm(w_b, act, bias=None):
        # bf16 MXU operands, f32 accumulate; elementwise math stays f32.
        r = jnp.dot(w_b, act.astype(bf16), preferred_element_type=f32)
        return r if bias is None else r + bias

    x = x_ref[0]                                   # (C, N) feature-major, f32

    # ---------------- LayerNorm1 (affine folded into pw / qkv) ----------------
    mu = jnp.mean(x, axis=0, keepdims=True)
    var = jnp.mean((x - mu) ** 2, axis=0, keepdims=True)
    xhat = (x - mu) * jax.lax.rsqrt(var + 1e-5)
    xc = xhat[0:conv_dim, :]
    xt = xhat[conv_dim:, :]

    # ========================= MSC (sub_Conv) branch =========================
    # folded LN1 affine + per-head BatchNorm + per-head 1x1 conv = one matmul
    y = mm(wld('pw_w'), xc, ald('pw_b'))

    # depthwise convs: per-head tap loops via lane rotations + (1,N) masks.
    pad = K // 2
    lane = jax.lax.broadcasted_iota(jnp.int32, (1, N), 1)
    col = jnp.bitwise_and(lane, W - 1)             # j = idx % W (W is 2^k)
    rowf = {dy: ((lane >= -dy * W) & (lane < N - dy * W)).astype(f32)
            for dy in range(-pad, pad + 1)}        # 0 <= row+dy < H
    colf = {dx: ((col >= -dx) & (col < W - dx)).astype(f32)
            for dx in range(-pad, pad + 1)}        # 0 <= col+dx < W

    dww = ald('dw_w')                              # (conv_dim, K*K), centre-padded
    Cg = conv_dim // nh1
    head_outs = []
    for i in range(nh1):
        Ki = 3 + 2 * i                             # this head's kernel size
        pp = (K - Ki) // 2
        yi = y[i * Cg:(i + 1) * Cg, :]
        acc = jnp.zeros((Cg, N), f32)
        for ky in range(pp, pp + Ki):
            for kx in range(pp, pp + Ki):
                dy, dx = ky - pad, kx - pad
                off = dy * W + dx
                # pltpu.roll matches jnp.roll: out[i] = in[(i - shift) % N];
                # shift = -off brings pixel (row+dy, col+dx) to position i.
                src = pltpu.roll(yi, shift=(-off) % N, axis=1) if off else yi
                okf = rowf[dy] * colf[dx]                           # (1, N)
                tap = dww[i * Cg:(i + 1) * Cg, ky * K + kx:ky * K + kx + 1]
                acc = acc + src * okf * tap
        head_outs.append(acc)
    acc = _leaky(jnp.concatenate(head_outs, axis=0) + ald('dw_b'))  # local_conv act

    # head interleave folded into proj0's columns; proj0(+BN)+act, then proj1
    t0 = _leaky(mm(wld('p0_w'), acc, ald('p0_b')))
    conv_out = mm(wld('p1_w'), t0, ald('p1_b'))

    # ======================== MSA (sub_Attention) branch ======================
    # TODO(synk): Pixel2SP / FeatureConverter superpixel assignment, ops['map_idx'],
    # ops['map_sp2p'] and the numpy adjacency mask (get_A) are undefined external
    # ops; cosine attention is computed densely over per-pixel tokens instead.
    qkv = mm(wld('qkv_w'), xt, ald('qkv_b'))       # (3*td, N); bias = LN1 beta fold
    dh = trans_dim // nh2
    temperature = trans_dim ** (-0.5)
    oh_heads = []
    for h in range(nh2):
        qh = qkv[h * dh:(h + 1) * dh, :]
        kh = qkv[trans_dim + h * dh:trans_dim + (h + 1) * dh, :]
        vh = qkv[2 * trans_dim + h * dh:2 * trans_dim + (h + 1) * dh, :]
        qn = qh * jax.lax.rsqrt(jnp.maximum(jnp.sum(qh * qh, 0, keepdims=True), 1e-24))
        kn = kh * jax.lax.rsqrt(jnp.maximum(jnp.sum(kh * kh, 0, keepdims=True), 1e-24))
        # QK^T: contract the feature axis (axis 0) directly — no (N,N) transpose.
        s = jax.lax.dot_general(qn.astype(bf16), kn.astype(bf16),
                                (((0,), (0,)), ((), ())),
                                preferred_element_type=f32) * temperature  # (Nq,Nk)
        # |s| <= temperature (unit-normalised q/k): exp cannot overflow, so the
        # row-max subtraction is dropped (saves an XLU reduce + a live (N,N) tmp).
        e = jnp.exp(s)
        p_attn = e * pl.reciprocal(jnp.sum(e, axis=-1, keepdims=True), approx=True)
        # AV: contract the big (N,N) matrix on its LAST axis; only the skinny
        # (dh,N) value tile is presented transposed to the MXU.
        oh = jax.lax.dot_general(p_attn.astype(bf16), vh.astype(bf16),
                                 (((1,), (1,)), ((), ())),
                                 preferred_element_type=f32)               # (Nq, dh)
        oh_heads.append(oh)
    oh_all = jnp.concatenate(oh_heads, axis=1)                             # (N, td)
    # single output projection after the head loop (K = trans_dim, one MXU pass)
    trans_out = jax.lax.dot_general(wld('out_w'), oh_all.astype(bf16),
                                    (((1,), (1,)), ((), ())),
                                    preferred_element_type=f32) + ald('out_b')

    # ============================ SK-style fusion =============================
    s_u = jnp.concatenate([jnp.mean(conv_out, axis=1, keepdims=True),
                           jnp.mean(trans_out, axis=1, keepdims=True)], axis=0)
    z = _leaky(mm(wld('fc_w'), s_u))
    gate_a = _sigmoid(mm(wld('fca_w'), z, ald('fca_b')))
    gate_b = _sigmoid(mm(wld('fcb_w'), z, ald('fcb_b')))

    # feats_u + cat(a*conv, b*trans) == branch * (1 + gate); then residual #1
    x1c = x[0:conv_dim, :] + conv_out * (1.0 + gate_a)
    x1t = x[conv_dim:, :] + trans_out * (1.0 + gate_b)
    x1 = jnp.concatenate([x1c, x1t], axis=0)                               # (C, N)

    # ------- LayerNorm2 (affine folded into mlp_w1/mlp_b1) + MLP + residual #2 ---
    mu2 = jnp.mean(x1, axis=0, keepdims=True)
    var2 = jnp.mean((x1 - mu2) ** 2, axis=0, keepdims=True)
    n2 = (x1 - mu2) * jax.lax.rsqrt(var2 + 1e-5)
    hmid = _gelu(mm(wld('mlp_w1'), n2, ald('mlp_b1')))
    mlp_out = mm(wld('mlp_w2'), hmid)

    o_ref[0] = (x1 + mlp_out).astype(o_ref.dtype)


# ------------------------------- wrapper --------------------------------------

def encoder_layer_forward(x_nchw, w_slab, a_slab):
    B, C, H, W = x_nchw.shape
    N = H * W
    conv_dim = int(C - C / (CFG['ratio'] + 1))
    trans_dim = C - conv_dim
    d = max(int(C / 4), 64)
    hidden = int(C * CFG['mlp_ratio'])
    nh1, nh2 = CFG['num_heads1'], CFG['num_heads2']
    K = 3 + 2 * (nh1 - 1)
    assert W & (W - 1) == 0, "lane-roll index math assumes W is a power of two"

    (w_layout, w_rows, w_cols), (a_layout, a_rows, a_cols) = _make_layout(
        C, conv_dim, trans_dim, d, hidden, K * K)
    assert w_slab.shape == (w_rows, w_cols) and a_slab.shape == (a_rows, a_cols)

    x = x_nchw.reshape(B, C, N)                    # feature-major tokens (free reshape)

    kernel = functools.partial(
        encoder_kernel, H=H, W=W, conv_dim=conv_dim, trans_dim=trans_dim,
        nh1=nh1, nh2=nh2, K=K, w_layout=w_layout, a_layout=a_layout)

    out = pl.pallas_call(
        kernel,
        out_shape=jax.ShapeDtypeStruct((B, C, N), jnp.float32),
        grid=(B,),
        in_specs=[pl.BlockSpec((1, C, N), lambda b: (b, 0, 0)),
                  pl.BlockSpec(w_slab.shape, lambda b: (0, 0)),   # resident (DMA'd once)
                  pl.BlockSpec(a_slab.shape, lambda b: (0, 0))],
        out_specs=pl.BlockSpec((1, C, N), lambda b: (b, 0, 0)),
        compiler_params=pltpu.CompilerParams(
            dimension_semantics=("parallel",)),    # one batch element per TensorCore
    )(x, w_slab, a_slab)
    return out.reshape(B, C, H, W)


# ------------------------------ parameters -------------------------------------

def _bn_fold(gamma, beta, mean, var, eps=1e-5):
    scale = gamma / jnp.sqrt(var + eps)
    shift = beta - mean * scale
    return scale, shift


def init_params(key):
    dim = CFG['dim']
    conv_dim = int(dim - dim / (CFG['ratio'] + 1))    # 16
    trans_dim = int(dim / (CFG['ratio'] + 1))         # 16
    nh1 = CFG['num_heads1']                           # 2
    Cg = conv_dim // nh1                              # 8
    K = 3 + 2 * (nh1 - 1)                             # 5  (largest depthwise kernel)
    d = max(int(dim / 4), 64)                         # 64
    hidden = int(dim * CFG['mlp_ratio'])              # 32

    keys = iter(jax.random.split(key, 64))

    def rnd(shape, s=0.1):
        return s * jax.random.normal(next(keys), shape, jnp.float32)

    p = {}
    p['ln1_g'] = (1.0 + rnd((dim,))).reshape(dim, 1)
    p['ln1_b'] = rnd((dim,)).reshape(dim, 1)
    p['ln2_g'] = (1.0 + rnd((dim,))).reshape(dim, 1)
    p['ln2_b'] = rnd((dim,)).reshape(dim, 1)

    # ---- sub_Conv (MSC): per-head BN + 1x1 conv + depthwise KxK conv ----
    pw_w = jnp.zeros((conv_dim, conv_dim), jnp.float32)       # block-diag (out, in)
    pw_b, dw_rows, dw_b = [], [], []
    for i in range(nh1):
        Ki = 3 + 2 * i
        gamma = 1.0 + rnd((Cg,)); beta = rnd((Cg,))
        mean = rnd((Cg,)); var = 0.5 + jnp.abs(rnd((Cg,), 1.0))
        scale, shift = _bn_fold(gamma, beta, mean, var)        # eval-mode BN, folded
        w1 = rnd((Cg, Cg), 0.2)                                # torch (out, in), no bias
        pw_w = pw_w.at[i * Cg:(i + 1) * Cg, i * Cg:(i + 1) * Cg].set(w1 * scale[None, :])
        pw_b.append(w1 @ shift)
        dw = rnd((Cg, Ki, Ki), 0.2)                            # depthwise (Cg,1,Ki,Ki) squeezed
        pp = (K - Ki) // 2                                     # centre smaller kernels in 5x5
        dw_rows.append(jnp.pad(dw, ((0, 0), (pp, pp), (pp, pp))).reshape(Cg, K * K))
        dw_b.append(rnd((Cg,)))
    p['pw_w'] = pw_w
    p['pw_b'] = jnp.concatenate(pw_b).reshape(conv_dim, 1)
    p['dw_w'] = jnp.concatenate(dw_rows, axis=0)               # (conv_dim, 25)
    p['dw_b'] = jnp.concatenate(dw_b).reshape(conv_dim, 1)

    # proj0: grouped 1x1 conv (groups = conv_dim // nh1) as a dense matmul whose
    # COLUMNS are permuted so it consumes the heads in plain concatenated order
    # (the torch cat/reshape interleave is folded in here); the following
    # BatchNorm is folded into its rows / bias.
    groups = conv_dim // nh1
    in_pg = conv_dim // groups        # == nh1 (expand_ratio == 1)
    out_pg = conv_dim // groups
    w0 = rnd((conv_dim, in_pg), 0.2)
    b0 = rnd((conv_dim,))
    dense_cat = jnp.zeros((conv_dim, conv_dim), jnp.float32)
    for co in range(conv_dim):
        g = co // out_pg              # within-head channel index of this group
        for m in range(in_pg):        # m == head index of the group's m-th input
            dense_cat = dense_cat.at[co, m * Cg + g].set(w0[co, m])
    gamma2 = 1.0 + rnd((conv_dim,)); beta2 = rnd((conv_dim,))
    mean2 = rnd((conv_dim,)); var2 = 0.5 + jnp.abs(rnd((conv_dim,), 1.0))
    scale2, shift2 = _bn_fold(gamma2, beta2, mean2, var2)
    p['p0_w'] = dense_cat * scale2[:, None]
    p['p0_b'] = (b0 * scale2 + shift2).reshape(conv_dim, 1)
    p['p1_w'] = rnd((conv_dim, conv_dim), 0.2)                 # (out, in)
    p['p1_b'] = rnd((conv_dim,)).reshape(conv_dim, 1)

    # ---- sub_Attention (MSA) ----
    p['qkv_w'] = rnd((3 * trans_dim, trans_dim), 0.2)          # Linear, no bias, (out, in)
    p['out_w'] = rnd((trans_dim, trans_dim), 0.2)
    p['out_b'] = rnd((trans_dim,)).reshape(trans_dim, 1)

    # ---- SK-style fusion ----
    p['fc_w'] = rnd((d, dim), 0.2)                             # 1x1 conv, no bias
    p['fca_w'] = rnd((conv_dim, d), 0.2)
    p['fca_b'] = rnd((conv_dim,)).reshape(conv_dim, 1)
    p['fcb_w'] = rnd((trans_dim, d), 0.2)
    p['fcb_b'] = rnd((trans_dim,)).reshape(trans_dim, 1)

    # ---- FeedForward ----
    p['mlp_w1'] = rnd((hidden, dim), 0.2)
    p['mlp_w2'] = rnd((dim, hidden), 0.2)
    return p


# --------------------------------- main ----------------------------------------

if __name__ == "__main__":
    key = jax.random.PRNGKey(0)
    pkey, xkey = jax.random.split(key)
    params = init_params(pkey)
    w_slab, a_slab = pack_params(params)           # LN folds + 2-slab packing
    x = jax.random.normal(xkey, (2, CFG['dim'], CFG['h'], CFG['w']), jnp.float32)
    fwd = jax.jit(encoder_layer_forward)
    out = fwd(x, w_slab, a_slab)
    jax.block_until_ready(out)
    assert out.shape == x.shape and out.dtype == jnp.float32
    assert bool(jnp.all(jnp.isfinite(out)))
    print("KERNEL_OK")
</pallas_src>

<mosaic_0001>
module attributes {stable_mosaic.version = 11 : i64} {
  func.func @encoder_kernel(%arg0: i32, %arg1: memref<1x32x256xf32, #tpu.memory_space<vmem>>, %arg2: memref<272x64xbf16, #tpu.memory_space<vmem>>, %arg3: memref<208x25xf32, #tpu.memory_space<vmem>>, %arg4: memref<1x32x256xf32, #tpu.memory_space<vmem>>) attributes {dimension_semantics = [#tpu.dimension_semantics<parallel>], iteration_bounds = array<i64: 2>, scalar_prefetch = 0 : i64, scratch_operands = 0 : i64, tpu.core_type = #tpu.core_type<tc>, window_params = [{transform_indices = @transform_0, window_bounds = array<i64: 1, 32, 256>}, {pipeline_mode = #tpu.pipeline_mode<synchronous>, transform_indices = @transform_1, window_bounds = array<i64: 272, 64>}, {pipeline_mode = #tpu.pipeline_mode<synchronous>, transform_indices = @transform_2, window_bounds = array<i64: 208, 25>}, {transform_indices = @transform_3, window_bounds = array<i64: 1, 32, 256>}]} {
    %c0 = arith.constant 0 : index
    %c0_0 = arith.constant 0 : index
    %c0_1 = arith.constant 0 : index
    %0 = vector.load %arg1[%c0, %c0_0, %c0_1] : memref<1x32x256xf32, #tpu.memory_space<vmem>>, vector<1x32x256xf32>
    %1 = vector.shape_cast %0 : vector<1x32x256xf32> to vector<32x256xf32>
    %cst = arith.constant dense<0.000000e+00> : vector<256xf32>
    %2 = vector.multi_reduction <add>, %1, %cst [0] : vector<32x256xf32> to vector<256xf32>
    %3 = vector.shape_cast %2 : vector<256xf32> to vector<1x256xf32>
    %cst_2 = arith.constant 3.200000e+01 : f32
    %4 = vector.broadcast %cst_2 : f32 to vector<1x256xf32>
    %5 = arith.divf %3, %4 : vector<1x256xf32>
    %6 = vector.broadcast %5 : vector<1x256xf32> to vector<32x256xf32>
    %7 = arith.subf %1, %6 : vector<32x256xf32>
    %8 = arith.mulf %7, %7 : vector<32x256xf32>
    %cst_3 = arith.constant dense<0.000000e+00> : vector<256xf32>
    %9 = vector.multi_reduction <add>, %8, %cst_3 [0] : vector<32x256xf32> to vector<256xf32>
    %10 = vector.shape_cast %9 : vector<256xf32> to vector<1x256xf32>
    %cst_4 = arith.constant 3.200000e+01 : f32
    %11 = vector.broadcast %cst_4 : f32 to vector<1x256xf32>
    %12 = arith.divf %10, %11 : vector<1x256xf32>
    %13 = vector.broadcast %5 : vector<1x256xf32> to vector<32x256xf32>
    %14 = arith.subf %1, %13 : vector<32x256xf32>
    %cst_5 = arith.constant 9.99999974E-6 : f32
    %15 = vector.broadcast %cst_5 : f32 to vector<1x256xf32>
    %16 = arith.addf %12, %15 : vector<1x256xf32>
    %17 = math.rsqrt %16 : vector<1x256xf32>
    %18 = vector.broadcast %17 : vector<1x256xf32> to vector<32x256xf32>
    %19 = arith.mulf %14, %18 : vector<32x256xf32>
    %20 = vector.extract_strided_slice %19 {offsets = [0, 0], sizes = [16, 256], strides = [1, 1]} : vector<32x256xf32> to vector<16x256xf32>
    %21 = vector.extract_strided_slice %19 {offsets = [16, 0], sizes = [16, 256], strides = [1, 1]} : vector<32x256xf32> to vector<16x256xf32>
    %c0_6 = arith.constant 0 : index
    %c0_7 = arith.constant 0 : index
    %22 = vector.load %arg2[%c0_6, %c0_7] : memref<272x64xbf16, #tpu.memory_space<vmem>>, vector<16x16xbf16>
    %c16 = arith.constant 16 : index
    %c0_8 = arith.constant 0 : index
    %23 = vector.load %arg3[%c16, %c0_8] : memref<208x25xf32, #tpu.memory_space<vmem>>, vector<16x1xf32>
    %24 = arith.truncf %20 : vector<16x256xf32> to vector<16x256xbf16>
    %cst_9 = arith.constant dense<0.000000e+00> : vector<16x256xf32>
    %25 = tpu.matmul %22, %24, %cst_9 {dimension_numbers = #tpu.dot_dimension_numbers<[1], [0], [0], [1], [0, 0, 1, 1], [], []>} : vector<16x16xbf16>, vector<16x256xbf16>, vector<16x256xf32> -> vector<16x256xf32>
    %26 = vector.broadcast %23 : vector<16x1xf32> to vector<16x256xf32>
    %27 = arith.addf %25, %26 : vector<16x256xf32>
    %28 = tpu.iota {dimensions = array<i32: 1>} : vector<1x256xi32>
    %c15_i32 = arith.constant 15 : i32
    %29 = vector.broadcast %c15_i32 : i32 to vector<1x256xi32>
    %30 = arith.andi %28, %29 : vector<1x256xi32>
    %c32_i32 = arith.constant 32 : i32
    %31 = vector.broadcast %c32_i32 : i32 to vector<1x256xi32>
    %32 = arith.cmpi sge, %28, %31 : vector<1x256xi32>
    %c288_i32 = arith.constant 288 : i32
    %33 = vector.broadcast %c288_i32 : i32 to vector<1x256xi32>
    %34 = arith.cmpi slt, %28, %33 : vector<1x256xi32>
    %35 = arith.andi %32, %34 : vector<1x256xi1>
    %36 = arith.extui %35 : vector<1x256xi1> to vector<1x256xi32>
    %37 = arith.sitofp %36 : vector<1x256xi32> to vector<1x256xf32>
    %c16_i32 = arith.constant 16 : i32
    %38 = vector.broadcast %c16_i32 : i32 to vector<1x256xi32>
    %39 = arith.cmpi sge, %28, %38 : vector<1x256xi32>
    %c272_i32 = arith.constant 272 : i32
    %40 = vector.broadcast %c272_i32 : i32 to vector<1x256xi32>
    %41 = arith.cmpi slt, %28, %40 : vector<1x256xi32>
    %42 = arith.andi %39, %41 : vector<1x256xi1>
    %43 = arith.extui %42 : vector<1x256xi1> to vector<1x256xi32>
    %44 = arith.sitofp %43 : vector<1x256xi32> to vector<1x256xf32>
    %c0_i32 = arith.constant 0 : i32
    %45 = vector.broadcast %c0_i32 : i32 to vector<1x256xi32>
    %46 = arith.cmpi sge, %28, %45 : vector<1x256xi32>
    %c256_i32 = arith.constant 256 : i32
    %47 = vector.broadcast %c256_i32 : i32 to vector<1x256xi32>
    %48 = arith.cmpi slt, %28, %47 : vector<1x256xi32>
    %49 = arith.andi %46, %48 : vector<1x256xi1>
    %50 = arith.extui %49 : vector<1x256xi1> to vector<1x256xi32>
    %51 = arith.sitofp %50 : vector<1x256xi32> to vector<1x256xf32>
    %c-16_i32 = arith.constant -16 : i32
    %52 = vector.broadcast %c-16_i32 : i32 to vector<1x256xi32>
    %53 = arith.cmpi sge, %28, %52 : vector<1x256xi32>
    %c240_i32 = arith.constant 240 : i32
    %54 = vector.broadcast %c240_i32 : i32 to vector<1x256xi32>
    %55 = arith.cmpi slt, %28, %54 : vector<1x256xi32>
    %56 = arith.andi %53, %55 : vector<1x256xi1>
    %57 = arith.extui %56 : vector<1x256xi1> to vector<1x256xi32>
    %58 = arith.sitofp %57 : vector<1x256xi32> to vector<1x256xf32>
    %c-32_i32 = arith.constant -32 : i32
    %59 = vector.broadcast %c-32_i32 : i32 to vector<1x256xi32>
    %60 = arith.cmpi sge, %28, %59 : vector<1x256xi32>
    %c224_i32 = arith.constant 224 : i32
    %61 = vector.broadcast %c224_i32 : i32 to vector<1x256xi32>
    %62 = arith.cmpi slt, %28, %61 : vector<1x256xi32>
    %63 = arith.andi %60, %62 : vector<1x256xi1>
    %64 = arith.extui %63 : vector<1x256xi1> to vector<1x256xi32>
    %65 = arith.sitofp %64 : vector<1x256xi32> to vector<1x256xf32>
    %c2_i32 = arith.constant 2 : i32
    %66 = vector.broadcast %c2_i32 : i32 to vector<1x256xi32>
    %67 = arith.cmpi sge, %30, %66 : vector<1x256xi32>
    %c18_i32 = arith.constant 18 : i32
    %68 = vector.broadcast %c18_i32 : i32 to vector<1x256xi32>
    %69 = arith.cmpi slt, %30, %68 : vector<1x256xi32>
    %70 = arith.andi %67, %69 : vector<1x256xi1>
    %71 = arith.extui %70 : vector<1x256xi1> to vector<1x256xi32>
    %72 = arith.sitofp %71 : vector<1x256xi32> to vector<1x256xf32>
    %c1_i32 = arith.constant 1 : i32
    %73 = vector.broadcast %c1_i32 : i32 to vector<1x256xi32>
    %74 = arith.cmpi sge, %30, %73 : vector<1x256xi32>
    %c17_i32 = arith.constant 17 : i32
    %75 = vector.broadcast %c17_i32 : i32 to vector<1x256xi32>
    %76 = arith.cmpi slt, %30, %75 : vector<1x256xi32>
    %77 = arith.andi %74, %76 : vector<1x256xi1>
    %78 = arith.extui %77 : vector<1x256xi1> to vector<1x256xi32>
    %79 = arith.sitofp %78 : vector<1x256xi32> to vector<1x256xf32>
    %c0_i32_10 = arith.constant 0 : i32
    %80 = vector.broadcast %c0_i32_10 : i32 to vector<1x256xi32>
    %81 = arith.cmpi sge, %30, %80 : vector<1x256xi32>
    %c16_i32_11 = arith.constant 16 : i32
    %82 = vector.broadcast %c16_i32_11 : i32 to vector<1x256xi32>
    %83 = arith.cmpi slt, %30, %82 : vector<1x256xi32>
    %84 = arith.andi %81, %83 : vector<1x256xi1>
    %85 = arith.extui %84 : vector<1x256xi1> to vector<1x256xi32>
    %86 = arith.sitofp %85 : vector<1x256xi32> to vector<1x256xf32>
    %c-1_i32 = arith.constant -1 : i32
    %87 = vector.broadcast %c-1_i32 : i32 to vector<1x256xi32>
    %88 = arith.cmpi sge, %30, %87 : vector<1x256xi32>
    %c15_i32_12 = arith.constant 15 : i32
    %89 = vector.broadcast %c15_i32_12 : i32 to vector<1x256xi32>
    %90 = arith.cmpi slt, %30, %89 : vector<1x256xi32>
    %91 = arith.andi %88, %90 : vector<1x256xi1>
    %92 = arith.extui %91 : vector<1x256xi1> to vector<1x256xi32>
    %93 = arith.sitofp %92 : vector<1x256xi32> to vector<1x256xf32>
    %c-2_i32 = arith.constant -2 : i32
    %94 = vector.broadcast %c-2_i32 : i32 to vector<1x256xi32>
    %95 = arith.cmpi sge, %30, %94 : vector<1x256xi32>
    %c14_i32 = arith.constant 14 : i32
    %96 = vector.broadcast %c14_i32 : i32 to vector<1x256xi32>
    %97 = arith.cmpi slt, %30, %96 : vector<1x256xi32>
    %98 = arith.andi %95, %97 : vector<1x256xi1>
    %99 = arith.extui %98 : vector<1x256xi1> to vector<1x256xi32>
    %100 = arith.sitofp %99 : vector<1x256xi32> to vector<1x256xf32>
    %c0_13 = arith.constant 0 : index
    %c0_14 = arith.constant 0 : index
    %101 = vector.load %arg3[%c0_13, %c0_14] : memref<208x25xf32, #tpu.memory_space<vmem>>, vector<16x25xf32>
    %102 = vector.extract_strided_slice %27 {offsets = [0, 0], sizes = [8, 256], strides = [1, 1]} : vector<16x256xf32> to vector<8x256xf32>
    %cst_15 = arith.constant 0.000000e+00 : f32
    %103 = vector.broadcast %cst_15 : f32 to vector<8x256xf32>
    %c17_i32_16 = arith.constant 17 : i32
    %104 = tpu.dynamic_rotate %102 by %c17_i32_16 dim 1 : vector<8x256xf32>, i32 -> vector<8x256xf32>
    %105 = arith.mulf %44, %79 : vector<1x256xf32>
    %106 = vector.extract_strided_slice %101 {offsets = [0, 6], sizes = [8, 1], strides = [1, 1]} : vector<16x25xf32> to vector<8x1xf32>
    %107 = vector.broadcast %105 : vector<1x256xf32> to vector<8x256xf32>
    %108 = arith.mulf %104, %107 : vector<8x256xf32>
    %109 = vector.broadcast %106 : vector<8x1xf32> to vector<8x256xf32>
    %110 = arith.mulf %108, %109 : vector<8x256xf32>
    %111 = arith.addf %103, %110 : vector<8x256xf32>
    %c16_i32_17 = arith.constant 16 : i32
    %112 = tpu.dynamic_rotate %102 by %c16_i32_17 dim 1 : vector<8x256xf32>, i32 -> vector<8x256xf32>
    %113 = arith.mulf %44, %86 : vector<1x256xf32>
    %114 = vector.extract_strided_slice %101 {offsets = [0, 7], sizes = [8, 1], strides = [1, 1]} : vector<16x25xf32> to vector<8x1xf32>
    %115 = vector.broadcast %113 : vector<1x256xf32> to vector<8x256xf32>
    %116 = arith.mulf %112, %115 : vector<8x256xf32>
    %117 = vector.broadcast %114 : vector<8x1xf32> to vector<8x256xf32>
    %118 = arith.mulf %116, %117 : vector<8x256xf32>
    %119 = arith.addf %111, %118 : vector<8x256xf32>
    %c15_i32_18 = arith.constant 15 : i32
    %120 = tpu.dynamic_rotate %102 by %c15_i32_18 dim 1 : vector<8x256xf32>, i32 -> vector<8x256xf32>
    %121 = arith.mulf %44, %93 : vector<1x256xf32>
    %122 = vector.extract_strided_slice %101 {offsets = [0, 8], sizes = [8, 1], strides = [1, 1]} : vector<16x25xf32> to vector<8x1xf32>
    %123 = vector.broadcast %121 : vector<1x256xf32> to vector<8x256xf32>
    %124 = arith.mulf %120, %123 : vector<8x256xf32>
    %125 = vector.broadcast %122 : vector<8x1xf32> to vector<8x256xf32>
    %126 = arith.mulf %124, %125 : vector<8x256xf32>
    %127 = arith.addf %119, %126 : vector<8x256xf32>
    %c1_i32_19 = arith.constant 1 : i32
    %128 = tpu.dynamic_rotate %102 by %c1_i32_19 dim 1 : vector<8x256xf32>, i32 -> vector<8x256xf32>
    %129 = arith.mulf %51, %79 : vector<1x256xf32>
    %130 = vector.extract_strided_slice %101 {offsets = [0, 11], sizes = [8, 1], strides = [1, 1]} : vector<16x25xf32> to vector<8x1xf32>
    %131 = vector.broadcast %129 : vector<1x256xf32> to vector<8x256xf32>
    %132 = arith.mulf %128, %131 : vector<8x256xf32>
    %133 = vector.broadcast %130 : vector<8x1xf32> to vector<8x256xf32>
    %134 = arith.mulf %132, %133 : vector<8x256xf32>
    %135 = arith.addf %127, %134 : vector<8x256xf32>
    %136 = arith.mulf %51, %86 : vector<1x256xf32>
    %137 = vector.extract_strided_slice %101 {offsets = [0, 12], sizes = [8, 1], strides = [1, 1]} : vector<16x25xf32> to vector<8x1xf32>
    %138 = vector.broadcast %136 : vector<1x256xf32> to vector<8x256xf32>
    %139 = arith.mulf %102, %138 : vector<8x256xf32>
    %140 = vector.broadcast %137 : vector<8x1xf32> to vector<8x256xf32>
    %141 = arith.mulf %139, %140 : vector<8x256xf32>
    %142 = arith.addf %135, %141 : vector<8x256xf32>
    %c255_i32 = arith.constant 255 : i32
    %143 = tpu.dynamic_rotate %102 by %c255_i32 dim 1 : vector<8x256xf32>, i32 -> vector<8x256xf32>
    %144 = arith.mulf %51, %93 : vector<1x256xf32>
    %145 = vector.extract_strided_slice %101 {offsets = [0, 13], sizes = [8, 1], strides = [1, 1]} : vector<16x25xf32> to vector<8x1xf32>
    %146 = vector.broadcast %144 : vector<1x256xf32> to vector<8x256xf32>
    %147 = arith.mulf %143, %146 : vector<8x256xf32>
    %148 = vector.broadcast %145 : vector<8x1xf32> to vector<8x256xf32>
    %149 = arith.mulf %147, %148 : vector<8x256xf32>
    %150 = arith.addf %142, %149 : vector<8x256xf32>
    %c241_i32 = arith.constant 241 : i32
    %151 = tpu.dynamic_rotate %102 by %c241_i32 dim 1 : vector<8x256xf32>, i32 -> vector<8x256xf32>
    %152 = arith.mulf %58, %79 : vector<1x256xf32>
    %153 = vector.extract_strided_slice %101 {offsets = [0, 16], sizes = [8, 1], strides = [1, 1]} : vector<16x25xf32> to vector<8x1xf32>
    %154 = vector.broadcast %152 : vector<1x256xf32> to vector<8x256xf32>
    %155 = arith.mulf %151, %154 : vector<8x256xf32>
    %156 = vector.broadcast %153 : vector<8x1xf32> to vector<8x256xf32>
    %157 = arith.mulf %155, %156 : vector<8x256xf32>
    %158 = arith.addf %150, %157 : vector<8x256xf32>
    %c240_i32_20 = arith.constant 240 : i32
    %159 = tpu.dynamic_rotate %102 by %c240_i32_20 dim 1 : vector<8x256xf32>, i32 -> vector<8x256xf32>
    %160 = arith.mulf %58, %86 : vector<1x256xf32>
    %161 = vector.extract_strided_slice %101 {offsets = [0, 17], sizes = [8, 1], strides = [1, 1]} : vector<16x25xf32> to vector<8x1xf32>
    %162 = vector.broadcast %160 : vector<1x256xf32> to vector<8x256xf32>
    %163 = arith.mulf %159, %162 : vector<8x256xf32>
    %164 = vector.broadcast %161 : vector<8x1xf32> to vector<8x256xf32>
    %165 = arith.mulf %163, %164 : vector<8x256xf32>
    %166 = arith.addf %158, %165 : vector<8x256xf32>
    %c239_i32 = arith.constant 239 : i32
    %167 = tpu.dynamic_rotate %102 by %c239_i32 dim 1 : vector<8x256xf32>, i32 -> vector<8x256xf32>
    %168 = arith.mulf %58, %93 : vector<1x256xf32>
    %169 = vector.extract_strided_slice %101 {offsets = [0, 18], sizes = [8, 1], strides = [1, 1]} : vector<16x25xf32> to vector<8x1xf32>
    %170 = vector.broadcast %168 : vector<1x256xf32> to vector<8x256xf32>
    %171 = arith.mulf %167, %170 : vector<8x256xf32>
    %172 = vector.broadcast %169 : vector<8x1xf32> to vector<8x256xf32>
    %173 = arith.mulf %171, %172 : vector<8x256xf32>
    %174 = arith.addf %166, %173 : vector<8x256xf32>
    %175 = vector.extract_strided_slice %27 {offsets = [8, 0], sizes = [8, 256], strides = [1, 1]} : vector<16x256xf32> to vector<8x256xf32>
    %cst_21 = arith.constant 0.000000e+00 : f32
    %176 = vector.broadcast %cst_21 : f32 to vector<8x256xf32>
    %c34_i32 = arith.constant 34 : i32
    %177 = tpu.dynamic_rotate %175 by %c34_i32 dim 1 : vector<8x256xf32>, i32 -> vector<8x256xf32>
    %178 = arith.mulf %37, %72 : vector<1x256xf32>
    %179 = vector.extract_strided_slice %101 {offsets = [8, 0], sizes = [8, 1], strides = [1, 1]} : vector<16x25xf32> to vector<8x1xf32>
    %180 = vector.broadcast %178 : vector<1x256xf32> to vector<8x256xf32>
    %181 = arith.mulf %177, %180 : vector<8x256xf32>
    %182 = vector.broadcast %179 : vector<8x1xf32> to vector<8x256xf32>
    %183 = arith.mulf %181, %182 : vector<8x256xf32>
    %184 = arith.addf %176, %183 : vector<8x256xf32>
    %c33_i32 = arith.constant 33 : i32
    %185 = tpu.dynamic_rotate %175 by %c33_i32 dim 1 : vector<8x256xf32>, i32 -> vector<8x256xf32>
    %186 = arith.mulf %37, %79 : vector<1x256xf32>
    %187 = vector.extract_strided_slice %101 {offsets = [8, 1], sizes = [8, 1], strides = [1, 1]} : vector<16x25xf32> to vector<8x1xf32>
    %188 = vector.broadcast %186 : vector<1x256xf32> to vector<8x256xf32>
    %189 = arith.mulf %185, %188 : vector<8x256xf32>
    %190 = vector.broadcast %187 : vector<8x1xf32> to vector<8x256xf32>
    %191 = arith.mulf %189, %190 : vector<8x256xf32>
    %192 = arith.addf %184, %191 : vector<8x256xf32>
    %c32_i32_22 = arith.constant 32 : i32
    %193 = tpu.dynamic_rotate %175 by %c32_i32_22 dim 1 : vector<8x256xf32>, i32 -> vector<8x256xf32>
    %194 = arith.mulf %37, %86 : vector<1x256xf32>
    %195 = vector.extract_strided_slice %101 {offsets = [8, 2], sizes = [8, 1], strides = [1, 1]} : vector<16x25xf32> to vector<8x1xf32>
    %196 = vector.broadcast %194 : vector<1x256xf32> to vector<8x256xf32>
    %197 = arith.mulf %193, %196 : vector<8x256xf32>
    %198 = vector.broadcast %195 : vector<8x1xf32> to vector<8x256xf32>
    %199 = arith.mulf %197, %198 : vector<8x256xf32>
    %200 = arith.addf %192, %199 : vector<8x256xf32>
    %c31_i32 = arith.constant 31 : i32
    %201 = tpu.dynamic_rotate %175 by %c31_i32 dim 1 : vector<8x256xf32>, i32 -> vector<8x256xf32>
    %202 = arith.mulf %37, %93 : vector<1x256xf32>
    %203 = vector.extract_strided_slice %101 {offsets = [8, 3], sizes = [8, 1], strides = [1, 1]} : vector<16x25xf32> to vector<8x1xf32>
    %204 = vector.broadcast %202 : vector<1x256xf32> to vector<8x256xf32>
    %205 = arith.mulf %201, %204 : vector<8x256xf32>
    %206 = vector.broadcast %203 : vector<8x1xf32> to vector<8x256xf32>
    %207 = arith.mulf %205, %206 : vector<8x256xf32>
    %208 = arith.addf %200, %207 : vector<8x256xf32>
    %c30_i32 = arith.constant 30 : i32
    %209 = tpu.dynamic_rotate %175 by %c30_i32 dim 1 : vector<8x256xf32>, i32 -> vector<8x256xf32>
    %210 = arith.mulf %37, %100 : vector<1x256xf32>
    %211 = vector.extract_strided_slice %101 {offsets = [8, 4], sizes = [8, 1], strides = [1, 1]} : vector<16x25xf32> to vector<8x1xf32>
    %212 = vector.broadcast %210 : vector<1x256xf32> to vector<8x256xf32>
    %213 = arith.mulf %209, %212 : vector<8x256xf32>
    %214 = vector.broadcast %211 : vector<8x1xf32> to vector<8x256xf32>
    %215 = arith.mulf %213, %214 : vector<8x256xf32>
    %216 = arith.addf %208, %215 : vector<8x256xf32>
    %c18_i32_23 = arith.constant 18 : i32
    %217 = tpu.dynamic_rotate %175 by %c18_i32_23 dim 1 : vector<8x256xf32>, i32 -> vector<8x256xf32>
    %218 = arith.mulf %44, %72 : vector<1x256xf32>
    %219 = vector.extract_strided_slice %101 {offsets = [8, 5], sizes = [8, 1], strides = [1, 1]} : vector<16x25xf32> to vector<8x1xf32>
    %220 = vector.broadcast %218 : vector<1x256xf32> to vector<8x256xf32>
    %221 = arith.mulf %217, %220 : vector<8x256xf32>
    %222 = vector.broadcast %219 : vector<8x1xf32> to vector<8x256xf32>
    %223 = arith.mulf %221, %222 : vector<8x256xf32>
    %224 = arith.addf %216, %223 : vector<8x256xf32>
    %c17_i32_24 = arith.constant 17 : i32
    %225 = tpu.dynamic_rotate %175 by %c17_i32_24 dim 1 : vector<8x256xf32>, i32 -> vector<8x256xf32>
    %226 = arith.mulf %44, %79 : vector<1x256xf32>
    %227 = vector.extract_strided_slice %101 {offsets = [8, 6], sizes = [8, 1], strides = [1, 1]} : vector<16x25xf32> to vector<8x1xf32>
    %228 = vector.broadcast %226 : vector<1x256xf32> to vector<8x256xf32>
    %229 = arith.mulf %225, %228 : vector<8x256xf32>
    %230 = vector.broadcast %227 : vector<8x1xf32> to vector<8x256xf32>
    %231 = arith.mulf %229, %230 : vector<8x256xf32>
    %232 = arith.addf %224, %231 : vector<8x256xf32>
    %c16_i32_25 = arith.constant 16 : i32
    %233 = tpu.dynamic_rotate %175 by %c16_i32_25 dim 1 : vector<8x256xf32>, i32 -> vector<8x256xf32>
    %234 = arith.mulf %44, %86 : vector<1x256xf32>
    %235 = vector.extract_strided_slice %101 {offsets = [8, 7], sizes = [8, 1], strides = [1, 1]} : vector<16x25xf32> to vector<8x1xf32>
    %236 = vector.broadcast %234 : vector<1x256xf32> to vector<8x256xf32>
    %237 = arith.mulf %233, %236 : vector<8x256xf32>
    %238 = vector.broadcast %235 : vector<8x1xf32> to vector<8x256xf32>
    %239 = arith.mulf %237, %238 : vector<8x256xf32>
    %240 = arith.addf %232, %239 : vector<8x256xf32>
    %c15_i32_26 = arith.constant 15 : i32
    %241 = tpu.dynamic_rotate %175 by %c15_i32_26 dim 1 : vector<8x256xf32>, i32 -> vector<8x256xf32>
    %242 = arith.mulf %44, %93 : vector<1x256xf32>
    %243 = vector.extract_strided_slice %101 {offsets = [8, 8], sizes = [8, 1], strides = [1, 1]} : vector<16x25xf32> to vector<8x1xf32>
    %244 = vector.broadcast %242 : vector<1x256xf32> to vector<8x256xf32>
    %245 = arith.mulf %241, %244 : vector<8x256xf32>
    %246 = vector.broadcast %243 : vector<8x1xf32> to vector<8x256xf32>
    %247 = arith.mulf %245, %246 : vector<8x256xf32>
    %248 = arith.addf %240, %247 : vector<8x256xf32>
    %c14_i32_27 = arith.constant 14 : i32
    %249 = tpu.dynamic_rotate %175 by %c14_i32_27 dim 1 : vector<8x256xf32>, i32 -> vector<8x256xf32>
    %250 = arith.mulf %44, %100 : vector<1x256xf32>
    %251 = vector.extract_strided_slice %101 {offsets = [8, 9], sizes = [8, 1], strides = [1, 1]} : vector<16x25xf32> to vector<8x1xf32>
    %252 = vector.broadcast %250 : vector<1x256xf32> to vector<8x256xf32>
    %253 = arith.mulf %249, %252 : vector<8x256xf32>
    %254 = vector.broadcast %251 : vector<8x1xf32> to vector<8x256xf32>
    %255 = arith.mulf %253, %254 : vector<8x256xf32>
    %256 = arith.addf %248, %255 : vector<8x256xf32>
    %c2_i32_28 = arith.constant 2 : i32
    %257 = tpu.dynamic_rotate %175 by %c2_i32_28 dim 1 : vector<8x256xf32>, i32 -> vector<8x256xf32>
    %258 = arith.mulf %51, %72 : vector<1x256xf32>
    %259 = vector.extract_strided_slice %101 {offsets = [8, 10], sizes = [8, 1], strides = [1, 1]} : vector<16x25xf32> to vector<8x1xf32>
    %260 = vector.broadcast %258 : vector<1x256xf32> to vector<8x256xf32>
    %261 = arith.mulf %257, %260 : vector<8x256xf32>
    %262 = vector.broadcast %259 : vector<8x1xf32> to vector<8x256xf32>
    %263 = arith.mulf %261, %262 : vector<8x256xf32>
    %264 = arith.addf %256, %263 : vector<8x256xf32>
    %c1_i32_29 = arith.constant 1 : i32
    %265 = tpu.dynamic_rotate %175 by %c1_i32_29 dim 1 : vector<8x256xf32>, i32 -> vector<8x256xf32>
    %266 = arith.mulf %51, %79 : vector<1x256xf32>
    %267 = vector.extract_strided_slice %101 {offsets = [8, 11], sizes = [8, 1], strides = [1, 1]} : vector<16x25xf32> to vector<8x1xf32>
    %268 = vector.broadcast %266 : vector<1x256xf32> to vector<8x256xf32>
    %269 = arith.mulf %265, %268 : vector<8x256xf32>
    %270 = vector.broadcast %267 : vector<8x1xf32> to vector<8x256xf32>
    %271 = arith.mulf %269, %270 : vector<8x256xf32>
    %272 = arith.addf %264, %271 : vector<8x256xf32>
    %273 = arith.mulf %51, %86 : vector<1x256xf32>
    %274 = vector.extract_strided_slice %101 {offsets = [8, 12], sizes = [8, 1], strides = [1, 1]} : vector<16x25xf32> to vector<8x1xf32>
    %275 = vector.broadcast %273 : vector<1x256xf32> to vector<8x256xf32>
    %276 = arith.mulf %175, %275 : vector<8x256xf32>
    %277 = vector.broadcast %274 : vector<8x1xf32> to vector<8x256xf32>
    %278 = arith.mulf %276, %277 : vector<8x256xf32>
    %279 = arith.addf %272, %278 : vector<8x256xf32>
    %c255_i32_30 = arith.constant 255 : i32
    %280 = tpu.dynamic_rotate %175 by %c255_i32_30 dim 1 : vector<8x256xf32>, i32 -> vector<8x256xf32>
    %281 = arith.mulf %51, %93 : vector<1x256xf32>
    %282 = vector.extract_strided_slice %101 {offsets = [8, 13], sizes = [8, 1], strides = [1, 1]} : vector<16x25xf32> to vector<8x1xf32>
    %283 = vector.broadcast %281 : vector<1x256xf32> to vector<8x256xf32>
    %284 = arith.mulf %280, %283 : vector<8x256xf32>
    %285 = vector.broadcast %282 : vector<8x1xf32> to vector<8x256xf32>
    %286 = arith.mulf %284, %285 : vector<8x256xf32>
    %287 = arith.addf %279, %286 : vector<8x256xf32>
    %c254_i32 = arith.constant 254 : i32
    %288 = tpu.dynamic_rotate %175 by %c254_i32 dim 1 : vector<8x256xf32>, i32 -> vector<8x256xf32>
    %289 = arith.mulf %51, %100 : vector<1x256xf32>
    %290 = vector.extract_strided_slice %101 {offsets = [8, 14], sizes = [8, 1], strides = [1, 1]} : vector<16x25xf32> to vector<8x1xf32>
    %291 = vector.broadcast %289 : vector<1x256xf32> to vector<8x256xf32>
    %292 = arith.mulf %288, %291 : vector<8x256xf32>
    %293 = vector.broadcast %290 : vector<8x1xf32> to vector<8x256xf32>
    %294 = arith.mulf %292, %293 : vector<8x256xf32>
    %295 = arith.addf %287, %294 : vector<8x256xf32>
    %c242_i32 = arith.constant 242 : i32
    %296 = tpu.dynamic_rotate %175 by %c242_i32 dim 1 : vector<8x256xf32>, i32 -> vector<8x256xf32>
    %297 = arith.mulf %58, %72 : vector<1x256xf32>
    %298 = vector.extract_strided_slice %101 {offsets = [8, 15], sizes = [8, 1], strides = [1, 1]} : vector<16x25xf32> to vector<8x1xf32>
    %299 = vector.broadcast %297 : vector<1x256xf32> to vector<8x256xf32>
    %300 = arith.mulf %296, %299 : vector<8x256xf32>
    %301 = vector.broadcast %298 : vector<8x1xf32> to vector<8x256xf32>
    %302 = arith.mulf %300, %301 : vector<8x256xf32>
    %303 = arith.addf %295, %302 : vector<8x256xf32>
    %c241_i32_31 = arith.constant 241 : i32
    %304 = tpu.dynamic_rotate %175 by %c241_i32_31 dim 1 : vector<8x256xf32>, i32 -> vector<8x256xf32>
    %305 = arith.mulf %58, %79 : vector<1x256xf32>
    %306 = vector.extract_strided_slice %101 {offsets = [8, 16], sizes = [8, 1], strides = [1, 1]} : vector<16x25xf32> to vector<8x1xf32>
    %307 = vector.broadcast %305 : vector<1x256xf32> to vector<8x256xf32>
    %308 = arith.mulf %304, %307 : vector<8x256xf32>
    %309 = vector.broadcast %306 : vector<8x1xf32> to vector<8x256xf32>
    %310 = arith.mulf %308, %309 : vector<8x256xf32>
    %311 = arith.addf %303, %310 : vector<8x256xf32>
    %c240_i32_32 = arith.constant 240 : i32
    %312 = tpu.dynamic_rotate %175 by %c240_i32_32 dim 1 : vector<8x256xf32>, i32 -> vector<8x256xf32>
    %313 = arith.mulf %58, %86 : vector<1x256xf32>
    %314 = vector.extract_strided_slice %101 {offsets = [8, 17], sizes = [8, 1], strides = [1, 1]} : vector<16x25xf32> to vector<8x1xf32>
    %315 = vector.broadcast %313 : vector<1x256xf32> to vector<8x256xf32>
    %316 = arith.mulf %312, %315 : vector<8x256xf32>
    %317 = vector.broadcast %314 : vector<8x1xf32> to vector<8x256xf32>
    %318 = arith.mulf %316, %317 : vector<8x256xf32>
    %319 = arith.addf %311, %318 : vector<8x256xf32>
    %c239_i32_33 = arith.constant 239 : i32
    %320 = tpu.dynamic_rotate %175 by %c239_i32_33 dim 1 : vector<8x256xf32>, i32 -> vector<8x256xf32>
    %321 = arith.mulf %58, %93 : vector<1x256xf32>
    %322 = vector.extract_strided_slice %101 {offsets = [8, 18], sizes = [8, 1], strides = [1, 1]} : vector<16x25xf32> to vector<8x1xf32>
    %323 = vector.broadcast %321 : vector<1x256xf32> to vector<8x256xf32>
    %324 = arith.mulf %320, %323 : vector<8x256xf32>
    %325 = vector.broadcast %322 : vector<8x1xf32> to vector<8x256xf32>
    %326 = arith.mulf %324, %325 : vector<8x256xf32>
    %327 = arith.addf %319, %326 : vector<8x256xf32>
    %c238_i32 = arith.constant 238 : i32
    %328 = tpu.dynamic_rotate %175 by %c238_i32 dim 1 : vector<8x256xf32>, i32 -> vector<8x256xf32>
    %329 = arith.mulf %58, %100 : vector<1x256xf32>
    %330 = vector.extract_strided_slice %101 {offsets = [8, 19], sizes = [8, 1], strides = [1, 1]} : vector<16x25xf32> to vector<8x1xf32>
    %331 = vector.broadcast %329 : vector<1x256xf32> to vector<8x256xf32>
    %332 = arith.mulf %328, %331 : vector<8x256xf32>
    %333 = vector.broadcast %330 : vector<8x1xf32> to vector<8x256xf32>
    %334 = arith.mulf %332, %333 : vector<8x256xf32>
    %335 = arith.addf %327, %334 : vector<8x256xf32>
    %c226_i32 = arith.constant 226 : i32
    %336 = tpu.dynamic_rotate %175 by %c226_i32 dim 1 : vector<8x256xf32>, i32 -> vector<8x256xf32>
    %337 = arith.mulf %65, %72 : vector<1x256xf32>
    %338 = vector.extract_strided_slice %101 {offsets = [8, 20], sizes = [8, 1], strides = [1, 1]} : vector<16x25xf32> to vector<8x1xf32>
    %339 = vector.broadcast %337 : vector<1x256xf32> to vector<8x256xf32>
    %340 = arith.mulf %336, %339 : vector<8x256xf32>
    %341 = vector.broadcast %338 : vector<8x1xf32> to vector<8x256xf32>
    %342 = arith.mulf %340, %341 : vector<8x256xf32>
    %343 = arith.addf %335, %342 : vector<8x256xf32>
    %c225_i32 = arith.constant 225 : i32
    %344 = tpu.dynamic_rotate %175 by %c225_i32 dim 1 : vector<8x256xf32>, i32 -> vector<8x256xf32>
    %345 = arith.mulf %65, %79 : vector<1x256xf32>
    %346 = vector.extract_strided_slice %101 {offsets = [8, 21], sizes = [8, 1], strides = [1, 1]} : vector<16x25xf32> to vector<8x1xf32>
    %347 = vector.broadcast %345 : vector<1x256xf32> to vector<8x256xf32>
    %348 = arith.mulf %344, %347 : vector<8x256xf32>
    %349 = vector.broadcast %346 : vector<8x1xf32> to vector<8x256xf32>
    %350 = arith.mulf %348, %349 : vector<8x256xf32>
    %351 = arith.addf %343, %350 : vector<8x256xf32>
    %c224_i32_34 = arith.constant 224 : i32
    %352 = tpu.dynamic_rotate %175 by %c224_i32_34 dim 1 : vector<8x256xf32>, i32 -> vector<8x256xf32>
    %353 = arith.mulf %65, %86 : vector<1x256xf32>
    %354 = vector.extract_strided_slice %101 {offsets = [8, 22], sizes = [8, 1], strides = [1, 1]} : vector<16x25xf32> to vector<8x1xf32>
    %355 = vector.broadcast %353 : vector<1x256xf32> to vector<8x256xf32>
    %356 = arith.mulf %352, %355 : vector<8x256xf32>
    %357 = vector.broadcast %354 : vector<8x1xf32> to vector<8x256xf32>
    %358 = arith.mulf %356, %357 : vector<8x256xf32>
    %359 = arith.addf %351, %358 : vector<8x256xf32>
    %c223_i32 = arith.constant 223 : i32
    %360 = tpu.dynamic_rotate %175 by %c223_i32 dim 1 : vector<8x256xf32>, i32 -> vector<8x256xf32>
    %361 = arith.mulf %65, %93 : vector<1x256xf32>
    %362 = vector.extract_strided_slice %101 {offsets = [8, 23], sizes = [8, 1], strides = [1, 1]} : vector<16x25xf32> to vector<8x1xf32>
    %363 = vector.broadcast %361 : vector<1x256xf32> to vector<8x256xf32>
    %364 = arith.mulf %360, %363 : vector<8x256xf32>
    %365 = vector.broadcast %362 : vector<8x1xf32> to vector<8x256xf32>
    %366 = arith.mulf %364, %365 : vector<8x256xf32>
    %367 = arith.addf %359, %366 : vector<8x256xf32>
    %c222_i32 = arith.constant 222 : i32
    %368 = tpu.dynamic_rotate %175 by %c222_i32 dim 1 : vector<8x256xf32>, i32 -> vector<8x256xf32>
    %369 = arith.mulf %65, %100 : vector<1x256xf32>
    %370 = vector.extract_strided_slice %101 {offsets = [8, 24], sizes = [8, 1], strides = [1, 1]} : vector<16x25xf32> to vector<8x1xf32>
    %371 = vector.broadcast %369 : vector<1x256xf32> to vector<8x256xf32>
    %372 = arith.mulf %368, %371 : vector<8x256xf32>
    %373 = vector.broadcast %370 : vector<8x1xf32> to vector<8x256xf32>
    %374 = arith.mulf %372, %373 : vector<8x256xf32>
    %375 = arith.addf %367, %374 : vector<8x256xf32>
    %376 = tpu.concatenate %174, %375 in 0 : vector<8x256xf32>, vector<8x256xf32> -> vector<16x256xf32>
    %c32 = arith.constant 32 : index
    %c0_35 = arith.constant 0 : index
    %377 = vector.load %arg3[%c32, %c0_35] : memref<208x25xf32, #tpu.memory_space<vmem>>, vector<16x1xf32>
    %378 = vector.broadcast %377 : vector<16x1xf32> to vector<16x256xf32>
    %379 = arith.addf %376, %378 : vector<16x256xf32>
    %cst_36 = arith.constant 0.000000e+00 : f32
    %380 = vector.broadcast %cst_36 : f32 to vector<16x256xf32>
    %381 = arith.cmpf oge, %379, %380 : vector<16x256xf32>
    %cst_37 = arith.constant 0.00999999977 : f32
    %382 = vector.broadcast %cst_37 : f32 to vector<16x256xf32>
    %383 = arith.mulf %382, %379 : vector<16x256xf32>
    %384 = arith.select %381, %379, %383 : vector<16x256xi1>, vector<16x256xf32>
    %c16_38 = arith.constant 16 : index
    %c0_39 = arith.constant 0 : index
    %385 = vector.load %arg2[%c16_38, %c0_39] : memref<272x64xbf16, #tpu.memory_space<vmem>>, vector<16x16xbf16>
    %c48 = arith.constant 48 : index
    %c0_40 = arith.constant 0 : index
    %386 = vector.load %arg3[%c48, %c0_40] : memref<208x25xf32, #tpu.memory_space<vmem>>, vector<16x1xf32>
    %387 = arith.truncf %384 : vector<16x256xf32> to vector<16x256xbf16>
    %cst_41 = arith.constant dense<0.000000e+00> : vector<16x256xf32>
    %388 = tpu.matmul %385, %387, %cst_41 {dimension_numbers = #tpu.dot_dimension_numbers<[1], [0], [0], [1], [0, 0, 1, 1], [], []>} : vector<16x16xbf16>, vector<16x256xbf16>, vector<16x256xf32> -> vector<16x256xf32>
    %389 = vector.broadcast %386 : vector<16x1xf32> to vector<16x256xf32>
    %390 = arith.addf %388, %389 : vector<16x256xf32>
    %cst_42 = arith.constant 0.000000e+00 : f32
    %391 = vector.broadcast %cst_42 : f32 to vector<16x256xf32>
    %392 = arith.cmpf oge, %390, %391 : vector<16x256xf32>
    %cst_43 = arith.constant 0.00999999977 : f32
    %393 = vector.broadcast %cst_43 : f32 to vector<16x256xf32>
    %394 = arith.mulf %393, %390 : vector<16x256xf32>
    %395 = arith.select %392, %390, %394 : vector<16x256xi1>, vector<16x256xf32>
    %c32_44 = arith.constant 32 : index
    %c0_45 = arith.constant 0 : index
    %396 = vector.load %arg2[%c32_44, %c0_45] : memref<272x64xbf16, #tpu.memory_space<vmem>>, vector<16x16xbf16>
    %c64 = arith.constant 64 : index
    %c0_46 = arith.constant 0 : index
    %397 = vector.load %arg3[%c64, %c0_46] : memref<208x25xf32, #tpu.memory_space<vmem>>, vector<16x1xf32>
    %398 = arith.truncf %395 : vector<16x256xf32> to vector<16x256xbf16>
    %cst_47 = arith.constant dense<0.000000e+00> : vector<16x256xf32>
    %399 = tpu.matmul %396, %398, %cst_47 {dimension_numbers = #tpu.dot_dimension_numbers<[1], [0], [0], [1], [0, 0, 1, 1], [], []>} : vector<16x16xbf16>, vector<16x256xbf16>, vector<16x256xf32> -> vector<16x256xf32>
    %400 = vector.broadcast %397 : vector<16x1xf32> to vector<16x256xf32>
    %401 = arith.addf %399, %400 : vector<16x256xf32>
    %c48_48 = arith.constant 48 : index
    %c0_49 = arith.constant 0 : index
    %402 = vector.load %arg2[%c48_48, %c0_49] : memref<272x64xbf16, #tpu.memory_space<vmem>>, vector<48x16xbf16>
    %c80 = arith.constant 80 : index
    %c0_50 = arith.constant 0 : index
    %403 = vector.load %arg3[%c80, %c0_50] : memref<208x25xf32, #tpu.memory_space<vmem>>, vector<48x1xf32>
    %404 = arith.truncf %21 : vector<16x256xf32> to vector<16x256xbf16>
    %cst_51 = arith.constant dense<0.000000e+00> : vector<48x256xf32>
    %405 = tpu.matmul %402, %404, %cst_51 {dimension_numbers = #tpu.dot_dimension_numbers<[1], [0], [0], [1], [0, 0, 1, 1], [], []>} : vector<48x16xbf16>, vector<16x256xbf16>, vector<48x256xf32> -> vector<48x256xf32>
    %406 = vector.broadcast %403 : vector<48x1xf32> to vector<48x256xf32>
    %407 = arith.addf %405, %406 : vector<48x256xf32>
    %408 = vector.extract_strided_slice %407 {offsets = [0, 0], sizes = [8, 256], strides = [1, 1]} : vector<48x256xf32> to vector<8x256xf32>
    %409 = vector.extract_strided_slice %407 {offsets = [16, 0], sizes = [8, 256], strides = [1, 1]} : vector<48x256xf32> to vector<8x256xf32>
    %410 = vector.extract_strided_slice %407 {offsets = [32, 0], sizes = [8, 256], strides = [1, 1]} : vector<48x256xf32> to vector<8x256xf32>
    %411 = arith.mulf %408, %408 : vector<8x256xf32>
    %cst_52 = arith.constant dense<0.000000e+00> : vector<256xf32>
    %412 = vector.multi_reduction <add>, %411, %cst_52 [0] : vector<8x256xf32> to vector<256xf32>
    %413 = vector.shape_cast %412 : vector<256xf32> to vector<1x256xf32>
    %cst_53 = arith.constant 1.000000e-24 : f32
    %414 = vector.broadcast %cst_53 : f32 to vector<1x256xf32>
    %415 = arith.maximumf %413, %414 : vector<1x256xf32>
    %416 = math.rsqrt %415 : vector<1x256xf32>
    %417 = vector.broadcast %416 : vector<1x256xf32> to vector<8x256xf32>
    %418 = arith.mulf %408, %417 : vector<8x256xf32>
    %419 = arith.mulf %409, %409 : vector<8x256xf32>
    %cst_54 = arith.constant dense<0.000000e+00> : vector<256xf32>
    %420 = vector.multi_reduction <add>, %419, %cst_54 [0] : vector<8x256xf32> to vector<256xf32>
    %421 = vector.shape_cast %420 : vector<256xf32> to vector<1x256xf32>
    %cst_55 = arith.constant 1.000000e-24 : f32
    %422 = vector.broadcast %cst_55 : f32 to vector<1x256xf32>
    %423 = arith.maximumf %421, %422 : vector<1x256xf32>
    %424 = math.rsqrt %423 : vector<1x256xf32>
    %425 = vector.broadcast %424 : vector<1x256xf32> to vector<8x256xf32>
    %426 = arith.mulf %409, %425 : vector<8x256xf32>
    %427 = arith.truncf %418 : vector<8x256xf32> to vector<8x256xbf16>
    %428 = arith.truncf %426 : vector<8x256xf32> to vector<8x256xbf16>
    %cst_56 = arith.constant dense<0.000000e+00> : vector<256x256xf32>
    %429 = tpu.matmul %427, %428, %cst_56 {dimension_numbers = #tpu.dot_dimension_numbers<[0], [0], [1], [1], [0, 1, 1, 1], [], []>} : vector<8x256xbf16>, vector<8x256xbf16>, vector<256x256xf32> -> vector<256x256xf32>
    %cst_57 = arith.constant 2.500000e-01 : f32
    %430 = vector.broadcast %cst_57 : f32 to vector<256x256xf32>
    %431 = arith.mulf %429, %430 : vector<256x256xf32>
    %432 = math.exp %431 : vector<256x256xf32>
    %cst_58 = arith.constant dense<0.000000e+00> : vector<256xf32>
    %433 = vector.multi_reduction <add>, %432, %cst_58 [1] : vector<256x256xf32> to vector<256xf32>
    %434 = vector.shape_cast %433 : vector<256xf32> to vector<256x1xf32>
    %435 = tpu.reciprocal %434 {approx = true} : vector<256x1xf32> -> vector<256x1xf32>
    %436 = vector.broadcast %435 : vector<256x1xf32> to vector<256x256xf32>
    %437 = arith.mulf %432, %436 : vector<256x256xf32>
    %438 = arith.truncf %437 : vector<256x256xf32> to vector<256x256xbf16>
    %439 = arith.truncf %410 : vector<8x256xf32> to vector<8x256xbf16>
    %cst_59 = arith.constant dense<0.000000e+00> : vector<256x8xf32>
    %440 = tpu.matmul %438, %439, %cst_59 {dimension_numbers = #tpu.dot_dimension_numbers<[1], [1], [0], [0], [0, 0, 1, 0], [], []>} : vector<256x256xbf16>, vector<8x256xbf16>, vector<256x8xf32> -> vector<256x8xf32>
    %441 = vector.extract_strided_slice %407 {offsets = [8, 0], sizes = [8, 256], strides = [1, 1]} : vector<48x256xf32> to vector<8x256xf32>
    %442 = vector.extract_strided_slice %407 {offsets = [24, 0], sizes = [8, 256], strides = [1, 1]} : vector<48x256xf32> to vector<8x256xf32>
    %443 = vector.extract_strided_slice %407 {offsets = [40, 0], sizes = [8, 256], strides = [1, 1]} : vector<48x256xf32> to vector<8x256xf32>
    %444 = arith.mulf %441, %441 : vector<8x256xf32>
    %cst_60 = arith.constant dense<0.000000e+00> : vector<256xf32>
    %445 = vector.multi_reduction <add>, %444, %cst_60 [0] : vector<8x256xf32> to vector<256xf32>
    %446 = vector.shape_cast %445 : vector<256xf32> to vector<1x256xf32>
    %cst_61 = arith.constant 1.000000e-24 : f32
    %447 = vector.broadcast %cst_61 : f32 to vector<1x256xf32>
    %448 = arith.maximumf %446, %447 : vector<1x256xf32>
    %449 = math.rsqrt %448 : vector<1x256xf32>
    %450 = vector.broadcast %449 : vector<1x256xf32> to vector<8x256xf32>
    %451 = arith.mulf %441, %450 : vector<8x256xf32>
    %452 = arith.mulf %442, %442 : vector<8x256xf32>
    %cst_62 = arith.constant dense<0.000000e+00> : vector<256xf32>
    %453 = vector.multi_reduction <add>, %452, %cst_62 [0] : vector<8x256xf32> to vector<256xf32>
    %454 = vector.shape_cast %453 : vector<256xf32> to vector<1x256xf32>
    %cst_63 = arith.constant 1.000000e-24 : f32
    %455 = vector.broadcast %cst_63 : f32 to vector<1x256xf32>
    %456 = arith.maximumf %454, %455 : vector<1x256xf32>
    %457 = math.rsqrt %456 : vector<1x256xf32>
    %458 = vector.broadcast %457 : vector<1x256xf32> to vector<8x256xf32>
    %459 = arith.mulf %442, %458 : vector<8x256xf32>
    %460 = arith.truncf %451 : vector<8x256xf32> to vector<8x256xbf16>
    %461 = arith.truncf %459 : vector<8x256xf32> to vector<8x256xbf16>
    %cst_64 = arith.constant dense<0.000000e+00> : vector<256x256xf32>
    %462 = tpu.matmul %460, %461, %cst_64 {dimension_numbers = #tpu.dot_dimension_numbers<[0], [0], [1], [1], [0, 1, 1, 1], [], []>} : vector<8x256xbf16>, vector<8x256xbf16>, vector<256x256xf32> -> vector<256x256xf32>
    %cst_65 = arith.constant 2.500000e-01 : f32
    %463 = vector.broadcast %cst_65 : f32 to vector<256x256xf32>
    %464 = arith.mulf %462, %463 : vector<256x256xf32>
    %465 = math.exp %464 : vector<256x256xf32>
    %cst_66 = arith.constant dense<0.000000e+00> : vector<256xf32>
    %466 = vector.multi_reduction <add>, %465, %cst_66 [1] : vector<256x256xf32> to vector<256xf32>
    %467 = vector.shape_cast %466 : vector<256xf32> to vector<256x1xf32>
    %468 = tpu.reciprocal %467 {approx = true} : vector<256x1xf32> -> vector<256x1xf32>
    %469 = vector.broadcast %468 : vector<256x1xf32> to vector<256x256xf32>
    %470 = arith.mulf %465, %469 : vector<256x256xf32>
    %471 = arith.truncf %470 : vector<256x256xf32> to vector<256x256xbf16>
    %472 = arith.truncf %443 : vector<8x256xf32> to vector<8x256xbf16>
    %cst_67 = arith.constant dense<0.000000e+00> : vector<256x8xf32>
    %473 = tpu.matmul %471, %472, %cst_67 {dimension_numbers = #tpu.dot_dimension_numbers<[1], [1], [0], [0], [0, 0, 1, 0], [], []>} : vector<256x256xbf16>, vector<8x256xbf16>, vector<256x8xf32> -> vector<256x8xf32>
    %474 = tpu.concatenate %440, %473 in 1 : vector<256x8xf32>, vector<256x8xf32> -> vector<256x16xf32>
    %c96 = arith.constant 96 : index
    %c0_68 = arith.constant 0 : index
    %475 = vector.load %arg2[%c96, %c0_68] : memref<272x64xbf16, #tpu.memory_space<vmem>>, vector<16x16xbf16>
    %476 = arith.truncf %474 : vector<256x16xf32> to vector<256x16xbf16>
    %cst_69 = arith.constant dense<0.000000e+00> : vector<16x256xf32>
    %477 = tpu.matmul %475, %476, %cst_69 {dimension_numbers = #tpu.dot_dimension_numbers<[1], [1], [0], [0], [0, 0, 1, 0], [], []>} : vector<16x16xbf16>, vector<256x16xbf16>, vector<16x256xf32> -> vector<16x256xf32>
    %c128 = arith.constant 128 : index
    %c0_70 = arith.constant 0 : index
    %478 = vector.load %arg3[%c128, %c0_70] : memref<208x25xf32, #tpu.memory_space<vmem>>, vector<16x1xf32>
    %479 = vector.broadcast %478 : vector<16x1xf32> to vector<16x256xf32>
    %480 = arith.addf %477, %479 : vector<16x256xf32>
    %cst_71 = arith.constant dense<0.000000e+00> : vector<16xf32>
    %481 = vector.multi_reduction <add>, %401, %cst_71 [1] : vector<16x256xf32> to vector<16xf32>
    %482 = vector.shape_cast %481 : vector<16xf32> to vector<16x1xf32>
    %cst_72 = arith.constant 2.560000e+02 : f32
    %483 = vector.broadcast %cst_72 : f32 to vector<16x1xf32>
    %484 = arith.divf %482, %483 : vector<16x1xf32>
    %cst_73 = arith.constant dense<0.000000e+00> : vector<16xf32>
    %485 = vector.multi_reduction <add>, %480, %cst_73 [1] : vector<16x256xf32> to vector<16xf32>
    %486 = vector.shape_cast %485 : vector<16xf32> to vector<16x1xf32>
    %cst_74 = arith.constant 2.560000e+02 : f32
    %487 = vector.broadcast %cst_74 : f32 to vector<16x1xf32>
    %488 = arith.divf %486, %487 : vector<16x1xf32>
    %489 = tpu.concatenate %484, %488 in 0 : vector<16x1xf32>, vector<16x1xf32> -> vector<32x1xf32>
    %c112 = arith.constant 112 : index
    %c0_75 = arith.constant 0 : index
    %490 = vector.load %arg2[%c112, %c0_75] : memref<272x64xbf16, #tpu.memory_space<vmem>>, vector<64x32xbf16>
    %491 = arith.truncf %489 : vector<32x1xf32> to vector<32x1xbf16>
    %cst_76 = arith.constant dense<0.000000e+00> : vector<64x1xf32>
    %492 = tpu.matmul %490, %491, %cst_76 {dimension_numbers = #tpu.dot_dimension_numbers<[1], [0], [0], [1], [0, 0, 1, 1], [], []>} : vector<64x32xbf16>, vector<32x1xbf16>, vector<64x1xf32> -> vector<64x1xf32>
    %cst_77 = arith.constant 0.000000e+00 : f32
    %493 = vector.broadcast %cst_77 : f32 to vector<64x1xf32>
    %494 = arith.cmpf oge, %492, %493 : vector<64x1xf32>
    %cst_78 = arith.constant 0.00999999977 : f32
    %495 = vector.broadcast %cst_78 : f32 to vector<64x1xf32>
    %496 = arith.mulf %495, %492 : vector<64x1xf32>
    %497 = arith.select %494, %492, %496 : vector<64x1xi1>, vector<64x1xf32>
    %c176 = arith.constant 176 : index
    %c0_79 = arith.constant 0 : index
    %498 = vector.load %arg2[%c176, %c0_79] : memref<272x64xbf16, #tpu.memory_space<vmem>>, vector<16x64xbf16>
    %c144 = arith.constant 144 : index
    %c0_80 = arith.constant 0 : index
    %499 = vector.load %arg3[%c144, %c0_80] : memref<208x25xf32, #tpu.memory_space<vmem>>, vector<16x1xf32>
    %500 = arith.truncf %497 : vector<64x1xf32> to vector<64x1xbf16>
    %cst_81 = arith.constant dense<0.000000e+00> : vector<16x1xf32>
    %501 = tpu.matmul %498, %500, %cst_81 {dimension_numbers = #tpu.dot_dimension_numbers<[1], [0], [0], [1], [0, 0, 1, 1], [], []>} : vector<16x64xbf16>, vector<64x1xbf16>, vector<16x1xf32> -> vector<16x1xf32>
    %502 = arith.addf %501, %499 : vector<16x1xf32>
    %503 = math.absf %502 : vector<16x1xf32>
    %cst_82 = arith.constant 0.000000e+00 : f32
    %504 = vector.broadcast %cst_82 : f32 to vector<16x1xf32>
    %505 = arith.subf %504, %503 : vector<16x1xf32>
    %506 = math.exp %505 : vector<16x1xf32>
    %cst_83 = arith.constant 0.000000e+00 : f32
    %507 = vector.broadcast %cst_83 : f32 to vector<16x1xf32>
    %508 = arith.cmpf oge, %502, %507 : vector<16x1xf32>
    %cst_84 = arith.constant 1.000000e+00 : f32
    %509 = vector.broadcast %cst_84 : f32 to vector<16x1xf32>
    %510 = arith.addf %509, %506 : vector<16x1xf32>
    %cst_85 = arith.constant 1.000000e+00 : f32
    %511 = vector.broadcast %cst_85 : f32 to vector<16x1xf32>
    %512 = arith.divf %511, %510 : vector<16x1xf32>
    %cst_86 = arith.constant 1.000000e+00 : f32
    %513 = vector.broadcast %cst_86 : f32 to vector<16x1xf32>
    %514 = arith.addf %513, %506 : vector<16x1xf32>
    %515 = arith.divf %506, %514 : vector<16x1xf32>
    %516 = arith.select %508, %512, %515 : vector<16x1xi1>, vector<16x1xf32>
    %c192 = arith.constant 192 : index
    %c0_87 = arith.constant 0 : index
    %517 = vector.load %arg2[%c192, %c0_87] : memref<272x64xbf16, #tpu.memory_space<vmem>>, vector<16x64xbf16>
    %c160 = arith.constant 160 : index
    %c0_88 = arith.constant 0 : index
    %518 = vector.load %arg3[%c160, %c0_88] : memref<208x25xf32, #tpu.memory_space<vmem>>, vector<16x1xf32>
    %519 = arith.truncf %497 : vector<64x1xf32> to vector<64x1xbf16>
    %cst_89 = arith.constant dense<0.000000e+00> : vector<16x1xf32>
    %520 = tpu.matmul %517, %519, %cst_89 {dimension_numbers = #tpu.dot_dimension_numbers<[1], [0], [0], [1], [0, 0, 1, 1], [], []>} : vector<16x64xbf16>, vector<64x1xbf16>, vector<16x1xf32> -> vector<16x1xf32>
    %521 = arith.addf %520, %518 : vector<16x1xf32>
    %522 = math.absf %521 : vector<16x1xf32>
    %cst_90 = arith.constant 0.000000e+00 : f32
    %523 = vector.broadcast %cst_90 : f32 to vector<16x1xf32>
    %524 = arith.subf %523, %522 : vector<16x1xf32>
    %525 = math.exp %524 : vector<16x1xf32>
    %cst_91 = arith.constant 0.000000e+00 : f32
    %526 = vector.broadcast %cst_91 : f32 to vector<16x1xf32>
    %527 = arith.cmpf oge, %521, %526 : vector<16x1xf32>
    %cst_92 = arith.constant 1.000000e+00 : f32
    %528 = vector.broadcast %cst_92 : f32 to vector<16x1xf32>
    %529 = arith.addf %528, %525 : vector<16x1xf32>
    %cst_93 = arith.constant 1.000000e+00 : f32
    %530 = vector.broadcast %cst_93 : f32 to vector<16x1xf32>
    %531 = arith.divf %530, %529 : vector<16x1xf32>
    %cst_94 = arith.constant 1.000000e+00 : f32
    %532 = vector.broadcast %cst_94 : f32 to vector<16x1xf32>
    %533 = arith.addf %532, %525 : vector<16x1xf32>
    %534 = arith.divf %525, %533 : vector<16x1xf32>
    %535 = arith.select %527, %531, %534 : vector<16x1xi1>, vector<16x1xf32>
    %536 = vector.extract_strided_slice %1 {offsets = [0, 0], sizes = [16, 256], strides = [1, 1]} : vector<32x256xf32> to vector<16x256xf32>
    %cst_95 = arith.constant 1.000000e+00 : f32
    %537 = vector.broadcast %cst_95 : f32 to vector<16x1xf32>
    %538 = arith.addf %537, %516 : vector<16x1xf32>
    %539 = vector.broadcast %538 : vector<16x1xf32> to vector<16x256xf32>
    %540 = arith.mulf %401, %539 : vector<16x256xf32>
    %541 = arith.addf %536, %540 : vector<16x256xf32>
    %542 = vector.extract_strided_slice %1 {offsets = [16, 0], sizes = [16, 256], strides = [1, 1]} : vector<32x256xf32> to vector<16x256xf32>
    %cst_96 = arith.constant 1.000000e+00 : f32
    %543 = vector.broadcast %cst_96 : f32 to vector<16x1xf32>
    %544 = arith.addf %543, %535 : vector<16x1xf32>
    %545 = vector.broadcast %544 : vector<16x1xf32> to vector<16x256xf32>
    %546 = arith.mulf %480, %545 : vector<16x256xf32>
    %547 = arith.addf %542, %546 : vector<16x256xf32>
    %548 = tpu.concatenate %541, %547 in 0 : vector<16x256xf32>, vector<16x256xf32> -> vector<32x256xf32>
    %cst_97 = arith.constant dense<0.000000e+00> : vector<256xf32>
    %549 = vector.multi_reduction <add>, %548, %cst_97 [0] : vector<32x256xf32> to vector<256xf32>
    %550 = vector.shape_cast %549 : vector<256xf32> to vector<1x256xf32>
    %cst_98 = arith.constant 3.200000e+01 : f32
    %551 = vector.broadcast %cst_98 : f32 to vector<1x256xf32>
    %552 = arith.divf %550, %551 : vector<1x256xf32>
    %553 = vector.broadcast %552 : vector<1x256xf32> to vector<32x256xf32>
    %554 = arith.subf %548, %553 : vector<32x256xf32>
    %555 = arith.mulf %554, %554 : vector<32x256xf32>
    %cst_99 = arith.constant dense<0.000000e+00> : vector<256xf32>
    %556 = vector.multi_reduction <add>, %555, %cst_99 [0] : vector<32x256xf32> to vector<256xf32>
    %557 = vector.shape_cast %556 : vector<256xf32> to vector<1x256xf32>
    %cst_100 = arith.constant 3.200000e+01 : f32
    %558 = vector.broadcast %cst_100 : f32 to vector<1x256xf32>
    %559 = arith.divf %557, %558 : vector<1x256xf32>
    %560 = vector.broadcast %552 : vector<1x256xf32> to vector<32x256xf32>
    %561 = arith.subf %548, %560 : vector<32x256xf32>
    %cst_101 = arith.constant 9.99999974E-6 : f32
    %562 = vector.broadcast %cst_101 : f32 to vector<1x256xf32>
    %563 = arith.addf %559, %562 : vector<1x256xf32>
    %564 = math.rsqrt %563 : vector<1x256xf32>
    %565 = vector.broadcast %564 : vector<1x256xf32> to vector<32x256xf32>
    %566 = arith.mulf %561, %565 : vector<32x256xf32>
    %c208 = arith.constant 208 : index
    %c0_102 = arith.constant 0 : index
    %567 = vector.load %arg2[%c208, %c0_102] : memref<272x64xbf16, #tpu.memory_space<vmem>>, vector<32x32xbf16>
    %c176_103 = arith.constant 176 : index
    %c0_104 = arith.constant 0 : index
    %568 = vector.load %arg3[%c176_103, %c0_104] : memref<208x25xf32, #tpu.memory_space<vmem>>, vector<32x1xf32>
    %569 = arith.truncf %566 : vector<32x256xf32> to vector<32x256xbf16>
    %cst_105 = arith.constant dense<0.000000e+00> : vector<32x256xf32>
    %570 = tpu.matmul %567, %569, %cst_105 {dimension_numbers = #tpu.dot_dimension_numbers<[1], [0], [0], [1], [0, 0, 1, 1], [], []>} : vector<32x32xbf16>, vector<32x256xbf16>, vector<32x256xf32> -> vector<32x256xf32>
    %571 = vector.broadcast %568 : vector<32x1xf32> to vector<32x256xf32>
    %572 = arith.addf %570, %571 : vector<32x256xf32>
    %cst_106 = arith.constant 5.000000e-01 : f32
    %573 = vector.broadcast %cst_106 : f32 to vector<32x256xf32>
    %574 = arith.mulf %573, %572 : vector<32x256xf32>
    %cst_107 = arith.constant 4.471500e-02 : f32
    %575 = vector.broadcast %cst_107 : f32 to vector<32x256xf32>
    %576 = arith.mulf %575, %572 : vector<32x256xf32>
    %577 = arith.mulf %576, %572 : vector<32x256xf32>
    %578 = arith.mulf %577, %572 : vector<32x256xf32>
    %579 = arith.addf %572, %578 : vector<32x256xf32>
    %cst_108 = arith.constant 0.797884583 : f32
    %580 = vector.broadcast %cst_108 : f32 to vector<32x256xf32>
    %581 = arith.mulf %580, %579 : vector<32x256xf32>
    %582 = math.tanh %581 : vector<32x256xf32>
    %cst_109 = arith.constant 1.000000e+00 : f32
    %583 = vector.broadcast %cst_109 : f32 to vector<32x256xf32>
    %584 = arith.addf %583, %582 : vector<32x256xf32>
    %585 = arith.mulf %574, %584 : vector<32x256xf32>
    %c240 = arith.constant 240 : index
    %c0_110 = arith.constant 0 : index
    %586 = vector.load %arg2[%c240, %c0_110] : memref<272x64xbf16, #tpu.memory_space<vmem>>, vector<32x32xbf16>
    %587 = arith.truncf %585 : vector<32x256xf32> to vector<32x256xbf16>
    %cst_111 = arith.constant dense<0.000000e+00> : vector<32x256xf32>
    %588 = tpu.matmul %586, %587, %cst_111 {dimension_numbers = #tpu.dot_dimension_numbers<[1], [0], [0], [1], [0, 0, 1, 1], [], []>} : vector<32x32xbf16>, vector<32x256xbf16>, vector<32x256xf32> -> vector<32x256xf32>
    %589 = arith.addf %548, %588 : vector<32x256xf32>
    %c0_112 = arith.constant 0 : index
    %c0_113 = arith.constant 0 : index
    %c0_114 = arith.constant 0 : index
    %590 = vector.load %arg4[%c0_112, %c0_113, %c0_114] : memref<1x32x256xf32, #tpu.memory_space<vmem>>, vector<1x32x256xf32>
    %591 = vector.shape_cast %590 : vector<1x32x256xf32> to vector<32x256xf32>
    %592 = vector.shape_cast %589 : vector<32x256xf32> to vector<1x32x256xf32>
    tpu.vector_store %arg4[%c0_112, %c0_113, %c0_114], %592 {strides = array<i32>} : memref<1x32x256xf32, #tpu.memory_space<vmem>>, vector<1x32x256xf32>,
    return
  }
  func.func @transform_0(%arg0: i32) -> (i32, i32, i32) {
    %c0_i32 = arith.constant 0 : i32
    %c0_i32_0 = arith.constant 0 : i32
    %c0_i32_1 = arith.constant 0 : i32
    return %arg0, %c0_i32, %c0_i32_0 : i32, i32, i32
  }
  func.func @transform_1(%arg0: i32) -> (i32, i32) {
    %c0_i32 = arith.constant 0 : i32
    %c0_i32_0 = arith.constant 0 : i32
    %c0_i32_1 = arith.constant 0 : i32
    return %c0_i32, %c0_i32_0 : i32, i32
  }
  func.func @transform_2(%arg0: i32) -> (i32, i32) {
    %c0_i32 = arith.constant 0 : i32
    %c0_i32_0 = arith.constant 0 : i32
    %c0_i32_1 = arith.constant 0 : i32
    return %c0_i32, %c0_i32_0 : i32, i32
  }
  func.func @transform_3(%arg0: i32) -> (i32, i32, i32) {
    %c0_i32 = arith.constant 0 : i32
    %c0_i32_0 = arith.constant 0 : i32
    %c0_i32_1 = arith.constant 0 : i32
    return %arg0, %c0_i32, %c0_i32_0 : i32, i32, i32
  }
}

</mosaic_0001>

<bundles_post_ra>
// kernel: encoder_layer_forward.1
= control target key start
LH: loop header
LB: loop body
LE: loop exit
PB: predicated region body
PF: predicated region fallthrough
CT: control target
= control target key end

     0   :  { %s5050_s12 = smov 0   ;;  %s6907_s0 = inlined_call_operand.vmem [shape: f32[2,32,256], index: 0, kind: input, shape index: {}]   ;;  %s6908_s1 = inlined_call_operand.vmem [shape: bf16[272,64], index: 1, kind: input, shape index: {}]   ;;  %s6909_s2 = inlined_call_operand.vmem [shape: f32[208,25], index: 2, kind: input, shape index: {}]   ;;  %s6910_s3 = inlined_call_operand.vmem [shape: f32[2,32,256], index: 3, kind: output, shape index: {}]  }
   0x1 LB: > { %s4161_s13 = sadd.s32 4294967295, %s4976_s12   ;;  %p4165_p0 = scmp.ge.s32.totalorder %s4976_s12, 1  ;;  %s4976_s12 = sphi %s5050_s12, %s13_s12  }
   0x2   : > { %p137_p1 = scmp.lt.s32.totalorder %s4976_s12, 3 }
   0x4   : > { %p138_p2 = pnand %p4165_p0, %p137_p1 }
   0x6   : > { %141 = sbr.rel (%p138_p2) target bundleno = 3520 (0xdc0), region = 32 }
   0xd   : > { %p161_p3 = scmp.lt.s32.totalorder %s4161_s13, 1  ;;  %v6911_v0 = vmov 0   ;;  %v252_v1 = vld [vmem:[%s6909_s2 + $0x18] sm:$0xff]  ;;  %v5068_v2 = vld [vmem:[%s6909_s2 + $0x8] sm:$0xff]  ;;  %v251_v3 = vld [vmem:[%s6909_s2 + $0x10] sm:$0xff]  ;;  %v4979_v11 = vmov 1  }
   0xe   : > { %306 = vmatprep.mubr.bf16.mxu0 %v6911_v0  ;;  %4392 = vset.pattern.permute.xlu0 %v6911_v0  ;;  %v4980_v17 = vmov 2   ;;  %v4981_v20 = vmov 4   ;;  %v4982_v24 = vmov 3   ;;  %v4983_v27 = vmov 5   ;;  %s5003_s28 = smov 16   ;;  %s5004_s29 = smov 17  }
   0xf   : > { %s7172_s13 = smov (!%p161_p3, %s4161_s13), 1  ;;  %262 = vperm.xlu0 %4392, %v252_v1   ;;  %4393 = vset.pattern.permute.xlu1 %v6911_v0  ;;  %v4984_v31 = vmov 6   ;;  %v4985_v34 = vmov 9   ;;  %v4986_v38 = vmov 7   ;;  %v4987_v44 = vmov 10   ;;  %s5005_s30 = smov 1  }
  0x10   : > { %602 = vperm.xlu1 %4393, %v5068_v2   ;;  %1116 = vmatprep.mubr.bf16.mxu1 %v6911_v0  ;;  %s4252_s20 = sshll.u32 %s7172_s13, 6  ;;  %v4988_v55 = vmov 8   ;;  %v4989_v60 = vmov 14   ;;  %v4990_v1 = vmov 16   ;;  %vm270_vm0 = vcmask 130048   ;;  %s5006_s4 = smov 15  }
  0x11   : > { %s5082_s23 = scalar_lea.vmem %s6907_s0, %s4252_s20  ;;  %s5007_s5 = smov 113  }
  0x12   : > { %v173_v4 = vld [vmem:[%s5082_s23 + $0x8] sm:$0xff]  ;;  %v175_v5 = vld [vmem:[%s5082_s23 + $0x18] sm:$0xff]  ;;  %v172_v9 = vld [vmem:[%s5082_s23] sm:$0xff]  ;;  %s5008_s6 = smov 127   ;;  %s5009_s7 = smov 33  }
  0x13   : > { %v177_v6 = vld [vmem:[%s5082_s23 + $0x28] sm:$0xff]  ;;  %257 = vperm.xlu0 %4392, %v251_v3   ;;  %v179_v7 = vld [vmem:[%s5082_s23 + $0x38] sm:$0xff]  ;;  %v189_v8 = vadd.f32 %v175_v5, %v173_v4  ;;  %v174_v10 = vld [vmem:[%s5082_s23 + $0x10] sm:$0xff]  ;;  %s5010_s8 = smov 30   ;;  %s5011_s9 = smov 14  }
  0x14   : > { %4394 = vset.pattern.permute.xlu1 %v4979_v11  ;;  %v176_v12 = vld [vmem:[%s5082_s23 + $0x20] sm:$0xff]  ;;  %v178_v13 = vld [vmem:[%s5082_s23 + $0x30] sm:$0xff]  ;;  %v180_v14 = vadd.f32 %v174_v10, %v172_v9  ;;  %s5012_s10 = smov 126   ;;  %s5013_s11 = smov 114  }
  0x15   : > { %621 = vperm.xlu1 %4394, %v5068_v2   ;;  %v190_v15 = vadd.f32 %v189_v8, %v177_v6  ;;  %s5014_s14 = smov 32   ;;  %s5015_s15 = smov 34  }
  0x16   : > { %v181_v16 = vadd.f32 %v180_v14, %v176_v12  ;;  %s5016_s16 = smov 31   ;;  %s5017_s17 = smov 18  }
  0x17   : > { %4395 = vset.pattern.permute.xlu0 %v4980_v17  ;;  %v191_v18 = vadd.f32 %v190_v15, %v179_v7  ;;  %s5018_s18 = smov 95   ;;  %s5019_s19 = smov 2  }
  0x18   : > { %640 = vperm.xlu0 %4395, %v5068_v2   ;;  %v182_v19 = vadd.f32 %v181_v16, %v178_v13  ;;  %s5020_s21 = smov 111   ;;  %s5021_s22 = smov 98  }
  0x19   : > { %4397 = vset.pattern.permute.xlu1 %v4981_v20  ;;  %v192_v21 = vrot.slane %v191_v18, 4  ;;  %v4993_v20 = vmov 19   ;;  %s5022_s24 = smov 94   ;;  %s5024_s25 = smov 110  }
  0x1a   : > { %678 = vperm.xlu1 %4397, %v5068_v2   ;;  %v183_v22 = vrot.slane %v182_v19, 4  ;;  %s5028_s27 = smov 8  }
  0x1b   : > { %v193_v23 = vadd.f32 %v192_v21, %v191_v18 }
  0x1c   : > { %4396 = vset.pattern.permute.xlu0 %v4982_v24  ;;  %v184_v25 = vadd.f32 %v183_v22, %v182_v19  ;;  %v4994_v24 = vmov 12  }
  0x1d   : > { %659 = vperm.xlu0 %4396, %v5068_v2   ;;  %v194_v26 = vrot.slane %v193_v23, 2 }
  0x1e   : > { %4398 = vset.pattern.permute.xlu1 %v4983_v27  ;;  %v185_v28 = vrot.slane %v184_v25, 2  ;;  %v4996_v27 = vmov 20  }
  0x1f   : > { %697 = vperm.xlu1 %4398, %v5068_v2   ;;  %v195_v29 = vadd.f32 %v194_v26, %v193_v23 }
  0x20   : > { %v186_v30 = vadd.f32 %v185_v28, %v184_v25  ;;  %v4995_v25 = vmov 18  }
  0x21   : > { %4399 = vset.pattern.permute.xlu0 %v4984_v31  ;;  %v196_v32 = vrot.slane %v195_v29, 1 }
  0x22   : > { %713 = vperm.xlu0 %4399, %v5068_v2   ;;  %v187_v33 = vrot.slane %v186_v30, 1 }
  0x23   : > { %4402 = vset.pattern.permute.xlu1 %v4985_v34  ;;  %v197_v35 = vadd.f32 %v196_v32, %v195_v29 }
  0x24   : > { %764 = vperm.xlu1 %4402, %v5068_v2   ;;  %v188_v36 = vadd.f32 %v187_v33, %v186_v30 }
  0x25   : > { %v200_v37 = vmul.f32 0.03125, %v197_v35  ;;  %v4997_v35 = vmov 22  }
  0x26   : > { %4400 = vset.pattern.permute.xlu0 %v4986_v38  ;;  %v199_v39 = vmul.f32 0.03125, %v188_v36  ;;  %v4505_v36 = vld [vmem:[%s6908_s1] sm:$0xff]  }
  0x27   : > { %729 = vperm.xlu0 %4400, %v5068_v2   ;;  %v5100_v40 = vsub.f32 %v173_v4, %v200_v37  ;;  %v5102_v41 = vsub.f32 %v175_v5, %v200_v37  ;;  %v5104_v42 = vsub.f32 %v177_v6, %v200_v37  ;;  %v5106_v43 = vsub.f32 %v179_v7, %v200_v37 }
  0x28   : > { %4403 = vset.pattern.permute.xlu1 %v4987_v44  ;;  %v5108_v45 = vsub.f32 %v172_v9, %v199_v39  ;;  %v5110_v46 = vsub.f32 %v174_v10, %v199_v39  ;;  %v5112_v47 = vsub.f32 %v176_v12, %v199_v39  ;;  %v5114_v48 = vsub.f32 %v178_v13, %v199_v39  ;;  %v5141_v12 = vld [vmem:[%s6909_s2] sm:$0xff] }
  0x29   : > { %6997 = vst [vmem:[#allocation2_spill] sm:$0xff] %v5104_v42  ;;  %6998 = vst [vmem:[#allocation3_spill] sm:$0xff] %v5106_v43  ;;  %783 = vperm.xlu1 %4403, %v5068_v2   ;;  %v210_v49 = vmul.f32 %v5100_v40, %v5100_v40  ;;  %v212_v50 = vmul.f32 %v5102_v41, %v5102_v41  ;;  %v214_v51 = vmul.f32 %v5104_v42, %v5104_v42  ;;  %v4991_v5 = vmov 15  }
  0x2a   : > { %6999 = vst [vmem:[#allocation4_spill] sm:$0xff] %v5112_v47  ;;  %7000 = vst [vmem:[#allocation5_spill] sm:$0xff] %v5114_v48  ;;  %v209_v52 = vmul.f32 %v5108_v45, %v5108_v45  ;;  %v211_v53 = vmul.f32 %v5110_v46, %v5110_v46  ;;  %v213_v54 = vmul.f32 %v5112_v47, %v5112_v47  ;;  %v4992_v9 = vmov 11  }
  0x2b   : > { %4401 = vset.pattern.permute.xlu0 %v4988_v55  ;;  %v216_v56 = vmul.f32 %v5106_v43, %v5106_v43  ;;  %v226_v57 = vadd.f32 %v212_v50, %v210_v49  ;;  %v215_v58 = vmul.f32 %v5114_v48, %v5114_v48  ;;  %v4998_v37 = vmov 13  }
  0x2c   : > { %745 = vperm.xlu0 %4401, %v5068_v2   ;;  %v217_v59 = vadd.f32 %v211_v53, %v209_v52  ;;  %v5000_v39 = vmov 17   ;;  %v7016_v48 = vmov 0.0  }
  0x2d   : > { %4404 = vset.pattern.permute.xlu1 %v4989_v60  ;;  %v227_v61 = vadd.f32 %v226_v57, %v214_v51 }
  0x2e   : > { %844 = vperm.xlu1 %4404, %v5068_v2   ;;  %v218_v62 = vadd.f32 %v217_v59, %v213_v54 }
  0x2f   : > { %v228_v63 = vadd.f32 %v227_v61, %v216_v56 }
  0x30   : > { %4406 = vset.pattern.permute.xlu0 %v4990_v1  ;;  %v219_v3 = vadd.f32 %v218_v62, %v215_v58 }
  0x31   : > { %879 = vperm.xlu0 %4406, %v5068_v2   ;;  %v229_v4 = vrot.slane %v228_v63, 4 }
  0x32   : > { %4405 = vset.pattern.permute.xlu1 %v4991_v5  ;;  %v220_v6 = vrot.slane %v219_v3, 4 }
  0x33   : > { %863 = vperm.xlu1 %4405, %v5068_v2   ;;  %v230_v7 = vadd.f32 %v229_v4, %v228_v63 }
  0x34   : > { %v221_v8 = vadd.f32 %v220_v6, %v219_v3 }
  0x35   : > { %4407 = vset.pattern.permute.xlu0 %v4992_v9  ;;  %v231_v10 = vrot.slane %v230_v7, 2 }
  0x36   : > { %799 = vperm.xlu0 %4407, %v5068_v2   ;;  %v222_v11 = vrot.slane %v221_v8, 2 }
  0x37   : > { %4408 = vset.pattern.permute.xlu1 %v4984_v31  ;;  %v232_v13 = vadd.f32 %v231_v10, %v230_v7 }
  0x38   : > { %437 = vperm.xlu1 %4408, %v5141_v12   ;;  %v223_v14 = vadd.f32 %v222_v11, %v221_v8  ;;  %v1032_v11 = vld [vmem:[%s6909_s2 + $0x20] sm:$0xff] }
  0x39   : > { %v233_v15 = vrot.slane %v232_v13, 1 }
  0x3a   : > { %494 = vperm.xlu0 %4407, %v5141_v12   ;;  %v224_v16 = vrot.slane %v223_v14, 1 }
  0x3b   : > { %v234_v17 = vadd.f32 %v233_v15, %v232_v13  ;;  %v1214_v13 = vld [vmem:[%s6909_s2 + $0x60] sm:$0xff] }
  0x3c   : > { %4409 = vset.pattern.permute.xlu1 %v4986_v38  ;;  %v225_v18 = vadd.f32 %v224_v16, %v223_v14  ;;  %v4999_v38 = vmov 21   ;;  %v1063_v16 = vld [vmem:[%s6909_s2 + $0x38] sm:$0xff] }
  0x3d   : > { %456 = vperm.xlu1 %4409, %v5141_v12   ;;  %v236_v19 = vmul.f32 0.03125, %v234_v17 }
  0x3e   : > { %4412 = vset.pattern.permute.xlu0 %v4993_v20  ;;  %v235_v21 = vmul.f32 0.03125, %v225_v18  ;;  %v1215_v20 = vld [vmem:[%s6909_s2 + $0x68] sm:$0xff] }
  0x3f   : > { %930 = vperm.xlu0 %4412, %v5068_v2   ;;  %v238_v22 = vadd.f32 1e-05, %v236_v19  ;;  %v1213_v19 = vld [vmem:[%s6909_s2 + $0x58] sm:$0xff] }
  0x40   : > { %v237_v23 = vadd.f32 1e-05, %v235_v21 }
  0x41   : > { %4410 = vset.pattern.permute.xlu1 %v4988_v55  ;;  %4522 = vrsqrt.f32 %v238_v22 }
  0x42   : > { %475 = vperm.xlu1 %4410, %v5141_v12   ;;  %4524 = vrsqrt.f32 %v237_v23 }
  0x43   : > { %4413 = vset.pattern.permute.xlu0 %v4994_v24 }
  0x44   : > { %809 = vperm.xlu0 %4413, %v5068_v2  }
  0x46   : > { %4411 = vset.pattern.permute.xlu1 %v4995_v25 }
  0x47   : > { %911 = vperm.xlu1 %4411, %v5068_v2  }
  0x48   : > { %506 = vperm.xlu0 %4413, %v5141_v12  }
  0x4b   : > { %4418 = vset.pattern.permute.xlu1 %v4990_v1  ;;  %v5151_v26 = vpop.eup %4522 }
  0x4c   : > { %7001 = vst [vmem:[#allocation6_spill] sm:$0xff] %v5151_v26  ;;  %4414 = vset.pattern.permute.xlu0 %v4996_v27  ;;  %544 = vperm.xlu1 %4418, %v5141_v12   ;;  %v5154_v28 = vpop.eup %4524  ;;  %v242_v29 = vmul.f32 %v5151_v26, %v5100_v40  ;;  %v244_v30 = vmul.f32 %v5151_v26, %v5102_v41  ;;  %v5001_v40 = vmov 23   ;;  %v5002_v41 = vmov 24  }
  0x4d   : > { %7002 = vst [vmem:[#allocation7_spill] sm:$0xff] %v5154_v28  ;;  %949 = vperm.xlu0 %4414, %v5068_v2   ;;  %v241_v31 = vmul.f32 %v5154_v28, %v5108_v45  ;;  %v243_v32 = vmul.f32 %v5154_v28, %v5110_v46 }
  0x4e   : > { %v254_v33 = vpack.c.bf16 %v244_v30, %v242_v29  ;;  %v317_v29 = vlaneseq }
  0x4f   : > { %v253_v34 = vpack.c.bf16 %v243_v32, %v241_v31 }
  0x50   : > { %4419 = vset.pattern.permute.xlu1 %v4997_v35  ;;  %274 = vmatprep.subr.bf16.mxu0 %v254_v33  ;;  %v5352_v32 = vand.u32 127, %v317_v29 }
  0x51   : > { %4415 = vset.pattern.permute.xlu0 %v4998_v37  ;;  %275 = vmatpush1.bf16.msra.mxu0 %v253_v34 }
  0x52   : > { %825 = vperm.xlu0 %4415, %v5068_v2   ;;  %987 = vperm.xlu1 %4419, %v5068_v2   ;;  %v5359_v35 = vadd.s32 128, %v5352_v32  ;;  %vm332_vm1 = vcmp.ge.s32.totalorder %v5352_v32, 16  ;;  %vm428_vm4 = vcmp.lt.s32.totalorder %v5352_v32, 17  ;;  %vm448_vm6 = vcmp.lt.s32.totalorder %v5352_v32, 16 }
  0x53   : > { %vm467_vm8 = vcmp.lt.s32.totalorder %v5352_v32, 15  ;;  %vm486_vm9 = vcmp.lt.s32.totalorder %v5352_v32, 1  ;;  %vm517_vm11 = vcmp.lt.s32.totalorder %v5352_v32, 127  ;;  %vm536_vm12 = vcmp.lt.s32.totalorder %v5352_v32, 113 }
  0x54   : > { %4171 = vmatmul.mubr.msk.bf16.vlgmr.msra.gmra.mrb[0].mxu0 %vm270_vm0, %v4505_v36  ;;  %7014 = vst [vmem:[#allocation19_spill] sm:$0xff] %v5359_v35  ;;  %v5364_v36 = vand.u32 15, %v5352_v32  ;;  %vm355_vm10 = vcmp.lt.s32.totalorder %v5359_v35, 240  ;;  %vm322_vm13 = vcmp.ge.s32.totalorder %v5352_v32, 32  ;;  %vm593_vm15 = vcmp.lt.s32.totalorder %v5352_v32, 34 }
  0x55   : > { %1195 = vmatprep.mubr.bf16.mxu0 %v6911_v0 }
  0x56   : > { %525 = vperm.xlu0 %4415, %v5141_v12   ;;  %4424 = vset.pattern.permute.xlu1 %v6911_v0  ;;  %vm382_vm2 = vcmp.ge.s32.totalorder %v5364_v36, 1  ;;  %vm404_vm5 = vcmp.lt.s32.totalorder %v5364_v36, 15  ;;  %vm372_vm14 = vcmp.ge.s32.totalorder %v5364_v36, 2 }
  0x5a   : > { %4416 = vset.pattern.permute.xlu0 %v4999_v38  ;;  %v5367_v38 = vand.u32 15, %v5359_v35 }
  0x5b   : > { %968 = vperm.xlu0 %4416, %v5068_v2  }
  0x5c   : > { %vm383_vm3 = vcmp.ge.s32.totalorder %v5367_v38, 1  ;;  %vm405_vm7 = vcmp.lt.s32.totalorder %v5367_v38, 15 }
  0x5d   : > { %v5423_v28 = vsel %vm405_vm7, 1.0, %v7016_v48  ;;  %vm613_vm7 = vcmp.lt.s32.totalorder %v5352_v32, 33 }
  0x5f   : > { %4417 = vset.pattern.permute.xlu0 %v5000_v39 }
  0x60   : > { %895 = vperm.xlu0 %4417, %v5068_v2  }
  0x64   : > { %563 = vperm.xlu0 %4417, %v5141_v12  }
  0x68   : > { %4420 = vset.pattern.permute.xlu0 %v5001_v40 }
  0x69   : > { %1006 = vperm.xlu0 %4420, %v5068_v2  }
  0x6d   : > { %4421 = vset.pattern.permute.xlu0 %v4995_v25 }
  0x6e   : > { %582 = vperm.xlu0 %4421, %v5141_v12  }
  0x72   : > { %4422 = vset.pattern.permute.xlu0 %v5002_v41  ;;  %v6913_v41 = vmov 0.0  }
  0x8e   : > { %v263_v44 = vpop.permute.xlu0 %262 }
  0x8f   : > { %v5225_v59 = vpop.permute.xlu1 %602 }
  0x92   : > { %v258_v45 = vpop.permute.xlu0 %257 }
  0x94   : > { %v5235_v61 = vpop.permute.xlu1 %621 }
  0x97   : > { %v5201_v55 = vpop.permute.xlu0 %640 }
  0x99   : > { %v5242_v63 = vpop.permute.xlu1 %678 }
  0x9c   : > { %v5207_v56 = vpop.permute.xlu0 %659 }
  0x9e   : > { %v5252_v3 = vpop.permute.xlu1 %697 }
  0xa1   : > { %v5217_v57 = vpop.permute.xlu0 %713 }
  0xa3   : > { %v5261_v5 = vpop.permute.xlu1 %764 }
  0xa6   : > { %v5227_v60 = vpop.permute.xlu0 %729 }
  0xab   : > { %v5237_v62 = vpop.permute.xlu0 %745 }
  0xb0   : > { %v5244_v1 = vpop.permute.xlu0 %879 }
  0xb1   : > { %7003 = vst [vmem:[#allocation8_spill] sm:$0xff] %v5244_v1 }
  0xb5   : > { %v5254_v4 = vpop.permute.xlu0 %799 }
  0xb9   : > { %v5263_v6 = vpop.permute.xlu0 %494 }
  0xbe   : > { %v5275_v7 = vpop.permute.xlu0 %930 }
  0xbf   : > { %7004 = vst [vmem:[#allocation9_spill] sm:$0xff] %v5275_v7 }
  0xc3   : > { %v5283_v9 = vpop.permute.xlu0 %809 }
  0xc7   : > { %v5297_v12 = vpop.permute.xlu0 %506 }
  0xcc   : > { %v5304_v14 = vpop.permute.xlu0 %949 }
  0xcd   : > { %7007 = vst [vmem:[#allocation12_spill] sm:$0xff] %v5304_v14 }
  0xd1   : > { %v5315_v17 = vpop.permute.xlu0 %825 }
  0xd5   : > { %v5327_v21 = vpop.permute.xlu0 %525 }
  0xda   : > { %v5332_v23 = vpop.permute.xlu0 %968 }
  0xdb   : > { %7008 = vst [vmem:[#allocation13_spill] sm:$0xff] %v5332_v23 }
  0xdf   : > { %v5340_v25 = vpop.permute.xlu0 %895 }
  0xe0   : > { %7010 = vst [vmem:[#allocation15_spill] sm:$0xff] %v5340_v25 }
  0xe3   : > { %v5346_v30 = vpop.permute.xlu0 %563 }
  0xe4   : > { %7011 = vst [vmem:[#allocation16_spill] sm:$0xff] %v5346_v30 }
  0xe8   : > { %v5356_v33 = vpop.permute.xlu0 %1006 }
  0xe9   : > { %7013 = vst [vmem:[#allocation18_spill] sm:$0xff] %v5356_v33 }
  0xed   : > { %v5369_v39 = vpop.permute.xlu0 %582 }
  0xee   : > { %7015 = vst [vmem:[#allocation20_spill] sm:$0xff] %v5369_v39  ;;  %v5555_v39 = vsel %vm372_vm14, 1.0, %v7016_v48  ;;  %vm689_vm14 = vcmp.lt.s32.totalorder %v5352_v32, 18 }
 0x127   : > { %v308_v46 = vpop.f32.mrb[0].mxu0 }
 0x128   : > { %v5179_v49 = vadd.f32 %v308_v46, %v258_v45  ;;  %v310_v50 = vpop.f32.mrb[1].mxu0  ;;  %v5388_v46 = vsel %vm383_vm3, 1.0, %v6913_v41  ;;  %vm373_vm3 = vcmp.ge.s32.totalorder %v5367_v38, 2 }
 0x129   : > { %v312_v51 = vpop.f32.mrb[2].mxu0  ;;  %v5193_v53 = vadd.f32 %v310_v50, %v258_v45  ;;  %v5382_v45 = vsel %vm382_vm2, 1.0, %v6913_v41  ;;  %vm414_vm2 = vcmp.lt.s32.totalorder %v5364_v36, 14  ;;  %v5571_v25 = vsel %vm373_vm3, 1.0, %v7016_v48 }
 0x12a   : > { %v314_v52 = vpop.f32.mrb[3].mxu0  ;;  %444 = vrot.lane.b32.xlu1 %v5179_v49, %s5003_s28  ;;  %424 = vrot.lane.b32.xlu0 %v5179_v49, %s5004_s29  ;;  %v5195_v54 = vadd.f32 %v312_v51, %v263_v44  ;;  %vm941_vm3 = vcmp.lt.s32.totalorder %v5352_v32, 98 }
 0x12b   : > { %v5223_v58 = vadd.f32 %v314_v52, %v263_v44  ;;  %v5379_v44 = vsel %vm332_vm1, 1.0, %v6913_v41  ;;  %vm632_vm1 = vcmp.lt.s32.totalorder %v5352_v32, 32 }
 0x12c   : > { %v5392_v51 = vmul.f32 %v5382_v45, %v5379_v44 }
 0x12e   : > { %482 = vrot.lane.b32.xlu1 %v5179_v49, %s5005_s30  ;;  %463 = vrot.lane.b32.xlu0 %v5179_v49, %s5006_s4 }
 0x132   : > { %532 = vrot.lane.b32.xlu1 %v5179_v49, %s5007_s5  ;;  %513 = vrot.lane.b32.xlu0 %v5179_v49, %s5008_s6 }
 0x136   : > { %426 = vrot.lane.b32.xlu1 %v5193_v53, %s5004_s29  ;;  %609 = vrot.lane.b32.xlu0 %v5195_v54, %s5009_s7 }
 0x13a   : > { %446 = vrot.lane.b32.xlu1 %v5193_v53, %s5003_s28  ;;  %666 = vrot.lane.b32.xlu0 %v5195_v54, %s5010_s8 }
 0x13e   : > { %465 = vrot.lane.b32.xlu1 %v5193_v53, %s5006_s4  ;;  %752 = vrot.lane.b32.xlu0 %v5195_v54, %s5011_s9 }
 0x142   : > { %484 = vrot.lane.b32.xlu1 %v5193_v53, %s5005_s30  ;;  %832 = vrot.lane.b32.xlu0 %v5195_v54, %s5012_s10 }
 0x146   : > { %515 = vrot.lane.b32.xlu1 %v5193_v53, %s5008_s6  ;;  %851 = vrot.lane.b32.xlu0 %v5195_v54, %s5013_s11 }
 0x14a   : > { %534 = vrot.lane.b32.xlu1 %v5193_v53, %s5007_s5  ;;  %630 = vrot.lane.b32.xlu0 %v5223_v58, %s5014_s14 }
 0x14e   : > { %589 = vrot.lane.b32.xlu1 %v5195_v54, %s5015_s15  ;;  %649 = vrot.lane.b32.xlu0 %v5223_v58, %s5016_s16 }
 0x152   : > { %628 = vrot.lane.b32.xlu1 %v5195_v54, %s5014_s14  ;;  %722 = vrot.lane.b32.xlu0 %v5223_v58, %s5003_s28 }
 0x156   : > { %647 = vrot.lane.b32.xlu1 %v5195_v54, %s5016_s16  ;;  %738 = vrot.lane.b32.xlu0 %v5223_v58, %s5006_s4 }
 0x15a   : > { %685 = vrot.lane.b32.xlu1 %v5195_v54, %s5017_s17  ;;  %1025 = vperm.xlu0 %4422, %v5068_v2   ;;  %v5273_v2 = vpop.permute.xlu1 %783 }
 0x15e   : > { %704 = vrot.lane.b32.xlu1 %v5195_v54, %s5004_s29  ;;  %818 = vrot.lane.b32.xlu0 %v5223_v58, %s5008_s6  ;;  %v5281_v8 = vpop.permute.xlu1 %844 }
 0x15f   : > { %4423 = vset.pattern.permute.xlu0 %v6911_v0  ;;  %7005 = vst [vmem:[#allocation10_spill] sm:$0xff] %v5281_v8 }
 0x162   : > { %720 = vrot.lane.b32.xlu1 %v5195_v54, %s5003_s28  ;;  %994 = vrot.lane.b32.xlu0 %v5195_v54, %s5018_s18  ;;  %v5292_v10 = vpop.permute.xlu1 %863  ;;  %s5025_s28 = smov 97  }
 0x163   : > { %7006 = vst [vmem:[#allocation11_spill] sm:$0xff] %v5292_v10 }
 0x166   : > { %736 = vrot.lane.b32.xlu1 %v5195_v54, %s5006_s4  ;;  %872 = vrot.lane.b32.xlu0 %v5223_v58, %s5007_s5  ;;  %v5306_v15 = vpop.permute.xlu1 %437  ;;  %s5023_s4 = smov 112  }
 0x16a   : > { %771 = vrot.lane.b32.xlu1 %v5195_v54, %s5019_s19  ;;  %570 = vrot.lane.b32.xlu0 %v5179_v49, %s5020_s21  ;;  %v5317_v18 = vpop.permute.xlu1 %456 }
 0x16e   : > { %790 = vrot.lane.b32.xlu1 %v5195_v54, %s5005_s30  ;;  %939 = vrot.lane.b32.xlu0 %v5223_v58, %s5021_s22  ;;  %v5329_v22 = vpop.permute.xlu1 %475 }
 0x172   : > { %816 = vrot.lane.b32.xlu1 %v5195_v54, %s5008_s6  ;;  %1013 = vrot.lane.b32.xlu0 %v5195_v54, %s5022_s24  ;;  %v5336_v24 = vpop.permute.xlu1 %911  ;;  %s5026_s6 = smov 96  }
 0x173   : > { %7009 = vst [vmem:[#allocation14_spill] sm:$0xff] %v5336_v24 }
 0x176   : > { %870 = vrot.lane.b32.xlu1 %v5195_v54, %s5007_s5  ;;  %1036 = vperm.xlu0 %4423, %v1032_v11   ;;  %v5342_v27 = vpop.permute.xlu1 %544 }
 0x17a   : > { %886 = vrot.lane.b32.xlu1 %v5195_v54, %s5023_s4  ;;  %1232 = vperm.xlu0 %4423, %v1214_v13   ;;  %v5350_v31 = vpop.permute.xlu1 %987 }
 0x17b   : > { %7012 = vst [vmem:[#allocation17_spill] sm:$0xff] %v5350_v31 }
 0x17e   : > { %902 = vrot.lane.b32.xlu1 %v5195_v54, %s5020_s21  ;;  %1073 = vperm.xlu0 %4423, %v1063_v16  }
 0x182   : > { %918 = vrot.lane.b32.xlu1 %v5195_v54, %s5024_s25  ;;  %1227 = vperm.xlu0 %4423, %v1213_v19   ;;  %v5404_v19 = vsel %vm404_vm5, 1.0, %v6913_v41  ;;  %vm651_vm5 = vcmp.lt.s32.totalorder %v5352_v32, 31 }
 0x186   : > { %937 = vrot.lane.b32.xlu1 %v5195_v54, %s5021_s22  ;;  %1237 = vperm.xlu0 %4423, %v1215_v20  }
 0x18a   : > { %956 = vrot.lane.b32.xlu1 %v5195_v54, %s5025_s28 }
 0x18e   : > { %975 = vrot.lane.b32.xlu1 %v5195_v54, %s5026_s6 }
 0x192   : > { %591 = vrot.lane.b32.xlu1 %v5223_v58, %s5015_s15 }
 0x196   : > { %611 = vrot.lane.b32.xlu1 %v5223_v58, %s5009_s7 }
 0x19a   : > { %668 = vrot.lane.b32.xlu1 %v5223_v58, %s5010_s8 }
 0x19c   : > { %v445_v34 = vpop.permute.xlu1 %444  ;;  %v425_v50 = vpop.permute.xlu0 %424 }
 0x19e   : > { %687 = vrot.lane.b32.xlu1 %v5223_v58, %s5017_s17 }
 0x1a0   : > { %v483_v37 = vpop.permute.xlu1 %482  ;;  %v464_v47 = vpop.permute.xlu0 %463 }
 0x1a2   : > { %706 = vrot.lane.b32.xlu1 %v5223_v58, %s5004_s29 }
 0x1a4   : > { %v5375_v40 = vpop.permute.xlu1 %532 }
 0x1a6   : > { %551 = vrot.lane.b32.xlu1 %v5179_v49, %s5023_s4 }
 0x1a8   : > { %v427_v52 = vpop.permute.xlu1 %426 }
 0x1a9   : > { %v429_v11 = vsel %vm428_vm4, %v425_v50, %v427_v52  ;;  %v430_v13 = vsel %vm428_vm4, %v427_v52, %v425_v50 }
 0x1aa   : > { %v434_v16 = vmul.f32 %v5388_v46, %v429_v11  ;;  %553 = vrot.lane.b32.xlu1 %v5193_v53, %s5023_s4  ;;  %v433_v20 = vmul.f32 %v5392_v51, %v430_v13  ;;  %v5420_v13 = vmul.f32 %v5404_v19, %v5379_v44 }
 0x1ac   : > { %v447_v29 = vpop.permute.xlu1 %446  ;;  %v441_v52 = vmul.f32 %v5306_v15, %v434_v16 }
 0x1ad   : > { %v449_v0 = vsel %vm448_vm6, %v445_v34, %v447_v29  ;;  %v450_v50 = vsel %vm448_vm6, %v447_v29, %v445_v34  ;;  %v440_v34 = vmul.f32 %v5306_v15, %v433_v20  ;;  %v5445_v20 = vsel %vm355_vm10, 1.0, %v7016_v48 }
 0x1ae   : > { %v453_v11 = vmul.f32 %v5379_v44, %v450_v50  ;;  %v460_v41 = vmul.f32 %v5317_v18, %v449_v0  ;;  %754 = vrot.lane.b32.xlu1 %v5223_v58, %s5011_s9  ;;  %7017 = vst [vmem:[#allocation21_spill] sm:$0xff] %v5445_v20  ;;  %vm415_vm10 = vcmp.lt.s32.totalorder %v5367_v38, 14 }
 0x1b0   : > { %v459_v29 = vmul.f32 %v5317_v18, %v453_v11  ;;  %v462_v16 = vadd.f32 %v460_v41, %v441_v52  ;;  %v466_v43 = vpop.permute.xlu1 %465 }
 0x1b1   : > { %v468_v0 = vsel %vm467_vm8, %v464_v47, %v466_v43  ;;  %v469_v50 = vsel %vm467_vm8, %v466_v43, %v464_v47 }
 0x1b2   : > { %v461_v26 = vadd.f32 %v459_v29, %v440_v34  ;;  %v472_v42 = vmul.f32 %v5420_v13, %v469_v50  ;;  %v473_v33 = vmul.f32 %v5423_v28, %v468_v0  ;;  %773 = vrot.lane.b32.xlu1 %v5223_v58, %s5019_s19 }
 0x1b4   : > { %v478_v15 = vmul.f32 %v5329_v22, %v472_v42  ;;  %v479_v18 = vmul.f32 %v5329_v22, %v473_v33  ;;  %v485_v41 = vpop.permute.xlu1 %484  ;;  %v509_v22 = vmul.f32 %v5297_v12, %v5179_v49  ;;  %v510_v33 = vmul.f32 %v5297_v12, %v5193_v53 }
 0x1b5   : > { %v487_v43 = vsel %vm486_vm9, %v483_v37, %v485_v41  ;;  %v488_v47 = vsel %vm486_vm9, %v485_v41, %v483_v37  ;;  %v514_v37 = vpop.permute.xlu0 %513  ;;  %v5464_v49 = vmul.f32 %v5388_v46, %v5445_v20  ;;  %v5582_v20 = vsel %vm415_vm10, 1.0, %v7016_v48 }
 0x1b6   : > { %v480_v52 = vadd.f32 %v478_v15, %v461_v26  ;;  %v481_v11 = vadd.f32 %v479_v18, %v462_v16  ;;  %v491_v34 = vmul.f32 %v5382_v45, %v488_v47  ;;  %v492_v42 = vmul.f32 %v5388_v46, %v487_v43  ;;  %792 = vrot.lane.b32.xlu1 %v5223_v58, %s5005_s30 }
 0x1b7   : > { %7018 = vst [vmem:[#allocation22_spill] sm:$0xff] %v5464_v49  ;;  %vm1017_vm10 = vcmp.lt.s32.totalorder %v5352_v32, 94 }
 0x1b8   : > { %v497_v29 = vmul.f32 %v5263_v6, %v491_v34  ;;  %v498_v0 = vmul.f32 %v5263_v6, %v492_v42  ;;  %v516_v26 = vpop.permute.xlu1 %515 }
 0x1b9   : > { %v518_v16 = vsel %vm517_vm11, %v514_v37, %v516_v26  ;;  %v519_v50 = vsel %vm517_vm11, %v516_v26, %v514_v37 }
 0x1ba   : > { %v499_v15 = vadd.f32 %v497_v29, %v480_v52  ;;  %v500_v12 = vadd.f32 %v498_v0, %v481_v11  ;;  %v522_v18 = vmul.f32 %v5404_v19, %v518_v16  ;;  %v523_v41 = vmul.f32 %v5423_v28, %v519_v50  ;;  %834 = vrot.lane.b32.xlu1 %v5223_v58, %s5012_s10 }
 0x1bc   : > { %v511_v6 = vadd.f32 %v509_v22, %v499_v15  ;;  %v512_v43 = vadd.f32 %v510_v33, %v500_v12  ;;  %v528_v47 = vmul.f32 %v5327_v21, %v522_v18  ;;  %v529_v34 = vmul.f32 %v5327_v21, %v523_v41  ;;  %v535_v42 = vpop.permute.xlu1 %534 }
 0x1bd   : > { %v537_v37 = vsel %vm536_vm12, %v5375_v40, %v535_v42  ;;  %v538_v52 = vsel %vm536_vm12, %v535_v42, %v5375_v40 }
 0x1be   : > { %v541_v11 = vmul.f32 %v5382_v45, %v537_v37  ;;  %v542_v29 = vmul.f32 %v5464_v49, %v538_v52  ;;  %853 = vrot.lane.b32.xlu1 %v5223_v58, %s5013_s11  ;;  %v530_v22 = vadd.f32 %v528_v47, %v511_v6  ;;  %v531_v33 = vadd.f32 %v529_v34, %v512_v43  ;;  %v1033_v6 = vld [vmem:[%s6909_s2 + $0x28] sm:$0xff]  ;;  %v610_v47 = vpop.permute.xlu0 %609  ;;  %v1212_v34 = vld [vmem:[%s6909_s2 + $0x50] sm:$0xff] }
 0x1bf   : > { %v1062_v37 = vld [vmem:[%s6909_s2 + $0x30] sm:$0xff] }
 0x1c0   : > { %v547_v21 = vmul.f32 %v5342_v27, %v541_v11  ;;  %v548_v0 = vmul.f32 %v5342_v27, %v542_v29  ;;  %v590_v26 = vpop.permute.xlu1 %589 }
 0x1c2   : > { %v5484_v16 = vadd.f32 %v547_v21, %v530_v22  ;;  %v5486_v50 = vadd.f32 %v548_v0, %v531_v33  ;;  %572 = vrot.lane.b32.xlu1 %v5193_v53, %s5020_s21  ;;  %v667_v11 = vpop.permute.xlu0 %666 }
 0x1c4   : > { %7019 = vst [vmem:[#allocation23_spill] sm:$0xff] %v5484_v16  ;;  %7020 = vst [vmem:[#allocation24_spill] sm:$0xff] %v5486_v50  ;;  %v5490_v40 = vpop.permute.xlu1 %628  ;;  %v4172_v16 = vsel %vm322_vm13, 1.0, %v7016_v48  ;;  %vm670_vm13 = vcmp.lt.s32.totalorder %v5352_v32, 30 }
 0x1c5   : > { %v596_v23 = vmul.f32 %v5555_v39, %v4172_v16  ;;  %v616_v7 = vmul.f32 %v5382_v45, %v4172_v16  ;;  %v654_v24 = vmul.f32 %v5404_v19, %v4172_v16 }
 0x1c6   : > { %888 = vrot.lane.b32.xlu1 %v5223_v58, %s5023_s4  ;;  %v5533_v22 = vpop.permute.xlu0 %752 }
 0x1c8   : > { %v648_v15 = vpop.permute.xlu1 %647 }
 0x1ca   : > { %904 = vrot.lane.b32.xlu1 %v5223_v58, %s5020_s21  ;;  %v5539_v0 = vpop.permute.xlu0 %832 }
 0x1cc   : > { %v5496_v12 = vpop.permute.xlu1 %685 }
 0x1ce   : > { %920 = vrot.lane.b32.xlu1 %v5223_v58, %s5024_s25 }
 0x1d0   : > { %v5500_v27 = vpop.permute.xlu1 %704 }
 0x1d2   : > { %958 = vrot.lane.b32.xlu1 %v5223_v58, %s5025_s28 }
 0x1d4   : > { %v5504_v53 = vpop.permute.xlu1 %720 }
 0x1d6   : > { %977 = vrot.lane.b32.xlu1 %v5223_v58, %s5026_s6  ;;  %s170_s6 = scalar_lea.vmem %s6910_s3, %s4252_s20 }
 0x1d8   : > { %v5508_v18 = vpop.permute.xlu1 %736 }
 0x1da   : > { %996 = vrot.lane.b32.xlu1 %v5223_v58, %s5018_s18 }
 0x1dc   : > { %v5512_v41 = vpop.permute.xlu1 %771 }
 0x1de   : > { %1015 = vrot.lane.b32.xlu1 %v5223_v58, %s5022_s24 }
 0x1e0   : > { %v5519_v43 = vpop.permute.xlu1 %790 }
 0x1e2   : > { %1041 = vperm.xlu1 %4424, %v1033_v6  }
 0x1e4   : > { %v5524_v42 = vpop.permute.xlu1 %816 }
 0x1e6   : > { %1222 = vperm.xlu1 %4424, %v1212_v34   ;;  %v5543_v34 = vpop.permute.xlu0 %851 }
 0x1e8   : > { %v5529_v52 = vpop.permute.xlu1 %870 }
 0x1e9   : > { %7021 = vst [vmem:[#allocation25_spill] sm:$0xff] %v5529_v52 }
 0x1ea   : > { %1068 = vperm.xlu1 %4424, %v1062_v37   ;;  %v631_v50 = vpop.permute.xlu0 %630 }
 0x1eb   : > { %v633_v52 = vsel %vm632_vm1, %v5490_v40, %v631_v50 }
 0x1ec   : > { %v5531_v29 = vpop.permute.xlu1 %886 }
 0x1ed   : > { %7022 = vst [vmem:[#allocation26_spill] sm:$0xff] %v5531_v29 }
 0x1ee   : > { %v650_v36 = vpop.permute.xlu0 %649 }
 0x1f0   : > { %v5535_v33 = vpop.permute.xlu1 %902 }
 0x1f1   : > { %7023 = vst [vmem:[#allocation27_spill] sm:$0xff] %v5535_v33 }
 0x1f4   : > { %v5537_v21 = vpop.permute.xlu1 %918 }
 0x1f5   : > { %7024 = vst [vmem:[#allocation28_spill] sm:$0xff] %v5537_v21 }
 0x1f8   : > { %v5541_v6 = vpop.permute.xlu1 %937 }
 0x1f9   : > { %7025 = vst [vmem:[#allocation29_spill] sm:$0xff] %v5541_v6  ;;  %v5567_v6 = vsel %vm414_vm2, 1.0, %v7016_v48  ;;  %vm555_vm2 = vcmp.lt.s32.totalorder %v5352_v32, 112 }
 0x1fa   : > { %v673_v10 = vmul.f32 %v5567_v6, %v4172_v16 }
 0x1fc   : > { %v5545_v31 = vpop.permute.xlu1 %956 }
 0x1fd   : > { %7026 = vst [vmem:[#allocation30_spill] sm:$0xff] %v5545_v31  ;;  %v634_v31 = vsel %vm632_vm1, %v631_v50, %v5490_v40 }
 0x1fe   : > { %v637_v29 = vmul.f32 %v4172_v16, %v634_v31 }
 0x200   : > { %v5549_v37 = vpop.permute.xlu1 %975  ;;  %v643_v40 = vmul.f32 %v5201_v55, %v637_v29 }
 0x201   : > { %7027 = vst [vmem:[#allocation31_spill] sm:$0xff] %v5549_v37 }
 0x204   : > { %v592_v30 = vpop.permute.xlu1 %591 }
 0x205   : > { %v594_v37 = vsel %vm593_vm15, %v590_v26, %v592_v30  ;;  %v595_v14 = vsel %vm593_vm15, %v592_v30, %v590_v26  ;;  %v652_v30 = vsel %vm651_vm5, %v648_v15, %v650_v36  ;;  %v653_v26 = vsel %vm651_vm5, %v650_v36, %v648_v15 }
 0x206   : > { %v598_v1 = vmul.f32 %v596_v23, %v595_v14  ;;  %v599_v49 = vmul.f32 %v5571_v25, %v594_v37  ;;  %v656_v15 = vmul.f32 %v654_v24, %v653_v26  ;;  %v657_v14 = vmul.f32 %v5423_v28, %v652_v30  ;;  %v723_v30 = vpop.permute.xlu0 %722 }
 0x207   : > { %v692_v23 = vmul.f32 %v5555_v39, %v5379_v44  ;;  %v644_v24 = vmul.f32 %v5201_v55, %v633_v52  ;;  %vm922_vm15 = vcmp.lt.s32.totalorder %v5352_v32, 110  ;;  %vm979_vm5 = vcmp.lt.s32.totalorder %v5352_v32, 96 }
 0x208   : > { %v612_v21 = vpop.permute.xlu1 %611  ;;  %v605_v31 = vmul.f32 %v5225_v59, %v598_v1  ;;  %v606_v16 = vmul.f32 %v5225_v59, %v599_v49 }
 0x209   : > { %v614_v33 = vsel %vm613_vm7, %v610_v47, %v612_v21  ;;  %v615_v35 = vsel %vm613_vm7, %v612_v21, %v610_v47  ;;  %vm998_vm7 = vcmp.lt.s32.totalorder %v5352_v32, 95 }
 0x20a   : > { %v618_v8 = vmul.f32 %v616_v7, %v615_v35  ;;  %v619_v38 = vmul.f32 %v5388_v46, %v614_v33 }
 0x20c   : > { %v624_v50 = vmul.f32 %v5235_v61, %v618_v8  ;;  %v625_v7 = vmul.f32 %v5235_v61, %v619_v38  ;;  %v669_v35 = vpop.permute.xlu1 %668  ;;  %v662_v8 = vmul.f32 %v5207_v56, %v656_v15  ;;  %v663_v61 = vmul.f32 %v5207_v56, %v657_v14 }
 0x20d   : > { %v671_v47 = vsel %vm670_vm13, %v667_v11, %v669_v35  ;;  %v672_v33 = vsel %vm670_vm13, %v669_v35, %v667_v11  ;;  %v725_v14 = vsel %vm448_vm6, %v723_v30, %v5504_v53 }
 0x20e   : > { %v626_v21 = vadd.f32 %v624_v50, %v605_v31  ;;  %v627_v37 = vadd.f32 %v625_v7, %v606_v16  ;;  %v675_v1 = vmul.f32 %v673_v10, %v672_v33  ;;  %v676_v59 = vmul.f32 %v5582_v20, %v671_v47 }
 0x20f   : > { %v726_v35 = vmul.f32 %v5379_v44, %v725_v14  ;;  %v724_v47 = vsel %vm448_vm6, %v5504_v53, %v723_v30  ;;  %vm775_vm6 = vcmp.lt.s32.totalorder %v5352_v32, 2 }
 0x210   : > { %v645_v49 = vadd.f32 %v643_v40, %v626_v21  ;;  %v646_v36 = vadd.f32 %v644_v24, %v627_v37  ;;  %v688_v29 = vpop.permute.xlu1 %687  ;;  %v681_v55 = vmul.f32 %v5242_v63, %v675_v1  ;;  %v682_v52 = vmul.f32 %v5242_v63, %v676_v59 }
 0x211   : > { %v690_v11 = vsel %vm689_vm14, %v5496_v12, %v688_v29  ;;  %v691_v10 = vsel %vm689_vm14, %v688_v29, %v5496_v12  ;;  %v733_v59 = vmul.f32 %v5227_v60, %v724_v47 }
 0x212   : > { %v664_v26 = vadd.f32 %v662_v8, %v645_v49  ;;  %v665_v38 = vadd.f32 %v663_v61, %v646_v36  ;;  %v694_v15 = vmul.f32 %v692_v23, %v691_v10  ;;  %v695_v56 = vmul.f32 %v5571_v25, %v690_v11 }
 0x214   : > { %v683_v31 = vadd.f32 %v681_v55, %v664_v26  ;;  %v684_v63 = vadd.f32 %v682_v52, %v665_v38  ;;  %v700_v16 = vmul.f32 %v5252_v3, %v694_v15  ;;  %v701_v50 = vmul.f32 %v5252_v3, %v695_v56  ;;  %v707_v7 = vpop.permute.xlu1 %706  ;;  %v739_v55 = vpop.permute.xlu0 %738 }
 0x215   : > { %v708_v12 = vsel %vm428_vm4, %v5500_v27, %v707_v7  ;;  %v709_v23 = vsel %vm428_vm4, %v707_v7, %v5500_v27  ;;  %v732_v27 = vmul.f32 %v5227_v60, %v726_v35  ;;  %vm756_vm4 = vcmp.lt.s32.totalorder %v5352_v32, 14 }
 0x216   : > { %v710_v40 = vmul.f32 %v709_v23, %v5392_v51  ;;  %v711_v24 = vmul.f32 %v5388_v46, %v708_v12  ;;  %v702_v3 = vadd.f32 %v700_v16, %v683_v31  ;;  %v703_v33 = vadd.f32 %v701_v50, %v684_v63 }
 0x217   : > { %v741_v60 = vsel %vm467_vm8, %v739_v55, %v5508_v18  ;;  %v740_v30 = vsel %vm467_vm8, %v5508_v18, %v739_v55  ;;  %vm836_vm8 = vcmp.lt.s32.totalorder %v5352_v32, 126 }
 0x218   : > { %v716_v21 = vmul.f32 %v5217_v57, %v710_v40  ;;  %v717_v37 = vmul.f32 %v5217_v57, %v711_v24  ;;  %v5629_v1 = vpop.permute.xlu1 %551  ;;  %v759_v57 = vmul.f32 %v5567_v6, %v5379_v44  ;;  %v742_v26 = vmul.f32 %v741_v60, %v5420_v13  ;;  %v5652_v56 = vpop.permute.xlu0 %1025 }
 0x219   : > { %v743_v63 = vmul.f32 %v5423_v28, %v740_v30 }
 0x21a   : > { %v718_v8 = vadd.f32 %v716_v21, %v702_v3  ;;  %v719_v51 = vadd.f32 %v717_v37, %v703_v33  ;;  %v748_v13 = vmul.f32 %v5237_v62, %v742_v26 }
 0x21b   : > { %v749_v35 = vmul.f32 %v5237_v62, %v743_v63 }
 0x21c   : > { %v734_v61 = vadd.f32 %v732_v27, %v718_v8  ;;  %v735_v49 = vadd.f32 %v733_v59, %v719_v51  ;;  %v5633_v36 = vpop.permute.xlu1 %553  ;;  %v819_v3 = vpop.permute.xlu0 %818 }
 0x21d   : > { %v820_v59 = vsel %vm517_vm11, %v5524_v42, %v819_v3 }
 0x21e   : > { %v751_v37 = vadd.f32 %v749_v35, %v735_v49  ;;  %v822_v49 = vmul.f32 %v5404_v19, %v820_v59 }
 0x220   : > { %v755_v29 = vpop.permute.xlu1 %754 }
 0x221   : > { %v758_v52 = vsel %vm756_vm4, %v755_v29, %v5533_v22  ;;  %v757_v38 = vsel %vm756_vm4, %v5533_v22, %v755_v29  ;;  %v5678_v29 = vpop.permute.xlu0 %994 }
 0x222   : > { %v761_v44 = vmul.f32 %v759_v57, %v758_v52  ;;  %v762_v16 = vmul.f32 %v5582_v20, %v757_v38  ;;  %v7028_v38 = vld [vmem:[#allocation21_spill] sm:$0xff] }
 0x224   : > { %v774_v53 = vpop.permute.xlu1 %773  ;;  %v767_v22 = vmul.f32 %v5261_v5, %v761_v44  ;;  %v768_v40 = vmul.f32 %v5261_v5, %v762_v16  ;;  %v859_v44 = vmul.f32 %v5571_v25, %v7028_v38 }
 0x225   : > { %v777_v11 = vsel %vm775_vm6, %v774_v53, %v5512_v41  ;;  %v776_v14 = vsel %vm775_vm6, %v5512_v41, %v774_v53  ;;  %v750_v41 = vadd.f32 %v748_v13, %v734_v61  ;;  %v812_v53 = vmul.f32 %v5283_v9, %v5195_v54  ;;  %v7030_v13 = vld [vmem:[#allocation25_spill] sm:$0xff] }
 0x226   : > { %v780_v31 = vmul.f32 %v5555_v39, %v777_v11  ;;  %v781_v12 = vmul.f32 %v5571_v25, %v776_v14  ;;  %v770_v8 = vadd.f32 %v768_v40, %v751_v37  ;;  %v813_v11 = vmul.f32 %v5283_v9, %v5223_v58  ;;  %v873_v14 = vpop.permute.xlu0 %872  ;;  %v7033_v40 = vld [vmem:[#allocation27_spill] sm:$0xff] }
 0x227   : > { %v769_v33 = vadd.f32 %v767_v22, %v750_v41  ;;  %v874_v22 = vsel %vm536_vm12, %v7030_v13, %v873_v14 }
 0x228   : > { %v793_v10 = vpop.permute.xlu1 %792  ;;  %v786_v23 = vmul.f32 %v5273_v2, %v780_v31 }
 0x229   : > { %v795_v15 = vsel %vm486_vm9, %v793_v10, %v5519_v43  ;;  %v794_v50 = vsel %vm486_vm9, %v5519_v43, %v793_v10  ;;  %v787_v43 = vmul.f32 %v5273_v2, %v781_v12  ;;  %v821_v2 = vsel %vm517_vm11, %v819_v3, %v5524_v42 }
 0x22a   : > { %v796_v7 = vmul.f32 %v5382_v45, %v795_v15  ;;  %v797_v24 = vmul.f32 %v5388_v46, %v794_v50  ;;  %v788_v27 = vadd.f32 %v786_v23, %v769_v33  ;;  %vm855_vm9 = vcmp.lt.s32.totalorder %v5352_v32, 114  ;;  %v7031_v23 = vld [vmem:[#allocation11_spill] sm:$0xff]  ;;  %v571_v33 = vpop.permute.xlu0 %570 }
 0x22b   : > { %v789_v61 = vadd.f32 %v787_v43, %v770_v8  ;;  %v823_v52 = vmul.f32 %v5423_v28, %v821_v2  ;;  %v828_v10 = vmul.f32 %v5315_v17, %v822_v49  ;;  %vm574_vm11 = vcmp.lt.s32.totalorder %v5352_v32, 111  ;;  %v7035_v8 = vld [vmem:[#allocation28_spill] sm:$0xff] }
 0x22c   : > { %v835_v18 = vpop.permute.xlu1 %834  ;;  %v802_v21 = vmul.f32 %v5254_v4, %v796_v7  ;;  %v803_v62 = vmul.f32 %v5254_v4, %v797_v24  ;;  %v876_v3 = vmul.f32 %v5382_v45, %v874_v22 }
 0x22d   : > { %v837_v55 = vsel %vm836_vm8, %v5539_v0, %v835_v18  ;;  %v838_v54 = vsel %vm836_vm8, %v835_v18, %v5539_v0  ;;  %v829_v63 = vmul.f32 %v5315_v17, %v823_v52  ;;  %v7029_v0 = vld [vmem:[#allocation10_spill] sm:$0xff]  ;;  %v926_v52 = vmul.f32 %v5582_v20, %v7028_v38 }
 0x22e   : > { %v804_v5 = vadd.f32 %v802_v21, %v788_v27  ;;  %v805_v4 = vadd.f32 %v803_v62, %v789_v61  ;;  %v841_v30 = vmul.f32 %v5567_v6, %v837_v55  ;;  %v842_v16 = vmul.f32 %v5582_v20, %v838_v54  ;;  %v7034_v21 = vld [vmem:[#allocation26_spill] sm:$0xff] }
 0x230   : > { %v854_v47 = vpop.permute.xlu1 %853  ;;  %v814_v60 = vadd.f32 %v812_v53, %v804_v5  ;;  %v815_v26 = vadd.f32 %v813_v11, %v805_v4  ;;  %v847_v18 = vmul.f32 %v7029_v0, %v841_v30  ;;  %v848_v17 = vmul.f32 %v7029_v0, %v842_v16  ;;  %v7036_v4 = vld [vmem:[#allocation22_spill] sm:$0xff]  ;;  %v7037_v11 = vld [vmem:[#allocation8_spill] sm:$0xff] }
 0x231   : > { %v856_v42 = vsel %vm855_vm9, %v5543_v34, %v854_v47  ;;  %v857_v58 = vsel %vm855_vm9, %v854_v47, %v5543_v34  ;;  %v7032_v34 = vld [vmem:[#allocation19_spill] sm:$0xff]  ;;  %v875_v47 = vsel %vm536_vm12, %v873_v14, %v7030_v13  ;;  %vm960_vm12 = vcmp.lt.s32.totalorder %v5352_v32, 97  ;;  %v7040_v13 = vld [vmem:[#allocation29_spill] sm:$0xff] }
 0x232   : > { %v830_v31 = vadd.f32 %v828_v10, %v814_v60  ;;  %v860_v9 = vmul.f32 %v5555_v39, %v856_v42  ;;  %v831_v50 = vadd.f32 %v829_v63, %v815_v26  ;;  %v861_v7 = vmul.f32 %v859_v44, %v857_v58  ;;  %v7038_v10 = vld [vmem:[#allocation15_spill] sm:$0xff]  ;;  %v940_v58 = vpop.permute.xlu0 %939  ;;  %v7039_v63 = vld [vmem:[#allocation14_spill] sm:$0xff] }
 0x233   : > { %vm365_vm1 = vcmp.lt.s32.totalorder %v7032_v34, 224  ;;  %v877_v55 = vmul.f32 %v875_v47, %v7036_v4  ;;  %v882_v42 = vmul.f32 %v7037_v11, %v876_v3  ;;  %v942_v22 = vsel %vm941_vm3, %v7040_v13, %v940_v58  ;;  %v7042_v34 = vld [vmem:[#allocation30_spill] sm:$0xff] }
 0x234   : > { %v5675_v51 = vpop.permute.xlu1 %572  ;;  %v849_v41 = vadd.f32 %v847_v18, %v830_v31  ;;  %v866_v35 = vmul.f32 %v7031_v23, %v860_v9  ;;  %v850_v43 = vadd.f32 %v848_v17, %v831_v50  ;;  %v867_v27 = vmul.f32 %v7031_v23, %v861_v7 }
 0x235   : > { %v5734_v61 = vsel %vm365_vm1, 1.0, %v7016_v48  ;;  %v883_v18 = vmul.f32 %v7037_v11, %v877_v55  ;;  %v557_v7 = vsel %vm555_vm2, %v5633_v36, %v5629_v1  ;;  %v946_v47 = vmul.f32 %v5555_v39, %v942_v22 }
 0x236   : > { %v868_v2 = vadd.f32 %v866_v35, %v849_v41  ;;  %v945_v44 = vmul.f32 %v5571_v25, %v5734_v61  ;;  %v964_v0 = vmul.f32 %v5388_v46, %v5734_v61  ;;  %v7041_v41 = vld [vmem:[#allocation9_spill] sm:$0xff]  ;;  %v575_v3 = vsel %vm574_vm11, %v571_v33, %v5675_v51 }
 0x237   : > { %vm1462_vm1 = vcmask 1043456  }
 0x238   : > { %v889_v57 = vpop.permute.xlu1 %888  ;;  %v884_v9 = vadd.f32 %v882_v42, %v868_v2 }
 0x239   : > { %v891_v37 = vsel %vm555_vm2, %v889_v57, %v7034_v21  ;;  %v890_v59 = vsel %vm555_vm2, %v7034_v21, %v889_v57  ;;  %v578_v57 = vmul.f32 %v5423_v28, %v7028_v38 }
 0x23a   : > { %v893_v60 = vmul.f32 %v7028_v38, %v891_v37  ;;  %v898_v54 = vmul.f32 %v7038_v10, %v890_v59  ;;  %v561_v37 = vmul.f32 %v7028_v38, %v557_v7 }
 0x23c   : > { %v905_v15 = vpop.permute.xlu1 %904  ;;  %v899_v25 = vmul.f32 %v7038_v10, %v893_v60  ;;  %v7044_v60 = vld [vmem:[#allocation31_spill] sm:$0xff]  ;;  %v7046_v10 = vld [vmem:[#allocation13_spill] sm:$0xff] }
 0x23d   : > { %v906_v24 = vsel %vm574_vm11, %v7033_v40, %v905_v15  ;;  %v907_v49 = vsel %vm574_vm11, %v905_v15, %v7033_v40  ;;  %v869_v15 = vadd.f32 %v867_v27, %v850_v43  ;;  %v576_v43 = vsel %vm574_vm11, %v5675_v51, %v571_v33  ;;  %v7043_v33 = vld [vmem:[#allocation12_spill] sm:$0xff] }
 0x23e   : > { %v908_v53 = vmul.f32 %v5404_v19, %v906_v24  ;;  %v909_v14 = vmul.f32 %v907_v49, %v578_v57  ;;  %v943_v24 = vsel %vm941_vm3, %v940_v58, %v7040_v13  ;;  %v579_v49 = vmul.f32 %v5404_v19, %v575_v3 }
 0x23f   : > { %v885_v46 = vadd.f32 %v883_v18, %v869_v15  ;;  %v947_v38 = vmul.f32 %v945_v44, %v943_v24  ;;  %v1002_v51 = vmul.f32 %v5423_v28, %v5734_v61  ;;  %v952_v4 = vmul.f32 %v7043_v33, %v946_v47  ;;  %v7047_v15 = vld [vmem:[#allocation20_spill] sm:$0xff] }
 0x240   : > { %v921_v12 = vpop.permute.xlu1 %920  ;;  %v914_v16 = vmul.f32 %v7039_v63, %v908_v53  ;;  %v915_v35 = vmul.f32 %v7039_v63, %v909_v14  ;;  %v580_v55 = vmul.f32 %v578_v57, %v576_v43  ;;  %v585_v14 = vmul.f32 %v7047_v15, %v579_v49 }
 0x241   : > { %v923_v62 = vsel %vm922_vm15, %v7035_v8, %v921_v12  ;;  %v924_v30 = vsel %vm922_vm15, %v921_v12, %v7035_v8  ;;  %v900_v12 = vadd.f32 %v898_v54, %v884_v9  ;;  %v901_v27 = vadd.f32 %v899_v25, %v885_v46 }
 0x242   : > { %v927_v26 = vmul.f32 %v5567_v6, %v923_v62  ;;  %v928_v50 = vmul.f32 %v926_v52, %v924_v30  ;;  %v556_v8 = vsel %vm555_vm2, %v5629_v1, %v5633_v36  ;;  %v7045_v36 = vld [vmem:[#allocation16_spill] sm:$0xff]  ;;  %v953_v44 = vmul.f32 %v7043_v33, %v947_v38  ;;  %v7052_v33 = vld [vmem:[#allocation2_spill] sm:$0xff] }
 0x243   : > { %v916_v21 = vadd.f32 %v914_v16, %v900_v12  ;;  %v917_v53 = vadd.f32 %v915_v35, %v901_v27  ;;  %v1021_v9 = vmul.f32 %v5582_v20, %v5734_v61  ;;  %v586_v63 = vmul.f32 %v7047_v15, %v580_v55  ;;  %v4506_v15 = vld [vmem:[%s6908_s1 + $0x8] sm:$0xff]  }
 0x244   : > { %v959_v5 = vpop.permute.xlu1 %958  ;;  %v933_v23 = vmul.f32 %v7041_v41, %v927_v26  ;;  %v934_v59 = vmul.f32 %v7041_v41, %v928_v50  ;;  %v1014_v26 = vpop.permute.xlu0 %1013  ;;  %v7048_v50 = vld [vmem:[#allocation23_spill] sm:$0xff]  ;;  %v7050_v41 = vld [vmem:[#allocation17_spill] sm:$0xff]  ;;  %vm1413_vm2 = vcmask 64512   ;;  %vm5029_vm3 = vmmov 0  }
 0x245   : > { %v961_v17 = vsel %vm960_vm12, %v7042_v34, %v959_v5  ;;  %v962_v62 = vsel %vm960_vm12, %v959_v5, %v7042_v34  ;;  %v566_v5 = vmul.f32 %v7045_v36, %v556_v8 }
 0x246   : > { %v935_v39 = vadd.f32 %v933_v23, %v916_v21  ;;  %v965_v2 = vmul.f32 %v5382_v45, %v961_v17  ;;  %v567_v45 = vmul.f32 %v7045_v36, %v561_v37  ;;  %v936_v52 = vadd.f32 %v934_v59, %v917_v53 }
 0x247   : > { %v966_v11 = vmul.f32 %v964_v0, %v962_v62  ;;  %v568_v20 = vadd.f32 %v566_v5, %v7048_v50  ;;  %v7055_v5 = vld [vmem:[#allocation4_spill] sm:$0xff] }
 0x248   : > { %v978_v31 = vpop.permute.xlu1 %977  ;;  %v971_v54 = vmul.f32 %v7046_v10, %v965_v2  ;;  %v954_v30 = vadd.f32 %v952_v4, %v935_v39  ;;  %v955_v18 = vadd.f32 %v953_v44, %v936_v52  ;;  %v1037_v47 = vpop.permute.xlu0 %1036  ;;  %v7053_v4 = vld [vmem:[#allocation6_spill] sm:$0xff] }
 0x249   : > { %v981_v1 = vsel %vm979_vm5, %v978_v31, %v7044_v60  ;;  %v980_v16 = vsel %vm979_vm5, %v7044_v60, %v978_v31  ;;  %v972_v13 = vmul.f32 %v7046_v10, %v966_v11  ;;  %v587_v34 = vadd.f32 %v585_v14, %v568_v20  ;;  %v7054_v60 = vld [vmem:[#allocation3_spill] sm:$0xff]  ;;  %v7057_v11 = vld [vmem:[#allocation5_spill] sm:$0xff] }
 0x24a   : > { %v985_v58 = vmul.f32 %v5734_v61, %v981_v1  ;;  %v7049_v61 = vld [vmem:[#allocation24_spill] sm:$0xff]  ;;  %v973_v12 = vadd.f32 %v971_v54, %v954_v30  ;;  %v990_v23 = vmul.f32 %v7050_v41, %v980_v16  ;;  %v246_v55 = vmul.f32 %v7053_v4, %v7052_v33 }
 0x24b   : > { %v569_v7 = vadd.f32 %v567_v45, %v7049_v61  ;;  %v974_v17 = vadd.f32 %v972_v13, %v955_v18  ;;  %v1044_v27 = vadd.f32 %v1037_v47, %v587_v34  ;;  %v248_v1 = vmul.f32 %v7053_v4, %v7054_v60  ;;  %v7056_v45 = vld [vmem:[#allocation7_spill] sm:$0xff] }
 0x24c   : > { %v997_v40 = vpop.permute.xlu1 %996  ;;  %v991_v31 = vmul.f32 %v7050_v41, %v985_v58  ;;  %v992_v3 = vadd.f32 %v990_v23, %v973_v12  ;;  %v245_v52 = vmul.f32 %v7056_v45, %v7055_v5  ;;  %v7058_v58 = vmov 0  }
 0x24d   : > { %v999_v28 = vsel %vm998_vm7, %v5678_v29, %v997_v40  ;;  %v1000_v57 = vsel %vm998_vm7, %v997_v40, %v5678_v29  ;;  %v588_v32 = vadd.f32 %v586_v63, %v569_v7  ;;  %v7051_v40 = vld [vmem:[#allocation18_spill] sm:$0xff]  ;;  %vm1048_vm14 = vcmp.ge.f32.partialorder %v1044_v27, 0.0 }
 0x24e   : > { %v1003_v22 = vmul.f32 %v5404_v19, %v999_v28  ;;  %v1004_v25 = vmul.f32 %v1002_v51, %v1000_v57  ;;  %v993_v21 = vadd.f32 %v991_v31, %v974_v17  ;;  %v1052_v51 = vmul.f32 0.01, %v1044_v27  ;;  %v4508_v63 = vld [vmem:[%s6908_s1 + $0x20] sm:$0xff]  }
 0x24f   : > { %v1045_v59 = vadd.f32 %v1037_v47, %v588_v32  ;;  %v1219_v44 = vpack.c.bf16 %v248_v1, %v246_v55 }
 0x250   : > { %v1016_v42 = vpop.permute.xlu1 %1015  ;;  %v1009_v24 = vmul.f32 %v7051_v40, %v1003_v22  ;;  %v1010_v19 = vmul.f32 %v7051_v40, %v1004_v25  ;;  %v1056_v30 = vsel %vm1048_vm14, %v1044_v27, %v1052_v51 }
 0x251   : > { %v1018_v0 = vsel %vm1017_vm10, %v1014_v26, %v1016_v42  ;;  %v1019_v29 = vsel %vm1017_vm10, %v1016_v42, %v1014_v26  ;;  %v1053_v53 = vmul.f32 0.01, %v1045_v59  ;;  %vm1049_vm13 = vcmp.ge.f32.partialorder %v1045_v59, 0.0 }
 0x252   : > { %v1022_v46 = vmul.f32 %v5567_v6, %v1018_v0  ;;  %v1023_v35 = vmul.f32 %v1021_v9, %v1019_v29  ;;  %v1011_v8 = vadd.f32 %v1009_v24, %v992_v3  ;;  %v1012_v39 = vadd.f32 %v1010_v19, %v993_v21  ;;  %v4507_v9 = vld [vmem:[%s6908_s1 + $0x18] sm:$0xff]   ;;  %v1233_v0 = vpop.permute.xlu0 %1232 }
 0x253   : > { %v247_v42 = vmul.f32 %v7056_v45, %v7057_v11  ;;  %v1057_v10 = vsel %vm1049_vm13, %v1045_v59, %v1053_v53  ;;  %v4509_v59 = vld [vmem:[%s6908_s1 + $0x10] sm:$0xff]  }
 0x254   : > { %v1028_v37 = vmul.f32 %v5652_v56, %v1022_v46  ;;  %v1029_v43 = vmul.f32 %v5652_v56, %v1023_v35 }
 0x255   : > { %v1218_v14 = vpack.c.bf16 %v247_v42, %v245_v52 }
 0x256   : > { %v1030_v6 = vadd.f32 %v1028_v37, %v1011_v8  ;;  %v1031_v62 = vadd.f32 %v1029_v43, %v1012_v39  ;;  %v1074_v25 = vpop.permute.xlu0 %1073 }
 0x25a   : > { %v1228_v8 = vpop.permute.xlu0 %1227 }
 0x25e   : > { %v1238_v60 = vpop.permute.xlu0 %1237 }
 0x261   : > { %v1042_v2 = vpop.permute.xlu1 %1041 }
 0x262   : > { %v1046_v38 = vadd.f32 %v1042_v2, %v1030_v6  ;;  %v1047_v49 = vadd.f32 %v1042_v2, %v1031_v62 }
 0x264   : > { %vm1051_vm4 = vcmp.ge.f32.partialorder %v1047_v49, 0.0  ;;  %v1055_v56 = vmul.f32 0.01, %v1047_v49  ;;  %vm1050_vm6 = vcmp.ge.f32.partialorder %v1046_v38, 0.0  ;;  %v1054_v36 = vmul.f32 0.01, %v1046_v38 }
 0x265   : > { %v1223_v16 = vpop.permute.xlu1 %1222 }
 0x266   : > { %v1059_v54 = vsel %vm1051_vm4, %v1047_v49, %v1055_v56  ;;  %v1058_v28 = vsel %vm1050_vm6, %v1046_v38, %v1054_v36 }
 0x267   : > { %v1065_v57 = vpack.c.bf16 %v1059_v54, %v1057_v10  ;;  %v1064_v26 = vpack.c.bf16 %v1058_v28, %v1056_v30 }
 0x269   : > { %1084 = vmatprep.subr.bf16.mxu1 %v1065_v57  ;;  %v1069_v29 = vpop.permute.xlu1 %1068 }
 0x26a   : > { %1085 = vmatpush1.bf16.msra.mxu1 %v1064_v26 }
 0x26b   : > { %1274 = vmatprep.subr.bf16.mxu1 %v1219_v44 }
 0x26d   : > { %4185 = vmatmul.mubr.msk.bf16.vlgmr.msra.gmra.mrb[0].mxu1 %vm270_vm0, %v4506_v15 }
 0x26e   : > { %1275 = vmatpush1.bf16.msra.mxu1 %v1218_v14  ;;  %1306 = vmatprep.mubr.bf16.mxu1 %v7058_v58 }
 0x275   : > { %4191 = vmatmul.mubr.msk.bf16.vlgmr.msra.gmra.mrb[4].mxu1 %vm270_vm0, %v4507_v9 }
 0x276   : > { %1316 = vmatprep.mubr.bf16.mxu1 %v7058_v58 }
 0x27d   : > { %4192 = vmatmul.mubr.msk.bf16.gmra.mrb[8].mxu1 %vm270_vm0, %v4508_v63 }
 0x27e   : > { %1326 = vmatprep.mubr.bf16.mxu1 %v7058_v58 }
 0x340   : > { %v1118_v18 = vpop.f32.mrb[0].mxu1 }
 0x341   : > { %v1119_v13 = vadd.f32 %v1118_v18, %v1069_v29  ;;  %v1120_v22 = vpop.f32.mrb[1].mxu1 }
 0x342   : > { %v1121_v50 = vadd.f32 %v1120_v22, %v1069_v29  ;;  %v1122_v20 = vpop.f32.mrb[2].mxu1 }
 0x343   : > { %v1131_v61 = vmul.f32 0.01, %v1119_v13  ;;  %v1123_v7 = vadd.f32 %v1122_v20, %v1074_v25  ;;  %v1124_v12 = vpop.f32.mrb[3].mxu1  ;;  %vm1127_vm8 = vcmp.ge.f32.partialorder %v1119_v13, 0.0 }
 0x344   : > { %v1132_v41 = vmul.f32 0.01, %v1121_v50  ;;  %v1125_v23 = vadd.f32 %v1124_v12, %v1074_v25  ;;  %vm1128_vm9 = vcmp.ge.f32.partialorder %v1121_v50, 0.0 }
 0x345   : > { %vm1129_vm11 = vcmp.ge.f32.partialorder %v1123_v7, 0.0  ;;  %v1133_v31 = vmul.f32 0.01, %v1123_v7  ;;  %v1135_v35 = vsel %vm1127_vm8, %v1119_v13, %v1131_v61  ;;  %vm3594_vm8 = vcmask 523264  }
 0x346   : > { %vm1130_vm15 = vcmp.ge.f32.partialorder %v1125_v23, 0.0  ;;  %v1134_v46 = vmul.f32 0.01, %v1125_v23  ;;  %v1136_v40 = vsel %vm1128_vm9, %v1121_v50, %v1132_v41 }
 0x347   : > { %v1137_v32 = vsel %vm1129_vm11, %v1123_v7, %v1133_v31 }
 0x348   : > { %v1143_v34 = vpack.c.bf16 %v1137_v32, %v1135_v35  ;;  %v1308_v17 = vpop.f32.mrb[4].mxu1  ;;  %v1138_v24 = vsel %vm1130_vm15, %v1125_v23, %v1134_v46 }
 0x349   : > { %v5858_v19 = vadd.f32 %v1308_v17, %v1223_v16  ;;  %v1310_v47 = vpop.f32.mrb[5].mxu1  ;;  %v1144_v3 = vpack.c.bf16 %v1138_v24, %v1136_v40 }
 0x34a   : > { %v5860_v21 = vadd.f32 %v1310_v47, %v1223_v16  ;;  %v1312_v37 = vpop.f32.mrb[6].mxu1 }
 0x34b   : > { %v1337_v43 = vmul.f32 %v5858_v19, %v5858_v19  ;;  %1163 = vmatprep.subr.bf16.mxu0 %v1144_v3  ;;  %v1314_v27 = vpop.f32.mrb[7].mxu1  ;;  %v5870_v49 = vadd.f32 %v1312_v37, %v1228_v8 }
 0x34c   : > { %v1338_v39 = vmul.f32 %v5860_v21, %v5860_v21  ;;  %1164 = vmatpush1.bf16.msra.mxu0 %v1143_v34  ;;  %v5873_v33 = vadd.f32 %v1314_v27, %v1228_v8 }
 0x34d   : > { %v1339_v6 = vrot.slane %v1337_v43, 4  ;;  %v2241_v10 = vmul.f32 %v5870_v49, %v5870_v49 }
 0x34e   : > { %v1345_v62 = vrot.slane %v1338_v39, 4  ;;  %v2242_v57 = vmul.f32 %v5873_v33, %v5873_v33 }
 0x34f   : > { %v1340_v2 = vadd.f32 %v1339_v6, %v1337_v43  ;;  %4187 = vmatmul.mubr.msk.bf16.vlgmr.msra.gmra.mrb[4].mxu0 %vm270_vm0, %v4509_v59  ;;  %v2243_v18 = vrot.slane %v2241_v10, 4 }
 0x350   : > { %v1346_v38 = vadd.f32 %v1345_v62, %v1338_v39  ;;  %v1318_v53 = vpop.f32.mrb[8].mxu1  ;;  %1501 = vmatprep.mubr.bf16.mxu0 %v7058_v58  ;;  %v2249_v50 = vrot.slane %v2242_v57, 4 }
 0x351   : > { %v1341_v51 = vrot.slane %v1340_v2, 2  ;;  %v5875_v4 = vadd.f32 %v1318_v53, %v1233_v0  ;;  %v1320_v55 = vpop.f32.mrb[9].mxu1  ;;  %v2244_v46 = vadd.f32 %v2243_v18, %v2241_v10 }
 0x352   : > { %v1347_v1 = vrot.slane %v1346_v38, 2  ;;  %v5877_v56 = vadd.f32 %v1320_v55, %v1233_v0  ;;  %v1322_v36 = vpop.f32.mrb[10].mxu1  ;;  %v2250_v34 = vadd.f32 %v2249_v50, %v2242_v57 }
 0x353   : > { %v1342_v5 = vadd.f32 %v1341_v51, %v1340_v2  ;;  %v1357_v45 = vmul.f32 %v5875_v4, %v5875_v4  ;;  %v5881_v52 = vadd.f32 %v1322_v36, %v1238_v60  ;;  %v1324_v11 = vpop.f32.mrb[11].mxu1  ;;  %v2245_v43 = vrot.slane %v2244_v46, 2 }
 0x354   : > { %v1348_v42 = vadd.f32 %v1347_v1, %v1346_v38  ;;  %v1358_v54 = vmul.f32 %v5877_v56, %v5877_v56  ;;  %v5887_v30 = vadd.f32 %v1324_v11, %v1238_v60  ;;  %v2251_v8 = vrot.slane %v2250_v34, 2 }
 0x355   : > { %v1343_v28 = vrot.slane %v1342_v5, 1  ;;  %v1359_v26 = vrot.slane %v1357_v45, 4  ;;  %v2261_v44 = vmul.f32 %v5881_v52, %v5881_v52  ;;  %v2246_v53 = vadd.f32 %v2245_v43, %v2244_v46 }
 0x356   : > { %v1349_v15 = vrot.slane %v1348_v42, 1  ;;  %v1365_v14 = vrot.slane %v1358_v54, 4  ;;  %v2262_v9 = vmul.f32 %v5887_v30, %v5887_v30  ;;  %v2252_v60 = vadd.f32 %v2251_v8, %v2250_v34 }
 0x357   : > { %v1344_v63 = vadd.f32 %v1343_v28, %v1342_v5  ;;  %v1360_v16 = vadd.f32 %v1359_v26, %v1357_v45  ;;  %v2263_v0 = vrot.slane %v2261_v44, 4  ;;  %v2247_v11 = vrot.slane %v2246_v53, 1 }
 0x358   : > { %v1350_v29 = vadd.f32 %v1349_v15, %v1348_v42  ;;  %v1366_v13 = vadd.f32 %v1365_v14, %v1358_v54  ;;  %v2269_v22 = vrot.slane %v2262_v9, 4  ;;  %v2253_v10 = vrot.slane %v2252_v60, 1 }
 0x359   : > { %v1351_v25 = vmax.f32 %v1344_v63, 1e-24  ;;  %v1361_v20 = vrot.slane %v1360_v16, 2  ;;  %v2264_v61 = vadd.f32 %v2263_v0, %v2261_v44  ;;  %v2248_v54 = vadd.f32 %v2247_v11, %v2246_v53 }
 0x35a   : > { %v1352_v7 = vmax.f32 %v1350_v29, 1e-24  ;;  %v1367_v12 = vrot.slane %v1366_v13, 2  ;;  %v2270_v41 = vadd.f32 %v2269_v22, %v2262_v9  ;;  %v2254_v57 = vadd.f32 %v2253_v10, %v2252_v60 }
 0x35b   : > { %4526 = vrsqrt.f32 %v1351_v25  ;;  %v1362_v23 = vadd.f32 %v1361_v20, %v1360_v16  ;;  %v2265_v31 = vrot.slane %v2264_v61, 2  ;;  %v2255_v9 = vmax.f32 %v2248_v54, 1e-24 }
 0x35c   : > { %4528 = vrsqrt.f32 %v1352_v7  ;;  %v1368_v35 = vadd.f32 %v1367_v12, %v1366_v13  ;;  %v2271_v32 = vrot.slane %v2270_v41, 2  ;;  %v2256_v16 = vmax.f32 %v2254_v57, 1e-24 }
 0x35d   : > { %v1363_v17 = vrot.slane %v1362_v23, 1  ;;  %v2266_v40 = vadd.f32 %v2265_v31, %v2264_v61 }
 0x35e   : > { %v1369_v24 = vrot.slane %v1368_v35, 1  ;;  %v2272_v47 = vadd.f32 %v2271_v32, %v2270_v41 }
 0x35f   : > { %v1364_v3 = vadd.f32 %v1363_v17, %v1362_v23  ;;  %v2267_v37 = vrot.slane %v2266_v40, 1  ;;  %v4510_v23 = vld [vmem:[%s6908_s1 + $0x28] sm:$0xff]  }
 0x360   : > { %v1370_v27 = vadd.f32 %v1369_v24, %v1368_v35  ;;  %v2273_v59 = vrot.slane %v2272_v47, 1  ;;  %4193 = vmatmul.mubr.msk.bf16.gmra.mrb[12].mxu1 %vm270_vm0, %v4510_v23 }
 0x361   : > { %v1371_v39 = vmax.f32 %v1364_v3, 1e-24  ;;  %v2268_v6 = vadd.f32 %v2267_v37, %v2266_v40 }
 0x362   : > { %v1372_v62 = vmax.f32 %v1370_v27, 1e-24  ;;  %v2274_v2 = vadd.f32 %v2273_v59, %v2272_v47 }
 0x363   : > { %4530 = vrsqrt.f32 %v1371_v39  ;;  %v2275_v38 = vmax.f32 %v2268_v6, 1e-24 }
 0x364   : > { %4532 = vrsqrt.f32 %v1372_v62  ;;  %v2276_v51 = vmax.f32 %v2274_v2, 1e-24 }
 0x365   : > { %v4527_v55 = vpop.eup %4526  ;;  %4534 = vrsqrt.f32 %v2275_v38 }
 0x366   : > { %v4529_v1 = vpop.eup %4528  ;;  %v1355_v36 = vmul.f32 %v4527_v55, %v5858_v19  ;;  %4536 = vrsqrt.f32 %v2276_v51 }
 0x367   : > { %v1356_v5 = vmul.f32 %v4529_v1, %v5860_v21  ;;  %4538 = vrsqrt.f32 %v2255_v9 }
 0x368   : > { %v1377_v45 = vpack.c.bf16 %v1355_v36, %v1355_v36  ;;  %4540 = vrsqrt.f32 %v2256_v16 }
 0x369   : > { %v1378_v42 = vpack.c.bf16 %v1356_v5, %v1356_v5 }
 0x36a   : > { %1381 = vxpose.xlu1.c.b16.start.end [1/1] (short) %v1377_v45, 128 }
 0x36b   : > { %1397 = vxpose.xlu0.c.b16.start.end [1/1] (short) %v1378_v42, 128 }
 0x36d   : > { %v4531_v28 = vpop.eup %4530 }
 0x36e   : > { %v4533_v26 = vpop.eup %4532  ;;  %v1375_v44 = vmul.f32 %v4531_v28, %v5875_v4 }
 0x36f   : > { %v4535_v15 = vpop.eup %4534  ;;  %v1376_v14 = vmul.f32 %v4533_v26, %v5877_v56 }
 0x370   : > { %v4537_v19 = vpop.eup %4536  ;;  %v1379_v63 = vpack.c.bf16 %v1375_v44, %v1375_v44  ;;  %v2279_v21 = vmul.f32 %v4535_v15, %v5881_v52 }
 0x371   : > { %v1380_v0 = vpack.c.bf16 %v1376_v14, %v1376_v14  ;;  %v2280_v29 = vmul.f32 %v4537_v19, %v5887_v30  ;;  %v4539_v56 = vpop.eup %4538 }
 0x372   : > { %v2283_v18 = vpack.c.bf16 %v2279_v21, %v2279_v21  ;;  %v1464_v13 = vsel %vm1462_vm1, %v1379_v63, 0  ;;  %v4541_v25 = vpop.eup %4540  ;;  %v2259_v52 = vmul.f32 %v4539_v56, %v5870_v49 }
 0x373   : > { %v2284_v22 = vpack.c.bf16 %v2280_v29, %v2280_v29  ;;  %4194 = vmatprep.subr.msk.bf16.mxu0 %vm1462_vm1, %v1380_v0  ;;  %v2260_v50 = vmul.f32 %v4541_v25, %v5873_v33 }
 0x374   : > { %1470 = vmatpush1.bf16.msra.mxu0 %v1464_v13  ;;  %v2366_v4 = vsel %vm1462_vm1, %v2283_v18, 0  ;;  %v2281_v30 = vpack.c.bf16 %v2259_v52, %v2259_v52 }
 0x375   : > { %4211 = vmatprep.subr.msk.bf16.mxu0 %vm1462_vm1, %v2284_v22  ;;  %v2282_v20 = vpack.c.bf16 %v2260_v50, %v2260_v50 }
 0x387   : > { %2285 = vxpose.xlu1.c.b16.start.end [1/1] (short) %v2281_v30, 128 }
 0x388   : > { %2301 = vxpose.xlu0.c.b16.start.end [1/1] (short) %v2282_v20, 128 }
 0x3d0   : > { %v1389_v61 = vpop.trf.xlu1 }
 0x3d1   : > { %4195 = vmatmul.mubr.msk.bf16.vlgmr.msra.gmra.mrb[8].mxu0 %vm1413_vm2, %v1389_v61  ;;  %v1405_v35 = vpop.trf.xlu0 }
 0x3d2   : > { %2372 = vmatpush1.bf16.msra.mxu0 %v2366_v4  ;;  %1511 = vmatprep.mubr.bf16.mxu0 %v7058_v58 }
 0x3d4   : > { %v1390_v7 = vpop.trf.xlu1 }
 0x3d5   : > { %v1406_v32 = vpop.trf.xlu0 }
 0x3d8   : > { %v1391_v12 = vpop.trf.xlu1 }
 0x3d9   : > { %4196 = vmatmul.mubr.msk.bf16.gmra.mrb[12].mxu0 %vm1413_vm2, %v1390_v7  ;;  %v1407_v34 = vpop.trf.xlu0 }
 0x3da   : > { %1521 = vmatprep.mubr.bf16.mxu0 %v7058_v58 }
 0x3dc   : > { %v1392_v49 = vpop.trf.xlu1 }
 0x3dd   : > { %v1408_v3 = vpop.trf.xlu0 }
 0x3e0   : > { %v1393_v33 = vpop.trf.xlu1 }
 0x3e1   : > { %4197 = vmatmul.mubr.msk.bf16.gmra.mrb[16].mxu0 %vm1413_vm2, %v1391_v12  ;;  %v1409_v37 = vpop.trf.xlu0 }
 0x3e2   : > { %1531 = vmatprep.mubr.bf16.mxu0 %v7058_v58 }
 0x3e4   : > { %v1394_v41 = vpop.trf.xlu1 }
 0x3e5   : > { %v1410_v43 = vpop.trf.xlu0 }
 0x3e8   : > { %v1395_v31 = vpop.trf.xlu1 }
 0x3e9   : > { %4198 = vmatmul.mubr.msk.bf16.gmra.mrb[20].mxu0 %vm1413_vm2, %v1392_v49  ;;  %v1411_v27 = vpop.trf.xlu0 }
 0x3ea   : > { %1541 = vmatprep.mubr.bf16.mxu0 %v7058_v58 }
 0x3ec   : > { %v1396_v46 = vpop.trf.xlu1 }
 0x3ed   : > { %v1412_v59 = vpop.trf.xlu0 }
 0x3f0   : > { %v2293_v8 = vpop.trf.xlu1 }
 0x3f1   : > { %4199 = vmatmul.mubr.msk.bf16.gmra.mrb[24].mxu0 %vm1413_vm2, %v1393_v33  ;;  %v2309_v55 = vpop.trf.xlu0 }
 0x3f2   : > { %1551 = vmatprep.mubr.bf16.mxu0 %v7058_v58 }
 0x3f4   : > { %v2294_v39 = vpop.trf.xlu1 }
 0x3f5   : > { %v2310_v60 = vpop.trf.xlu0 }
 0x3f8   : > { %v2295_v6 = vpop.trf.xlu1 }
 0x3f9   : > { %4200 = vmatmul.mubr.msk.bf16.gmra.mrb[28].mxu0 %vm1413_vm2, %v1394_v41  ;;  %v2311_v1 = vpop.trf.xlu0 }
 0x3fa   : > { %1561 = vmatprep.mubr.bf16.mxu0 %v7058_v58 }
 0x3fc   : > { %v2296_v62 = vpop.trf.xlu1 }
 0x3fd   : > { %v2312_v10 = vpop.trf.xlu0 }
 0x400   : > { %v2297_v2 = vpop.trf.xlu1 }
 0x401   : > { %4201 = vmatmul.mubr.msk.bf16.gmra.mrb[32].mxu0 %vm1413_vm2, %v1395_v31  ;;  %v2313_v0 = vpop.trf.xlu0 }
 0x402   : > { %1571 = vmatprep.mubr.bf16.mxu0 %v7058_v58 }
 0x404   : > { %v2298_v38 = vpop.trf.xlu1 }
 0x405   : > { %v2314_v23 = vpop.trf.xlu0 }
 0x408   : > { %v2299_v53 = vpop.trf.xlu1 }
 0x409   : > { %4202 = vmatmul.mubr.msk.bf16.gmra.mrb[36].mxu0 %vm1413_vm2, %v1396_v46 }
 0x40a   : > { %1581 = vmatprep.mubr.bf16.mxu0 %v7058_v58 }
 0x40c   : > { %v2300_v51 = vpop.trf.xlu1 }
 0x411   : > { %4203 = vmatmul.mubr.msk.bf16.gmra.mrb[40].mxu0 %vm1413_vm2, %v1405_v35 }
 0x412   : > { %1591 = vmatprep.mubr.bf16.mxu0 %v7058_v58 }
 0x419   : > { %4204 = vmatmul.mubr.msk.bf16.gmra.mrb[44].mxu0 %vm1413_vm2, %v1406_v32 }
 0x41a   : > { %1601 = vmatprep.mubr.bf16.mxu0 %v7058_v58 }
 0x421   : > { %4205 = vmatmul.mubr.msk.bf16.gmra.mrb[48].mxu0 %vm1413_vm2, %v1407_v34 }
 0x422   : > { %1611 = vmatprep.mubr.bf16.mxu0 %v7058_v58  ;;  %v5933_v17 = vpop.f32.mrb[4].mxu0 }
 0x423   : > { %7059 = vst [vmem:[#allocation21_spill] sm:$0xff] %v5933_v17  ;;  %v5935_v40 = vpop.f32.mrb[5].mxu0 }
 0x424   : > { %7060 = vst [vmem:[#allocation10_spill] sm:$0xff] %v5935_v40  ;;  %v5937_v24 = vpop.f32.mrb[6].mxu0 }
 0x425   : > { %7061 = vst [vmem:[#allocation25_spill] sm:$0xff] %v5937_v24  ;;  %v5939_v47 = vpop.f32.mrb[7].mxu0 }
 0x426   : > { %7062 = vst [vmem:[#allocation11_spill] sm:$0xff] %v5939_v47 }
 0x429   : > { %4206 = vmatmul.mubr.msk.bf16.gmra.mrb[52].mxu0 %vm1413_vm2, %v1408_v3 }
 0x42a   : > { %1621 = vmatprep.mubr.bf16.mxu0 %v7058_v58 }
 0x431   : > { %4207 = vmatmul.mubr.msk.bf16.gmra.mrb[56].mxu0 %vm1413_vm2, %v1409_v37 }
 0x432   : > { %1631 = vmatprep.mubr.bf16.mxu0 %v7058_v58 }
 0x439   : > { %4208 = vmatmul.mubr.msk.bf16.gmra.mrb[60].mxu0 %vm1413_vm2, %v1410_v43 }
 0x43a   : > { %1641 = vmatprep.mubr.bf16.mxu0 %v7058_v58 }
 0x441   : > { %4209 = vmatmul.mubr.msk.bf16.gmra.mrb[64].mxu0 %vm1413_vm2, %v1411_v27 }
 0x442   : > { %1651 = vmatprep.mubr.bf16.mxu0 %v7058_v58 }
 0x449   : > { %4210 = vmatmul.mubr.msk.bf16.gmra.mrb[68].mxu0 %vm1413_vm2, %v1412_v59 }
 0x44a   : > { %2403 = vmatprep.mubr.bf16.mxu0 %v7058_v58 }
 0x451   : > { %4212 = vmatmul.mubr.msk.bf16.vlgmr.msra.gmra.mrb[72].mxu0 %vm1413_vm2, %v2293_v8 }
 0x452   : > { %2413 = vmatprep.mubr.bf16.mxu0 %v7058_v58 }
 0x459   : > { %4213 = vmatmul.mubr.msk.bf16.gmra.mrb[76].mxu0 %vm1413_vm2, %v2294_v39 }
 0x45a   : > { %2423 = vmatprep.mubr.bf16.mxu0 %v7058_v58 }
 0x461   : > { %4214 = vmatmul.mubr.msk.bf16.gmra.mrb[80].mxu0 %vm1413_vm2, %v2295_v6 }
 0x462   : > { %2433 = vmatprep.mubr.bf16.mxu0 %v7058_v58 }
 0x469   : > { %4215 = vmatmul.mubr.msk.bf16.gmra.mrb[84].mxu0 %vm1413_vm2, %v2296_v62 }
 0x46a   : > { %2443 = vmatprep.mubr.bf16.mxu0 %v7058_v58 }
 0x471   : > { %4216 = vmatmul.mubr.msk.bf16.gmra.mrb[88].mxu0 %vm1413_vm2, %v2297_v2 }
 0x472   : > { %2453 = vmatprep.mubr.bf16.mxu0 %v7058_v58 }
 0x479   : > { %4217 = vmatmul.mubr.msk.bf16.gmra.mrb[92].mxu0 %vm1413_vm2, %v2298_v38 }
 0x47a   : > { %2463 = vmatprep.mubr.bf16.mxu0 %v7058_v58 }
 0x481   : > { %4218 = vmatmul.mubr.msk.bf16.gmra.mrb[96].mxu0 %vm1413_vm2, %v2299_v53 }
 0x482   : > { %2473 = vmatprep.mubr.bf16.mxu0 %v7058_v58 }
 0x489   : > { %4219 = vmatmul.mubr.msk.bf16.gmra.mrb[100].mxu0 %vm1413_vm2, %v2300_v51 }
 0x48a   : > { %2483 = vmatprep.mubr.bf16.mxu0 %v7058_v58 }
 0x491   : > { %4220 = vmatmul.mubr.msk.bf16.gmra.mrb[104].mxu0 %vm1413_vm2, %v2309_v55  ;;  %v2315_v55 = vpop.trf.xlu0 }
 0x492   : > { %2493 = vmatprep.mubr.bf16.mxu0 %v7058_v58 }
 0x499   : > { %4221 = vmatmul.mubr.msk.bf16.gmra.mrb[108].mxu0 %vm1413_vm2, %v2310_v60 }
 0x49a   : > { %2503 = vmatprep.mubr.bf16.mxu0 %v7058_v58 }
 0x4a1   : > { %4222 = vmatmul.mubr.msk.bf16.gmra.mrb[112].mxu0 %vm1413_vm2, %v2311_v1 }
 0x4a2   : > { %2513 = vmatprep.mubr.bf16.mxu0 %v7058_v58 }
 0x4a4   : > { %v1503_v36 = vpop.f32.mrb[8].mxu0 }
 0x4a5   : > { %v1662_v5 = vmul.f32 0.25, %v1503_v36  ;;  %v1505_v45 = vpop.f32.mrb[9].mxu0 }
 0x4a6   : > { %v1663_v11 = vmul.f32 0.25, %v1505_v45  ;;  %v1507_v42 = vpop.f32.mrb[10].mxu0 }
 0x4a7   : > { %v1726_v54 = vmul.f32 1.442695, %v1662_v5  ;;  %v1664_v28 = vmul.f32 0.25, %v1507_v42  ;;  %v1509_v57 = vpop.f32.mrb[11].mxu0 }
 0x4a8   : > { %v1728_v26 = vmul.f32 1.442695, %v1663_v11  ;;  %v1665_v44 = vmul.f32 0.25, %v1509_v57 }
 0x4a9   : > { %4542 = vpow2.f32 %v1726_v54  ;;  %v1730_v15 = vmul.f32 1.442695, %v1664_v28  ;;  %4223 = vmatmul.mubr.msk.bf16.gmra.mrb[116].mxu0 %vm1413_vm2, %v2312_v10 }
 0x4aa   : > { %4544 = vpow2.f32 %v1728_v26  ;;  %v1732_v14 = vmul.f32 1.442695, %v1665_v44  ;;  %2523 = vmatprep.mubr.bf16.mxu0 %v7058_v58 }
 0x4ab   : > { %4546 = vpow2.f32 %v1730_v15 }
 0x4ac   : > { %4548 = vpow2.f32 %v1732_v14  ;;  %v1513_v19 = vpop.f32.mrb[12].mxu0 }
 0x4ad   : > { %v1666_v9 = vmul.f32 0.25, %v1513_v19  ;;  %v1515_v63 = vpop.f32.mrb[13].mxu0 }
 0x4ae   : > { %v1667_v21 = vmul.f32 0.25, %v1515_v63  ;;  %v1517_v16 = vpop.f32.mrb[14].mxu0 }
 0x4af   : > { %v1734_v29 = vmul.f32 1.442695, %v1666_v9  ;;  %v1668_v18 = vmul.f32 0.25, %v1517_v16  ;;  %v1519_v13 = vpop.f32.mrb[15].mxu0 }
 0x4b0   : > { %v1736_v22 = vmul.f32 1.442695, %v1667_v21  ;;  %v1669_v4 = vmul.f32 0.25, %v1519_v13  ;;  %v2316_v21 = vpop.trf.xlu0 }
 0x4b1   : > { %4550 = vpow2.f32 %v1734_v29  ;;  %v1738_v56 = vmul.f32 1.442695, %v1668_v18  ;;  %4224 = vmatmul.mubr.msk.bf16.gmra.mrb[120].mxu0 %vm1413_vm2, %v2313_v0 }
 0x4b2   : > { %4552 = vpow2.f32 %v1736_v22  ;;  %v1740_v25 = vmul.f32 1.442695, %v1669_v4  ;;  %2533 = vmatprep.mubr.bf16.mxu0 %v7058_v58 }
 0x4b3   : > { %v5977_v52 = vpop.eup %4542  ;;  %4554 = vpow2.f32 %v1738_v56 }
 0x4b4   : > { %v5979_v50 = vpop.eup %4544  ;;  %4556 = vpow2.f32 %v1740_v25  ;;  %v1523_v30 = vpop.f32.mrb[16].mxu0 }
 0x4b5   : > { %v5981_v20 = vpop.eup %4546  ;;  %v1670_v61 = vmul.f32 0.25, %v1523_v30  ;;  %v1525_v7 = vpop.f32.mrb[17].mxu0  ;;  %v1854_v12 = vadd.f32 %v5979_v50, %v5977_v52 }
 0x4b6   : > { %v5985_v49 = vpop.eup %4548  ;;  %v1671_v33 = vmul.f32 0.25, %v1525_v7  ;;  %v1527_v41 = vpop.f32.mrb[18].mxu0  ;;  %v1216_v7 = vld [vmem:[%s6909_s2 + $0x70] sm:$0xff] }
 0x4b7   : > { %v1742_v31 = vmul.f32 1.442695, %v1670_v61  ;;  %v1672_v46 = vmul.f32 0.25, %v1527_v41  ;;  %1855 = vadd.xlane.f32.xlu1 %v1854_v12  ;;  %v1529_v35 = vpop.f32.mrb[19].mxu0  ;;  %v1857_v32 = vadd.f32 %v5985_v49, %v5981_v20 }
 0x4b8   : > { %v1744_v34 = vmul.f32 1.442695, %v1671_v33  ;;  %v1673_v3 = vmul.f32 0.25, %v1529_v35 }
 0x4b9   : > { %4558 = vpow2.f32 %v1742_v31  ;;  %v1746_v37 = vmul.f32 1.442695, %v1672_v46  ;;  %4225 = vmatmul.mubr.msk.bf16.gmra.mrb[124].mxu0 %vm1413_vm2, %v2314_v23  ;;  %1858 = vadd.xlane.f32.xlu0 %v1857_v32  ;;  %v6031_v46 = vpop.f32.mrb[12].mxu1 }
 0x4ba   : > { %4560 = vpow2.f32 %v1744_v34  ;;  %v1748_v43 = vmul.f32 1.442695, %v1673_v3  ;;  %2543 = vmatprep.mubr.bf16.mxu0 %v7058_v58  ;;  %v6033_v34 = vpop.f32.mrb[13].mxu1 }
 0x4bb   : > { %v5991_v27 = vpop.eup %4550  ;;  %4562 = vpow2.f32 %v1746_v37 }
 0x4bc   : > { %v5993_v59 = vpop.eup %4552  ;;  %4564 = vpow2.f32 %v1748_v43  ;;  %v1533_v8 = vpop.f32.mrb[20].mxu0 }
 0x4bd   : > { %v5995_v39 = vpop.eup %4554  ;;  %v1674_v6 = vmul.f32 0.25, %v1533_v8  ;;  %v1535_v62 = vpop.f32.mrb[21].mxu0  ;;  %v1860_v2 = vadd.f32 %v5993_v59, %v5991_v27 }
 0x4be   : > { %v5999_v38 = vpop.eup %4556  ;;  %v1675_v53 = vmul.f32 0.25, %v1535_v62  ;;  %v1537_v51 = vpop.f32.mrb[22].mxu0 }
 0x4bf   : > { %v1750_v60 = vmul.f32 1.442695, %v1674_v6  ;;  %v1676_v1 = vmul.f32 0.25, %v1537_v51  ;;  %1861 = vadd.xlane.f32.xlu1 %v1860_v2  ;;  %v1539_v36 = vpop.f32.mrb[23].mxu0  ;;  %v1863_v42 = vadd.f32 %v5999_v38, %v5995_v39 }
 0x4c0   : > { %v1752_v5 = vmul.f32 1.442695, %v1675_v53  ;;  %v1677_v45 = vmul.f32 0.25, %v1539_v36 }
 0x4c1   : > { %4566 = vpow2.f32 %v1750_v60  ;;  %v1754_v11 = vmul.f32 1.442695, %v1676_v1  ;;  %4226 = vmatmul.mubr.msk.bf16.gmra.mrb[128].mxu0 %vm1413_vm2, %v2315_v55 }
 0x4c2   : > { %4568 = vpow2.f32 %v1752_v5  ;;  %v1756_v10 = vmul.f32 1.442695, %v1677_v45  ;;  %2553 = vmatprep.mubr.bf16.mxu0 %v7058_v58 }
 0x4c3   : > { %v6005_v54 = vpop.eup %4558  ;;  %4570 = vpow2.f32 %v1754_v11  ;;  %1864 = vadd.xlane.f32.xlu1 %v1863_v42 }
 0x4c4   : > { %v6007_v28 = vpop.eup %4560  ;;  %4572 = vpow2.f32 %v1756_v10  ;;  %v1543_v57 = vpop.f32.mrb[24].mxu0 }
 0x4c5   : > { %v6009_v26 = vpop.eup %4562  ;;  %v1678_v44 = vmul.f32 0.25, %v1543_v57  ;;  %v1545_v15 = vpop.f32.mrb[25].mxu0  ;;  %v1866_v14 = vadd.f32 %v6007_v28, %v6005_v54 }
 0x4c6   : > { %v6013_v19 = vpop.eup %4564  ;;  %v1679_v9 = vmul.f32 0.25, %v1545_v15  ;;  %v1547_v63 = vpop.f32.mrb[26].mxu0 }
 0x4c7   : > { %v1758_v16 = vmul.f32 1.442695, %v1678_v44  ;;  %v1680_v0 = vmul.f32 0.25, %v1547_v63  ;;  %1867 = vadd.xlane.f32.xlu1 %v1866_v14  ;;  %v1549_v29 = vpop.f32.mrb[27].mxu0  ;;  %v1869_v4 = vadd.f32 %v6013_v19, %v6009_v26 }
 0x4c8   : > { %v1760_v18 = vmul.f32 1.442695, %v1679_v9  ;;  %v1681_v13 = vmul.f32 0.25, %v1549_v29 }
 0x4c9   : > { %4574 = vpow2.f32 %v1758_v16  ;;  %v1762_v22 = vmul.f32 1.442695, %v1680_v0  ;;  %4227 = vmatmul.mubr.msk.bf16.gmra.mrb[132].mxu0 %vm1413_vm2, %v2316_v21 }
 0x4ca   : > { %4576 = vpow2.f32 %v1760_v18  ;;  %v1764_v56 = vmul.f32 1.442695, %v1681_v13 }
 0x4cb   : > { %v6018_v25 = vpop.eup %4566  ;;  %4578 = vpow2.f32 %v1762_v22  ;;  %1870 = vadd.xlane.f32.xlu1 %v1869_v4  ;;  %v6051_v22 = vpop.f32.mrb[14].mxu1 }
 0x4cc   : > { %v6020_v30 = vpop.eup %4568  ;;  %4580 = vpow2.f32 %v1764_v56  ;;  %v1553_v61 = vpop.f32.mrb[28].mxu0  ;;  %7063 = vst [vmem:[#allocation19_spill] sm:$0xff] %v6051_v22 }
 0x4cd   : > { %v6025_v12 = vpop.eup %4570  ;;  %v1555_v33 = vpop.f32.mrb[29].mxu0  ;;  %v1872_v41 = vadd.f32 %v6020_v30, %v6018_v25  ;;  %v1682_v36 = vmul.f32 0.25, %v1553_v61 }
 0x4ce   : > { %v6029_v23 = vpop.eup %4572  ;;  %v1557_v31 = vpop.f32.mrb[30].mxu0  ;;  %v1683_v11 = vmul.f32 0.25, %v1555_v33 }
 0x4cf   : > { %v1684_v35 = vmul.f32 0.25, %v1557_v31  ;;  %1242 = vperm.xlu0 %4423, %v1216_v7   ;;  %1873 = vadd.xlane.f32.xlu1 %v1872_v41  ;;  %v1559_v32 = vpop.f32.mrb[31].mxu0  ;;  %v1875_v43 = vadd.f32 %v6029_v23, %v6025_v12  ;;  %v1766_v63 = vmul.f32 1.442695, %v1682_v36  ;;  %v6055_v7 = vpop.f32.mrb[15].mxu1 }
 0x4d0   : > { %v1685_v3 = vmul.f32 0.25, %v1559_v32  ;;  %v1768_v16 = vmul.f32 1.442695, %v1683_v11  ;;  %7064 = vst [vmem:[#allocation27_spill] sm:$0xff] %v6055_v7 }
 0x4d1   : > { %v1770_v37 = vmul.f32 1.442695, %v1684_v35 }
 0x4d2   : > { %v1772_v8 = vmul.f32 1.442695, %v1685_v3 }
 0x4d3   : > { %v6037_v6 = vpop.eup %4574  ;;  %4582 = vpow2.f32 %v1770_v37  ;;  %1876 = vadd.xlane.f32.xlu1 %v1875_v43 }
 0x4d4   : > { %v6039_v62 = vpop.eup %4576  ;;  %4584 = vpow2.f32 %v1772_v8  ;;  %v1563_v2 = vpop.f32.mrb[32].mxu0 }
 0x4d5   : > { %v6041_v53 = vpop.eup %4578  ;;  %v1686_v51 = vmul.f32 0.25, %v1563_v2  ;;  %v1565_v55 = vpop.f32.mrb[33].mxu0  ;;  %v1878_v60 = vadd.f32 %v6039_v62, %v6037_v6 }
 0x4d6   : > { %v6045_v1 = vpop.eup %4580  ;;  %v1687_v5 = vmul.f32 0.25, %v1565_v55  ;;  %v1567_v45 = vpop.f32.mrb[34].mxu0 }
 0x4d7   : > { %v1774_v42 = vmul.f32 1.442695, %v1686_v51  ;;  %v1688_v10 = vmul.f32 0.25, %v1567_v45  ;;  %1879 = vadd.xlane.f32.xlu1 %v1878_v60  ;;  %v1569_v57 = vpop.f32.mrb[35].mxu0  ;;  %v1881_v9 = vadd.f32 %v6045_v1, %v6041_v53 }
 0x4d8   : > { %v1776_v44 = vmul.f32 1.442695, %v1687_v5  ;;  %v1689_v15 = vmul.f32 0.25, %v1569_v57 }
 0x4d9   : > { %4586 = vpow2.f32 %v1774_v42  ;;  %v1778_v14 = vmul.f32 1.442695, %v1688_v10 }
 0x4da   : > { %4588 = vpow2.f32 %v1776_v44  ;;  %v1780_v21 = vmul.f32 1.442695, %v1689_v15 }
 0x4db   : > { %4590 = vpow2.f32 %v1778_v14  ;;  %1882 = vadd.xlane.f32.xlu1 %v1881_v9 }
 0x4dc   : > { %4592 = vpow2.f32 %v1780_v21  ;;  %v1573_v0 = vpop.f32.mrb[36].mxu0 }
 0x4dd   : > { %v6049_v29 = vpop.eup %4582  ;;  %v1690_v18 = vmul.f32 0.25, %v1573_v0  ;;  %v1575_v13 = vpop.f32.mrb[37].mxu0  ;;  %4594 = vpow2.f32 %v1766_v63 }
 0x4de   : > { %v6053_v4 = vpop.eup %4584  ;;  %v1691_v56 = vmul.f32 0.25, %v1575_v13  ;;  %v1577_v61 = vpop.f32.mrb[38].mxu0  ;;  %4596 = vpow2.f32 %v1768_v16 }
 0x4df   : > { %v1782_v33 = vmul.f32 1.442695, %v1690_v18  ;;  %v1692_v41 = vmul.f32 0.25, %v1577_v61  ;;  %v1579_v31 = vpop.f32.mrb[39].mxu0  ;;  %v1887_v35 = vadd.f32 %v6053_v4, %v6049_v29 }
 0x4e0   : > { %v1784_v32 = vmul.f32 1.442695, %v1691_v56  ;;  %v1693_v3 = vmul.f32 0.25, %v1579_v31 }
 0x4e1   : > { %4598 = vpow2.f32 %v1782_v33  ;;  %v1786_v37 = vmul.f32 1.442695, %v1692_v41  ;;  %1888 = vadd.xlane.f32.xlu1 %v1887_v35 }
 0x4e2   : > { %4600 = vpow2.f32 %v1784_v32  ;;  %v1788_v43 = vmul.f32 1.442695, %v1693_v3 }
 0x4e3   : > { %v6059_v8 = vpop.eup %4586  ;;  %4602 = vpow2.f32 %v1786_v37 }
 0x4e4   : > { %v6061_v2 = vpop.eup %4588  ;;  %4604 = vpow2.f32 %v1788_v43  ;;  %v1583_v51 = vpop.f32.mrb[40].mxu0 }
 0x4e5   : > { %v6063_v55 = vpop.eup %4590  ;;  %v1694_v60 = vmul.f32 0.25, %v1583_v51  ;;  %v1585_v36 = vpop.f32.mrb[41].mxu0  ;;  %v1890_v5 = vadd.f32 %v6061_v2, %v6059_v8 }
 0x4e6   : > { %v6067_v45 = vpop.eup %4592  ;;  %v1695_v11 = vmul.f32 0.25, %v1585_v36  ;;  %v1587_v42 = vpop.f32.mrb[42].mxu0 }
 0x4e7   : > { %v1790_v10 = vmul.f32 1.442695, %v1694_v60  ;;  %v1696_v57 = vmul.f32 0.25, %v1587_v42  ;;  %1891 = vadd.xlane.f32.xlu1 %v1890_v5  ;;  %v1589_v44 = vpop.f32.mrb[43].mxu0  ;;  %v6069_v15 = vpop.eup %4594  ;;  %v1893_v16 = vadd.f32 %v6067_v45, %v6063_v55 }
 0x4e8   : > { %v1792_v14 = vmul.f32 1.442695, %v1695_v11  ;;  %v1697_v9 = vmul.f32 0.25, %v1589_v44  ;;  %v6071_v63 = vpop.eup %4596 }
 0x4e9   : > { %4606 = vpow2.f32 %v1790_v10  ;;  %v1794_v21 = vmul.f32 1.442695, %v1696_v57  ;;  %v1884_v61 = vadd.f32 %v6071_v63, %v6069_v15 }
 0x4ea   : > { %4608 = vpow2.f32 %v1792_v14  ;;  %v1796_v0 = vmul.f32 1.442695, %v1697_v9 }
 0x4eb   : > { %v6075_v18 = vpop.eup %4598  ;;  %4610 = vpow2.f32 %v1794_v21  ;;  %1894 = vadd.xlane.f32.xlu1 %v1893_v16 }
 0x4ec   : > { %v6077_v13 = vpop.eup %4600  ;;  %4612 = vpow2.f32 %v1796_v0  ;;  %v1593_v56 = vpop.f32.mrb[44].mxu0 }
 0x4ed   : > { %v6081_v33 = vpop.eup %4602  ;;  %v1698_v41 = vmul.f32 0.25, %v1593_v56  ;;  %v1595_v31 = vpop.f32.mrb[45].mxu0  ;;  %v1896_v35 = vadd.f32 %v6077_v13, %v6075_v18 }
 0x4ee   : > { %v6085_v32 = vpop.eup %4604  ;;  %v1699_v3 = vmul.f32 0.25, %v1595_v31  ;;  %1885 = vadd.xlane.f32.xlu0 %v1884_v61  ;;  %v1597_v37 = vpop.f32.mrb[46].mxu0 }
 0x4ef   : > { %v1798_v43 = vmul.f32 1.442695, %v1698_v41  ;;  %v1700_v51 = vmul.f32 0.25, %v1597_v37  ;;  %1897 = vadd.xlane.f32.xlu1 %v1896_v35  ;;  %v1599_v60 = vpop.f32.mrb[47].mxu0  ;;  %v1899_v42 = vadd.f32 %v6085_v32, %v6081_v33 }
 0x4f0   : > { %v1800_v36 = vmul.f32 1.442695, %v1699_v3  ;;  %v1701_v5 = vmul.f32 0.25, %v1599_v60 }
 0x4f1   : > { %4614 = vpow2.f32 %v1798_v43  ;;  %v1802_v11 = vmul.f32 1.442695, %v1700_v51 }
 0x4f2   : > { %4616 = vpow2.f32 %v1800_v36  ;;  %v1804_v10 = vmul.f32 1.442695, %v1701_v5 }
 0x4f3   : > { %v6089_v57 = vpop.eup %4606  ;;  %4618 = vpow2.f32 %v1802_v11  ;;  %1900 = vadd.xlane.f32.xlu1 %v1899_v42 }
 0x4f4   : > { %v6091_v44 = vpop.eup %4608  ;;  %4620 = vpow2.f32 %v1804_v10  ;;  %v1603_v14 = vpop.f32.mrb[48].mxu0 }
 0x4f5   : > { %v6093_v9 = vpop.eup %4610  ;;  %v1702_v21 = vmul.f32 0.25, %v1603_v14  ;;  %v1605_v16 = vpop.f32.mrb[49].mxu0  ;;  %v1902_v0 = vadd.f32 %v6091_v44, %v6089_v57 }
 0x4f6   : > { %v6097_v56 = vpop.eup %4612  ;;  %v1703_v61 = vmul.f32 0.25, %v1605_v16  ;;  %v1607_v41 = vpop.f32.mrb[50].mxu0 }
 0x4f7   : > { %v1806_v31 = vmul.f32 1.442695, %v1702_v21  ;;  %v1704_v35 = vmul.f32 0.25, %v1607_v41  ;;  %1903 = vadd.xlane.f32.xlu1 %v1902_v0  ;;  %v1609_v3 = vpop.f32.mrb[51].mxu0  ;;  %v1905_v60 = vadd.f32 %v6097_v56, %v6093_v9 }
 0x4f8   : > { %v1808_v37 = vmul.f32 1.442695, %v1703_v61  ;;  %v1705_v43 = vmul.f32 0.25, %v1609_v3 }
 0x4f9   : > { %4622 = vpow2.f32 %v1806_v31  ;;  %v1810_v51 = vmul.f32 1.442695, %v1704_v35 }
 0x4fa   : > { %4624 = vpow2.f32 %v1808_v37  ;;  %v1812_v36 = vmul.f32 1.442695, %v1705_v43 }
 0x4fb   : > { %v6101_v5 = vpop.eup %4614  ;;  %4626 = vpow2.f32 %v1810_v51  ;;  %1906 = vadd.xlane.f32.xlu1 %v1905_v60 }
 0x4fc   : > { %7065 = vst [vmem:[#allocation26_spill] sm:$0xff] %v6101_v5  ;;  %v6103_v11 = vpop.eup %4616  ;;  %4628 = vpow2.f32 %v1812_v36  ;;  %v1613_v42 = vpop.f32.mrb[52].mxu0 }
 0x4fd   : > { %v6105_v10 = vpop.eup %4618  ;;  %v1706_v14 = vmul.f32 0.25, %v1613_v42  ;;  %v1615_v21 = vpop.f32.mrb[53].mxu0  ;;  %v1908_v16 = vadd.f32 %v6103_v11, %v6101_v5 }
 0x4fe   : > { %v6109_v0 = vpop.eup %4620  ;;  %v1707_v61 = vmul.f32 0.25, %v1615_v21  ;;  %v1617_v41 = vpop.f32.mrb[54].mxu0 }
 0x4ff   : > { %v1814_v31 = vmul.f32 1.442695, %v1706_v14  ;;  %v1708_v35 = vmul.f32 0.25, %v1617_v41  ;;  %1909 = vadd.xlane.f32.xlu0 %v1908_v16  ;;  %v1619_v3 = vpop.f32.mrb[55].mxu0  ;;  %v1911_v37 = vadd.f32 %v6109_v0, %v6105_v10 }
 0x500   : > { %v1816_v43 = vmul.f32 1.442695, %v1707_v61  ;;  %v1709_v51 = vmul.f32 0.25, %v1619_v3 }
 0x501   : > { %4630 = vpow2.f32 %v1814_v31  ;;  %v1818_v60 = vmul.f32 1.442695, %v1708_v35  ;;  %1912 = vadd.xlane.f32.xlu1 %v1911_v37 }
 0x502   : > { %4632 = vpow2.f32 %v1816_v43  ;;  %v1820_v36 = vmul.f32 1.442695, %v1709_v51 }
 0x503   : > { %v6113_v42 = vpop.eup %4622  ;;  %4634 = vpow2.f32 %v1818_v60 }
 0x504   : > { %7066 = vst [vmem:[#allocation28_spill] sm:$0xff] %v6113_v42  ;;  %v6115_v58 = vpop.eup %4624  ;;  %4636 = vpow2.f32 %v1820_v36  ;;  %v1623_v14 = vpop.f32.mrb[56].mxu0 }
 0x505   : > { %7067 = vst [vmem:[#allocation22_spill] sm:$0xff] %v6115_v58  ;;  %v6117_v21 = vpop.eup %4626  ;;  %v1710_v16 = vmul.f32 0.25, %v1623_v14  ;;  %v1625_v41 = vpop.f32.mrb[57].mxu0  ;;  %v1914_v61 = vadd.f32 %v6115_v58, %v6113_v42 }
 0x506   : > { %7068 = vst [vmem:[#allocation8_spill] sm:$0xff] %v6117_v21  ;;  %v6121_v3 = vpop.eup %4628  ;;  %v1711_v31 = vmul.f32 0.25, %v1625_v41  ;;  %v1627_v35 = vpop.f32.mrb[58].mxu0 }
 0x507   : > { %v1822_v37 = vmul.f32 1.442695, %v1710_v16  ;;  %v1712_v43 = vmul.f32 0.25, %v1627_v35  ;;  %1915 = vadd.xlane.f32.xlu0 %v1914_v61  ;;  %v1629_v51 = vpop.f32.mrb[59].mxu0  ;;  %v1917_v60 = vadd.f32 %v6121_v3, %v6117_v21 }
 0x508   : > { %v1824_v36 = vmul.f32 1.442695, %v1711_v31  ;;  %v1713_v47 = vmul.f32 0.25, %v1629_v51 }
 0x509   : > { %4638 = vpow2.f32 %v1822_v37  ;;  %v1826_v24 = vmul.f32 1.442695, %v1712_v43  ;;  %1918 = vadd.xlane.f32.xlu1 %v1917_v60 }
 0x50a   : > { %4640 = vpow2.f32 %v1824_v36  ;;  %v1828_v14 = vmul.f32 1.442695, %v1713_v47 }
 0x50b   : > { %v6125_v40 = vpop.eup %4630  ;;  %4642 = vpow2.f32 %v1826_v24 }
 0x50c   : > { %7069 = vst [vmem:[#allocation15_spill] sm:$0xff] %v6125_v40  ;;  %v6127_v17 = vpop.eup %4632  ;;  %4644 = vpow2.f32 %v1828_v14  ;;  %v1633_v16 = vpop.f32.mrb[60].mxu0 }
 0x50d   : > { %7070 = vst [vmem:[#allocation14_spill] sm:$0xff] %v6127_v17  ;;  %v6129_v41 = vpop.eup %4634  ;;  %v1714_v61 = vmul.f32 0.25, %v1633_v16  ;;  %v1635_v35 = vpop.f32.mrb[61].mxu0  ;;  %v1920_v31 = vadd.f32 %v6127_v17, %v6125_v40 }
 0x50e   : > { %7071 = vst [vmem:[#allocation29_spill] sm:$0xff] %v6129_v41  ;;  %v6133_v51 = vpop.eup %4636  ;;  %v1715_v37 = vmul.f32 0.25, %v1635_v35  ;;  %v1637_v43 = vpop.f32.mrb[62].mxu0 }
 0x50f   : > { %7072 = vst [vmem:[#allocation9_spill] sm:$0xff] %v6133_v51  ;;  %v1830_v60 = vmul.f32 1.442695, %v1714_v61  ;;  %v1716_v47 = vmul.f32 0.25, %v1637_v43  ;;  %1921 = vadd.xlane.f32.xlu0 %v1920_v31  ;;  %v1639_v36 = vpop.f32.mrb[63].mxu0  ;;  %v1923_v24 = vadd.f32 %v6133_v51, %v6129_v41 }
 0x510   : > { %v1832_v14 = vmul.f32 1.442695, %v1715_v37  ;;  %v1717_v48 = vmul.f32 0.25, %v1639_v36 }
 0x511   : > { %4646 = vpow2.f32 %v1830_v60  ;;  %v1834_v7 = vmul.f32 1.442695, %v1716_v47  ;;  %1924 = vadd.xlane.f32.xlu1 %v1923_v24 }
 0x512   : > { %4648 = vpow2.f32 %v1832_v14  ;;  %v1836_v16 = vmul.f32 1.442695, %v1717_v48 }
 0x513   : > { %v6137_v22 = vpop.eup %4638  ;;  %4650 = vpow2.f32 %v1834_v7 }
 0x514   : > { %7073 = vst [vmem:[#allocation30_spill] sm:$0xff] %v6137_v22  ;;  %v6139_v40 = vpop.eup %4640  ;;  %4652 = vpow2.f32 %v1836_v16  ;;  %v1643_v61 = vpop.f32.mrb[64].mxu0 }
 0x515   : > { %7074 = vst [vmem:[#allocation12_spill] sm:$0xff] %v6139_v40  ;;  %v6141_v35 = vpop.eup %4642  ;;  %v1718_v31 = vmul.f32 0.25, %v1643_v61  ;;  %v1645_v43 = vpop.f32.mrb[65].mxu0  ;;  %v1926_v37 = vadd.f32 %v6139_v40, %v6137_v22 }
 0x516   : > { %7075 = vst [vmem:[#allocation31_spill] sm:$0xff] %v6141_v35  ;;  %v6145_v36 = vpop.eup %4644  ;;  %v1719_v60 = vmul.f32 0.25, %v1645_v43  ;;  %v1647_v47 = vpop.f32.mrb[66].mxu0 }
 0x517   : > { %7076 = vst [vmem:[#allocation16_spill] sm:$0xff] %v6145_v36  ;;  %v1838_v24 = vmul.f32 1.442695, %v1718_v31  ;;  %v1720_v48 = vmul.f32 0.25, %v1647_v47  ;;  %1927 = vadd.xlane.f32.xlu0 %v1926_v37  ;;  %v1649_v14 = vpop.f32.mrb[67].mxu0  ;;  %v1929_v7 = vadd.f32 %v6145_v36, %v6141_v35 }
 0x518   : > { %v1840_v16 = vmul.f32 1.442695, %v1719_v60  ;;  %v1721_v41 = vmul.f32 0.25, %v1649_v14 }
 0x519   : > { %4654 = vpow2.f32 %v1838_v24  ;;  %v1842_v17 = vmul.f32 1.442695, %v1720_v48  ;;  %1930 = vadd.xlane.f32.xlu1 %v1929_v7 }
 0x51a   : > { %4656 = vpow2.f32 %v1840_v16  ;;  %v1844_v61 = vmul.f32 1.442695, %v1721_v41 }
 0x51b   : > { %v6149_v42 = vpop.eup %4646  ;;  %4658 = vpow2.f32 %v1842_v17 }
 0x51c   : > { %7077 = vst [vmem:[#allocation13_spill] sm:$0xff] %v6149_v42  ;;  %v6151_v22 = vpop.eup %4648  ;;  %4660 = vpow2.f32 %v1844_v61  ;;  %v1653_v31 = vpop.f32.mrb[68].mxu0 }
 0x51d   : > { %7078 = vst [vmem:[#allocation20_spill] sm:$0xff] %v6151_v22  ;;  %v6153_v43 = vpop.eup %4650  ;;  %v1722_v37 = vmul.f32 0.25, %v1653_v31  ;;  %v1655_v47 = vpop.f32.mrb[69].mxu0  ;;  %v1932_v60 = vadd.f32 %v6151_v22, %v6149_v42 }
 0x51e   : > { %7079 = vst [vmem:[#allocation23_spill] sm:$0xff] %v6153_v43  ;;  %v6157_v14 = vpop.eup %4652  ;;  %v1723_v24 = vmul.f32 0.25, %v1655_v47  ;;  %v1657_v48 = vpop.f32.mrb[70].mxu0 }
 0x51f   : > { %7080 = vst [vmem:[#allocation24_spill] sm:$0xff] %v6157_v14  ;;  %v1846_v7 = vmul.f32 1.442695, %v1722_v37  ;;  %v1724_v41 = vmul.f32 0.25, %v1657_v48  ;;  %1933 = vadd.xlane.f32.xlu0 %v1932_v60  ;;  %v1659_v16 = vpop.f32.mrb[71].mxu0  ;;  %v1935_v17 = vadd.f32 %v6157_v14, %v6153_v43 }
 0x520   : > { %v1848_v61 = vmul.f32 1.442695, %v1723_v24  ;;  %v1725_v35 = vmul.f32 0.25, %v1659_v16 }
 0x521   : > { %4662 = vpow2.f32 %v1846_v7  ;;  %v1850_v40 = vmul.f32 1.442695, %v1724_v41  ;;  %1936 = vadd.xlane.f32.xlu1 %v1935_v17 }
 0x522   : > { %4664 = vpow2.f32 %v1848_v61  ;;  %v1852_v31 = vmul.f32 1.442695, %v1725_v35 }
 0x523   : > { %v6161_v36 = vpop.eup %4654  ;;  %4666 = vpow2.f32 %v1850_v40 }
 0x524   : > { %7081 = vst [vmem:[#allocation17_spill] sm:$0xff] %v6161_v36  ;;  %v6163_v42 = vpop.eup %4656  ;;  %4668 = vpow2.f32 %v1852_v31  ;;  %v2405_v37 = vpop.f32.mrb[72].mxu0 }
 0x525   : > { %7082 = vst [vmem:[#allocation18_spill] sm:$0xff] %v6163_v42  ;;  %v6165_v47 = vpop.eup %4658  ;;  %v2564_v60 = vmul.f32 0.25, %v2405_v37  ;;  %v2407_v48 = vpop.f32.mrb[73].mxu0  ;;  %v1938_v24 = vadd.f32 %v6163_v42, %v6161_v36 }
 0x526   : > { %7083 = vst [vmem:[#allocation2_spill] sm:$0xff] %v6165_v47  ;;  %v6169_v16 = vpop.eup %4660  ;;  %v2565_v7 = vmul.f32 0.25, %v2407_v48  ;;  %v2409_v41 = vpop.f32.mrb[74].mxu0 }
 0x527   : > { %7084 = vst [vmem:[#allocation6_spill] sm:$0xff] %v6169_v16  ;;  %v2628_v17 = vmul.f32 1.442695, %v2564_v60  ;;  %v2566_v35 = vmul.f32 0.25, %v2409_v41  ;;  %1939 = vadd.xlane.f32.xlu0 %v1938_v24  ;;  %v2411_v61 = vpop.f32.mrb[75].mxu0  ;;  %v1941_v40 = vadd.f32 %v6169_v16, %v6165_v47 }
 0x528   : > { %v2630_v31 = vmul.f32 1.442695, %v2565_v7  ;;  %v2567_v43 = vmul.f32 0.25, %v2411_v61 }
 0x529   : > { %4670 = vpow2.f32 %v2628_v17  ;;  %v2632_v22 = vmul.f32 1.442695, %v2566_v35  ;;  %1942 = vadd.xlane.f32.xlu1 %v1941_v40 }
 0x52a   : > { %4672 = vpow2.f32 %v2630_v31  ;;  %v2634_v37 = vmul.f32 1.442695, %v2567_v43 }
 0x52b   : > { %v6173_v14 = vpop.eup %4662  ;;  %4674 = vpow2.f32 %v2632_v22 }
 0x52c   : > { %7085 = vst [vmem:[#allocation3_spill] sm:$0xff] %v6173_v14  ;;  %v6175_v36 = vpop.eup %4664  ;;  %4676 = vpow2.f32 %v2634_v37  ;;  %v2415_v60 = vpop.f32.mrb[76].mxu0 }
 0x52d   : > { %7086 = vst [vmem:[#allocation4_spill] sm:$0xff] %v6175_v36  ;;  %v6177_v48 = vpop.eup %4666  ;;  %v2568_v24 = vmul.f32 0.25, %v2415_v60  ;;  %v2417_v41 = vpop.f32.mrb[77].mxu0  ;;  %v1944_v7 = vadd.f32 %v6175_v36, %v6173_v14 }
 0x52e   : > { %7087 = vst [vmem:[#allocation7_spill] sm:$0xff] %v6177_v48  ;;  %v6181_v61 = vpop.eup %4668  ;;  %v2569_v17 = vmul.f32 0.25, %v2417_v41  ;;  %v2419_v35 = vpop.f32.mrb[78].mxu0 }
 0x52f   : > { %7088 = vst [vmem:[#allocation5_spill] sm:$0xff] %v6181_v61  ;;  %v2636_v40 = vmul.f32 1.442695, %v2568_v24  ;;  %v2570_v43 = vmul.f32 0.25, %v2419_v35  ;;  %1945 = vadd.xlane.f32.xlu0 %v1944_v7  ;;  %v2421_v31 = vpop.f32.mrb[79].mxu0  ;;  %v1947_v22 = vadd.f32 %v6181_v61, %v6177_v48 }
 0x530   : > { %v2638_v37 = vmul.f32 1.442695, %v2569_v17  ;;  %v2571_v47 = vmul.f32 0.25, %v2421_v31 }
 0x531   : > { %4678 = vpow2.f32 %v2636_v40  ;;  %v2640_v42 = vmul.f32 1.442695, %v2570_v43  ;;  %1948 = vadd.xlane.f32.xlu1 %v1947_v22 }
 0x532   : > { %4680 = vpow2.f32 %v2638_v37  ;;  %v2642_v60 = vmul.f32 1.442695, %v2571_v47 }
 0x533   : > { %v6185_v16 = vpop.eup %4670  ;;  %4682 = vpow2.f32 %v2640_v42 }
 0x534   : > { %7089 = vst [vmem:[#allocation32_spill] sm:$0xff] %v6185_v16  ;;  %v6187_v14 = vpop.eup %4672  ;;  %4684 = vpow2.f32 %v2642_v60  ;;  %v2425_v24 = vpop.f32.mrb[80].mxu0 }
 0x535   : > { %7090 = vst [vmem:[#allocation33_spill] sm:$0xff] %v6187_v14  ;;  %v6189_v41 = vpop.eup %4674  ;;  %v2572_v7 = vmul.f32 0.25, %v2425_v24  ;;  %v2427_v35 = vpop.f32.mrb[81].mxu0  ;;  %v2756_v17 = vadd.f32 %v6187_v14, %v6185_v16 }
 0x536   : > { %7091 = vst [vmem:[#allocation34_spill] sm:$0xff] %v6189_v41  ;;  %v6193_v31 = vpop.eup %4676  ;;  %v2573_v40 = vmul.f32 0.25, %v2427_v35  ;;  %v2429_v43 = vpop.f32.mrb[82].mxu0 }
 0x537   : > { %7092 = vst [vmem:[#allocation35_spill] sm:$0xff] %v6193_v31  ;;  %v2644_v22 = vmul.f32 1.442695, %v2572_v7  ;;  %2757 = vadd.xlane.f32.xlu0 %v2756_v17  ;;  %v2574_v47 = vmul.f32 0.25, %v2429_v43  ;;  %v2431_v37 = vpop.f32.mrb[83].mxu0  ;;  %v2759_v42 = vadd.f32 %v6193_v31, %v6189_v41 }
 0x538   : > { %v2646_v60 = vmul.f32 1.442695, %v2573_v40  ;;  %v2575_v48 = vmul.f32 0.25, %v2431_v37 }
 0x539   : > { %4686 = vpow2.f32 %v2644_v22  ;;  %v2648_v36 = vmul.f32 1.442695, %v2574_v47  ;;  %2760 = vadd.xlane.f32.xlu1 %v2759_v42 }
 0x53a   : > { %4688 = vpow2.f32 %v2646_v60  ;;  %v2650_v24 = vmul.f32 1.442695, %v2575_v48 }
 0x53b   : > { %v6197_v61 = vpop.eup %4678  ;;  %4690 = vpow2.f32 %v2648_v36 }
 0x53c   : > { %7093 = vst [vmem:[#allocation36_spill] sm:$0xff] %v6197_v61  ;;  %v6199_v16 = vpop.eup %4680  ;;  %4692 = vpow2.f32 %v2650_v24  ;;  %v2435_v7 = vpop.f32.mrb[84].mxu0 }
 0x53d   : > { %7094 = vst [vmem:[#allocation37_spill] sm:$0xff] %v6199_v16  ;;  %v6201_v35 = vpop.eup %4682  ;;  %v2576_v17 = vmul.f32 0.25, %v2435_v7  ;;  %v2437_v43 = vpop.f32.mrb[85].mxu0  ;;  %v2762_v40 = vadd.f32 %v6199_v16, %v6197_v61 }
 0x53e   : > { %7095 = vst [vmem:[#allocation38_spill] sm:$0xff] %v6201_v35  ;;  %v6205_v37 = vpop.eup %4684  ;;  %v2577_v22 = vmul.f32 0.25, %v2437_v43  ;;  %v2439_v47 = vpop.f32.mrb[86].mxu0 }
 0x53f   : > { %7096 = vst [vmem:[#allocation39_spill] sm:$0xff] %v6205_v37  ;;  %v2652_v42 = vmul.f32 1.442695, %v2576_v17  ;;  %2763 = vadd.xlane.f32.xlu0 %v2762_v40  ;;  %v2578_v48 = vmul.f32 0.25, %v2439_v47  ;;  %v2441_v60 = vpop.f32.mrb[87].mxu0  ;;  %v2765_v36 = vadd.f32 %v6205_v37, %v6201_v35 }
 0x540   : > { %v2654_v24 = vmul.f32 1.442695, %v2577_v22  ;;  %v2579_v41 = vmul.f32 0.25, %v2441_v60 }
 0x541   : > { %4694 = vpow2.f32 %v2652_v42  ;;  %v2656_v14 = vmul.f32 1.442695, %v2578_v48  ;;  %2766 = vadd.xlane.f32.xlu1 %v2765_v36 }
 0x542   : > { %4696 = vpow2.f32 %v2654_v24  ;;  %v2658_v7 = vmul.f32 1.442695, %v2579_v41 }
 0x543   : > { %v6209_v31 = vpop.eup %4686  ;;  %4698 = vpow2.f32 %v2656_v14 }
 0x544   : > { %7097 = vst [vmem:[#allocation40_spill] sm:$0xff] %v6209_v31  ;;  %v6211_v61 = vpop.eup %4688  ;;  %4700 = vpow2.f32 %v2658_v7  ;;  %v1856_v17 = vpop.xlane.xlu1 %1855 }
 0x545   : > { %7098 = vst [vmem:[#allocation41_spill] sm:$0xff] %v6211_v61  ;;  %v2445_v43 = vpop.f32.mrb[88].mxu0  ;;  %v6213_v40 = vpop.eup %4690  ;;  %v2768_v22 = vadd.f32 %v6211_v61, %v6209_v31  ;;  %4702 = vrcp.f32 %v1856_v17 }
 0x546   : > { %7099 = vst [vmem:[#allocation42_spill] sm:$0xff] %v6213_v40  ;;  %v2580_v47 = vmul.f32 0.25, %v2445_v43  ;;  %v2447_v16 = vpop.f32.mrb[89].mxu0  ;;  %v6217_v42 = vpop.eup %4692 }
 0x547   : > { %7100 = vst [vmem:[#allocation43_spill] sm:$0xff] %v6217_v42  ;;  %v2581_v48 = vmul.f32 0.25, %v2447_v16  ;;  %v1859_v41 = vpop.xlane.xlu0 %1858  ;;  %v2449_v60 = vpop.f32.mrb[90].mxu0  ;;  %2769 = vadd.xlane.f32.xlu1 %v2768_v22  ;;  %v2771_v7 = vadd.f32 %v6217_v42, %v6213_v40 }
 0x548   : > { %v2660_v36 = vmul.f32 1.442695, %v2580_v47  ;;  %4704 = vrcp.f32 %v1859_v41  ;;  %v2582_v14 = vmul.f32 0.25, %v2449_v60  ;;  %v2451_v24 = vpop.f32.mrb[91].mxu0 }
 0x549   : > { %v2662_v35 = vmul.f32 1.442695, %v2581_v48  ;;  %v2583_v43 = vmul.f32 0.25, %v2451_v24 }
 0x54a   : > { %4706 = vpow2.f32 %v2660_v36  ;;  %v2664_v37 = vmul.f32 1.442695, %v2582_v14 }
 0x54b   : > { %4708 = vpow2.f32 %v2662_v35  ;;  %v2666_v31 = vmul.f32 1.442695, %v2583_v43  ;;  %v6221_v61 = vpop.eup %4694  ;;  %2772 = vadd.xlane.f32.xlu1 %v2771_v7 }
 0x54c   : > { %7101 = vst [vmem:[#allocation44_spill] sm:$0xff] %v6221_v61  ;;  %4710 = vpow2.f32 %v2664_v37  ;;  %v6223_v16 = vpop.eup %4696  ;;  %v1862_v17 = vpop.xlane.xlu1 %1861 }
 0x54d   : > { %7102 = vst [vmem:[#allocation45_spill] sm:$0xff] %v6223_v16  ;;  %4712 = vpow2.f32 %v2666_v31  ;;  %v2455_v47 = vpop.f32.mrb[92].mxu0  ;;  %v6225_v22 = vpop.eup %4698  ;;  %v2774_v48 = vadd.f32 %v6223_v16, %v6221_v61 }
 0x54e   : > { %v2457_v41 = vpop.f32.mrb[93].mxu0  ;;  %v6229_v60 = vpop.eup %4700  ;;  %v2584_v14 = vmul.f32 0.25, %v2455_v47  ;;  %4714 = vrcp.f32 %v1862_v17 }
 0x54f   : > { %v1243_v36 = vpop.permute.xlu0 %1242  ;;  %v2459_v35 = vpop.f32.mrb[94].mxu0  ;;  %2775 = vadd.xlane.f32.xlu1 %v2774_v48  ;;  %v2777_v51 = vadd.f32 %v6229_v60, %v6225_v22 }
 0x550   : > { %v1329_v24 = vadd.f32 %v6031_v46, %v1243_v36  ;;  %v1331_v37 = vadd.f32 %v6033_v34, %v1243_v36  ;;  %v2586_v7 = vmul.f32 0.25, %v2459_v35  ;;  %v2461_v43 = vpop.f32.mrb[95].mxu0  ;;  %v4703_v31 = vpop.eup %4702  ;;  %v1217_v46 = vld [vmem:[%s6909_s2 + $0x78] sm:$0xff]  ;;  %v2668_v47 = vmul.f32 1.442695, %v2584_v14 }
 0x551   : > { %v2587_v40 = vmul.f32 0.25, %v2461_v43  ;;  %v1865_v42 = vpop.xlane.xlu1 %1864  ;;  %v1983_v48 = vmul.f32 %v4703_v31, %v5979_v50  ;;  %v2585_v14 = vmul.f32 0.25, %v2457_v41 }
 0x552   : > { %v4705_v21 = vpop.eup %4704  ;;  %v2078_v61 = vpack.c.bf16 %v1329_v24, %v1329_v24  ;;  %v2079_v16 = vpack.c.bf16 %v1331_v37, %v1331_v37  ;;  %v2672_v58 = vmul.f32 1.442695, %v2586_v7 }
 0x553   : > { %v2674_v5 = vmul.f32 1.442695, %v2587_v40  ;;  %2778 = vadd.xlane.f32.xlu1 %v2777_v51  ;;  %v1985_v36 = vmul.f32 %v4705_v21, %v5985_v49  ;;  %v1984_v17 = vmul.f32 %v4705_v21, %v5981_v20  ;;  %v1982_v49 = vmul.f32 %v4703_v31, %v5977_v52 }
 0x554   : > { %v6238_v34 = vpop.eup %4706  ;;  %4716 = vpow2.f32 %v2672_v58  ;;  %2080 = vmatprep.subr.bf16.mxu1 %v2079_v16  ;;  %v2465_v24 = vpop.f32.mrb[96].mxu0  ;;  %v2670_v52 = vmul.f32 1.442695, %v2585_v14 }
 0x555   : > { %7103 = vst [vmem:[#allocation46_spill] sm:$0xff] %v6238_v34  ;;  %v6242_v35 = vpop.eup %4708  ;;  %4718 = vpow2.f32 %v2674_v5  ;;  %2081 = vmatpush1.bf16.xpose.msra.mxu1 %v2078_v61  ;;  %v1868_v40 = vpop.xlane.xlu1 %1867  ;;  %v2588_v7 = vmul.f32 0.25, %v2465_v24  ;;  %1247 = vperm.xlu0 %4423, %v1217_v46   ;;  %v2047_v16 = vpack.c.bf16 %v1985_v36, %v1983_v48 }
 0x556   : > { %v6245_v37 = vpop.eup %4710  ;;  %4720 = vrcp.f32 %v1865_v42  ;;  %v2467_v58 = vpop.f32.mrb[97].mxu0  ;;  %v2780_v50 = vadd.f32 %v6242_v35, %v6238_v34  ;;  %v2046_v34 = vpack.c.bf16 %v1984_v17, %v1982_v49 }
 0x557   : > { %v6249_v51 = vpop.eup %4712  ;;  %v2589_v20 = vmul.f32 0.25, %v2467_v58  ;;  %v2469_v5 = vpop.f32.mrb[98].mxu0  ;;  %4722 = vpow2.f32 %v2668_v47  ;;  %v2676_v21 = vmul.f32 1.442695, %v2588_v7  ;;  %2112 = vmatprep.mubr.bf16.mxu1 %v2047_v16 }
 0x558   : > { %2781 = vadd.xlane.f32.xlu1 %v2780_v50  ;;  %v2590_v61 = vmul.f32 0.25, %v2469_v5  ;;  %v2471_v42 = vpop.f32.mrb[99].mxu0  ;;  %v2783_v43 = vadd.f32 %v6249_v51, %v6245_v37  ;;  %4724 = vrcp.f32 %v1868_v40  ;;  %v4715_v31 = vpop.eup %4714 }
 0x559   : > { %v2678_v46 = vmul.f32 1.442695, %v2589_v20  ;;  %v1871_v48 = vpop.xlane.xlu1 %1870  ;;  %v2591_v36 = vmul.f32 0.25, %v2471_v42  ;;  %4726 = vpow2.f32 %v2676_v21  ;;  %v1987_v17 = vmul.f32 %v4715_v31, %v5993_v59 }
 0x55a   : > { %v2680_v24 = vmul.f32 1.442695, %v2590_v61 }
 0x55b   : > { %4728 = vpow2.f32 %v2678_v46  ;;  %v2682_v41 = vmul.f32 1.442695, %v2591_v36 }
 0x55c   : > { %4730 = vrcp.f32 %v1871_v48  ;;  %2113 = vmatmul.mubr.bf16.vlgmr.msra.gmra.mrb[16].mxu1 %v2046_v34  ;;  %2784 = vadd.xlane.f32.xlu1 %v2783_v43  ;;  %v2475_v7 = vpop.f32.mrb[100].mxu0 }
 0x55d   : > { %4732 = vpow2.f32 %v2680_v24  ;;  %v1874_v47 = vpop.xlane.xlu1 %1873  ;;  %v2592_v40 = vmul.f32 0.25, %v2475_v7  ;;  %v2477_v16 = vpop.f32.mrb[101].mxu0 }
 0x55e   : > { %v6254_v58 = vpop.eup %4716  ;;  %4734 = vpow2.f32 %v2682_v41  ;;  %v2593_v20 = vmul.f32 0.25, %v2477_v16  ;;  %v2479_v49 = vpop.f32.mrb[102].mxu0 }
 0x55f   : > { %v6256_v50 = vpop.eup %4718  ;;  %4736 = vpow2.f32 %v2670_v52  ;;  %v2684_v5 = vmul.f32 1.442695, %v2592_v40  ;;  %v2594_v34 = vmul.f32 0.25, %v2479_v49  ;;  %v2481_v21 = vpop.f32.mrb[103].mxu0  ;;  %v1986_v52 = vmul.f32 %v4715_v31, %v5991_v27 }
 0x560   : > { %v4721_v14 = vpop.eup %4720  ;;  %4738 = vrcp.f32 %v1874_v47  ;;  %v2789_v61 = vadd.f32 %v6256_v50, %v6254_v58  ;;  %v2686_v42 = vmul.f32 1.442695, %v2593_v20  ;;  %v2595_v48 = vmul.f32 0.25, %v2481_v21 }
 0x561   : > { %v1989_v43 = vmul.f32 %v4721_v14, %v5999_v38  ;;  %v1877_v46 = vpop.xlane.xlu1 %1876  ;;  %v1988_v36 = vmul.f32 %v4721_v14, %v5995_v39  ;;  %v6263_v24 = vpop.eup %4722  ;;  %4740 = vpow2.f32 %v2684_v5  ;;  %v2688_v59 = vmul.f32 1.442695, %v2594_v34 }
 0x562   : > { %2790 = vadd.xlane.f32.xlu1 %v2789_v61  ;;  %v4725_v41 = vpop.eup %4724  ;;  %4742 = vpow2.f32 %v2686_v42  ;;  %v2690_v7 = vmul.f32 1.442695, %v2595_v48 }
 0x563   : > { %v2049_v47 = vpack.c.bf16 %v1989_v43, %v1987_v17  ;;  %v6266_v40 = vpop.eup %4726  ;;  %4744 = vrcp.f32 %v1877_v46  ;;  %v2048_v16 = vpack.c.bf16 %v1988_v36, %v1986_v52  ;;  %v1991_v34 = vmul.f32 %v4725_v41, %v6007_v28 }
 0x564   : > { %4746 = vpow2.f32 %v2688_v59  ;;  %v2485_v20 = vpop.f32.mrb[104].mxu0 }
 0x565   : > { %v6268_v38 = vpop.eup %4728  ;;  %2120 = vmatprep.mubr.bf16.mxu1 %v2049_v47  ;;  %v1880_v39 = vpop.xlane.xlu1 %1879  ;;  %4748 = vpow2.f32 %v2690_v7  ;;  %v2596_v14 = vmul.f32 0.25, %v2485_v20 }
 0x566   : > { %v4731_v49 = vpop.eup %4730  ;;  %2121 = vmatmul.mubr.bf16.gmra.mrb[20].mxu1 %v2048_v16  ;;  %v2487_v5 = vpop.f32.mrb[105].mxu0  ;;  %v2792_v27 = vadd.f32 %v6268_v38, %v6266_v40  ;;  %4750 = vrcp.f32 %v1880_v39 }
 0x567   : > { %v6272_v31 = vpop.eup %4732  ;;  %v2597_v17 = vmul.f32 0.25, %v2487_v5  ;;  %v1993_v21 = vmul.f32 %v4731_v49, %v6013_v19  ;;  %v2489_v61 = vpop.f32.mrb[106].mxu0  ;;  %v2692_v43 = vmul.f32 1.442695, %v2596_v14  ;;  %v1992_v36 = vmul.f32 %v4731_v49, %v6009_v26 }
 0x568   : > { %v6276_v42 = vpop.eup %4734  ;;  %2793 = vadd.xlane.f32.xlu1 %v2792_v27  ;;  %v2598_v46 = vmul.f32 0.25, %v2489_v61  ;;  %v2491_v48 = vpop.f32.mrb[107].mxu0  ;;  %v1990_v19 = vmul.f32 %v4725_v41, %v6005_v54 }
 0x569   : > { %v6279_v59 = vpop.eup %4736  ;;  %v2694_v52 = vmul.f32 1.442695, %v2597_v17  ;;  %v2051_v47 = vpack.c.bf16 %v1993_v21, %v1991_v34  ;;  %v1883_v7 = vpop.xlane.xlu1 %1882  ;;  %v2599_v16 = vmul.f32 0.25, %v2491_v48  ;;  %4752 = vpow2.f32 %v2692_v43 }
 0x56a   : > { %v4739_v20 = vpop.eup %4738  ;;  %v2696_v28 = vmul.f32 1.442695, %v2598_v46  ;;  %v2795_v14 = vadd.f32 %v6276_v42, %v6272_v31  ;;  %v2050_v26 = vpack.c.bf16 %v1992_v36, %v1990_v19 }
 0x56b   : > { %4754 = vpow2.f32 %v2694_v52  ;;  %2128 = vmatprep.mubr.bf16.mxu1 %v2051_v47  ;;  %v2698_v5 = vmul.f32 1.442695, %v2599_v16  ;;  %v6284_v27 = vpop.eup %4740  ;;  %v1995_v46 = vmul.f32 %v4739_v20, %v6020_v30 }
 0x56c   : > { %4756 = vrcp.f32 %v1883_v7  ;;  %2796 = vadd.xlane.f32.xlu1 %v2795_v14  ;;  %v6286_v39 = vpop.eup %4742  ;;  %v2495_v49 = vpop.f32.mrb[108].mxu0 }
 0x56d   : > { %4758 = vpow2.f32 %v2696_v28  ;;  %v4745_v17 = vpop.eup %4744  ;;  %v2600_v34 = vmul.f32 0.25, %v2495_v49  ;;  %v2497_v54 = vpop.f32.mrb[109].mxu0  ;;  %v2798_v41 = vadd.f32 %v6286_v39, %v6284_v27  ;;  %v1994_v49 = vmul.f32 %v4739_v20, %v6018_v25 }
 0x56e   : > { %4760 = vpow2.f32 %v2698_v5  ;;  %2129 = vmatmul.mubr.bf16.gmra.mrb[24].mxu1 %v2050_v26  ;;  %v6290_v21 = vpop.eup %4746  ;;  %v2601_v61 = vmul.f32 0.25, %v2497_v54  ;;  %v2499_v43 = vpop.f32.mrb[110].mxu0  ;;  %v1997_v48 = vmul.f32 %v4745_v17, %v6029_v23  ;;  %v1996_v16 = vmul.f32 %v4745_v17, %v6025_v12 }
 0x56f   : > { %v6294_v36 = vpop.eup %4748  ;;  %v2700_v52 = vmul.f32 1.442695, %v2600_v34  ;;  %v2602_v47 = vmul.f32 0.25, %v2499_v43  ;;  %v2501_v7 = vpop.f32.mrb[111].mxu0  ;;  %v2786_v34 = vadd.f32 %v6279_v59, %v6263_v24 }
 0x570   : > { %2799 = vadd.xlane.f32.xlu1 %v2798_v41  ;;  %v2702_v28 = vmul.f32 1.442695, %v2601_v61  ;;  %v1889_v19 = vpop.xlane.xlu1 %1888  ;;  %v2603_v14 = vmul.f32 0.25, %v2501_v7  ;;  %v2053_v5 = vpack.c.bf16 %v1997_v48, %v1995_v46  ;;  %v2801_v30 = vadd.f32 %v6294_v36, %v6290_v21  ;;  %v4751_v23 = vpop.eup %4750 }
 0x571   : > { %4762 = vpow2.f32 %v2700_v52  ;;  %v2704_v26 = vmul.f32 1.442695, %v2602_v47  ;;  %v2052_v12 = vpack.c.bf16 %v1996_v16, %v1994_v49  ;;  %v1999_v16 = vmul.f32 %v4751_v23, %v6039_v62 }
 0x572   : > { %4764 = vpow2.f32 %v2702_v28  ;;  %v2706_v54 = vmul.f32 1.442695, %v2603_v14  ;;  %2136 = vmatprep.mubr.bf16.mxu1 %v2053_v5  ;;  %v1998_v62 = vmul.f32 %v4751_v23, %v6037_v6 }
 0x573   : > { %v6302_v41 = vpop.eup %4752  ;;  %4766 = vpow2.f32 %v2704_v26 }
 0x574   : > { %2802 = vadd.xlane.f32.xlu1 %v2801_v30  ;;  %4768 = vpow2.f32 %v2706_v54  ;;  %v1892_v61 = vpop.xlane.xlu1 %1891  ;;  %2787 = vadd.xlane.f32.xlu0 %v2786_v34  ;;  %v2505_v25 = vpop.f32.mrb[112].mxu0 }
 0x575   : > { %v6304_v17 = vpop.eup %4754  ;;  %v2604_v43 = vmul.f32 0.25, %v2505_v25  ;;  %v2507_v46 = vpop.f32.mrb[113].mxu0  ;;  %4770 = vrcp.f32 %v1889_v19 }
 0x576   : > { %v4757_v20 = vpop.eup %4756  ;;  %2137 = vmatmul.mubr.bf16.gmra.mrb[28].mxu1 %v2052_v12  ;;  %v2804_v48 = vadd.f32 %v6304_v17, %v6302_v41  ;;  %v2605_v47 = vmul.f32 0.25, %v2507_v46  ;;  %v2509_v7 = vpop.f32.mrb[114].mxu0  ;;  %4772 = vrcp.f32 %v1892_v61 }
 0x577   : > { %v6308_v52 = vpop.eup %4758  ;;  %v2001_v28 = vmul.f32 %v4757_v20, %v6045_v1  ;;  %v2708_v5 = vmul.f32 1.442695, %v2604_v43  ;;  %v2606_v26 = vmul.f32 0.25, %v2509_v7  ;;  %v2511_v49 = vpop.f32.mrb[115].mxu0  ;;  %v2000_v30 = vmul.f32 %v4757_v20, %v6041_v53 }
 0x578   : > { %v6312_v14 = vpop.eup %4760  ;;  %2805 = vadd.xlane.f32.xlu1 %v2804_v48  ;;  %v2710_v54 = vmul.f32 1.442695, %v2605_v47  ;;  %v2607_v34 = vmul.f32 0.25, %v2511_v49  ;;  %v1895_v25 = vpop.xlane.xlu1 %1894 }
 0x579   : > { %v2055_v12 = vpack.c.bf16 %v2001_v28, %v1999_v16  ;;  %4774 = vpow2.f32 %v2708_v5  ;;  %v2712_v46 = vmul.f32 1.442695, %v2606_v26  ;;  %v2807_v1 = vadd.f32 %v6312_v14, %v6308_v52 }
 0x57a   : > { %4776 = vpow2.f32 %v2710_v54  ;;  %v2714_v19 = vmul.f32 1.442695, %v2607_v34  ;;  %v2054_v48 = vpack.c.bf16 %v2000_v30, %v1998_v62 }
 0x57b   : > { %2144 = vmatprep.mubr.bf16.mxu1 %v2055_v12  ;;  %v6318_v43 = vpop.eup %4762  ;;  %4778 = vpow2.f32 %v2712_v46  ;;  %v1886_v53 = vpop.xlane.xlu0 %1885 }
 0x57c   : > { %7104 = vst [vmem:[#allocation47_spill] sm:$0xff] %v6318_v43  ;;  %2808 = vadd.xlane.f32.xlu1 %v2807_v1  ;;  %v6320_v61 = vpop.eup %4764  ;;  %4780 = vpow2.f32 %v2714_v19  ;;  %v1898_v20 = vpop.xlane.xlu1 %1897 }
 0x57d   : > { %7105 = vst [vmem:[#allocation48_spill] sm:$0xff] %v6320_v61  ;;  %v2515_v47 = vpop.f32.mrb[116].mxu0  ;;  %v6322_v7 = vpop.eup %4766  ;;  %4782 = vrcp.f32 %v1895_v25  ;;  %v2810_v16 = vadd.f32 %v6320_v61, %v6318_v43 }
 0x57e   : > { %7106 = vst [vmem:[#allocation49_spill] sm:$0xff] %v6322_v7  ;;  %2145 = vmatmul.mubr.bf16.gmra.mrb[32].mxu1 %v2054_v48  ;;  %v2608_v6 = vmul.f32 0.25, %v2515_v47  ;;  %v2517_v23 = vpop.f32.mrb[117].mxu0  ;;  %v6326_v28 = vpop.eup %4768  ;;  %4784 = vrcp.f32 %v1886_v53 }
 0x57f   : > { %v2609_v5 = vmul.f32 0.25, %v2517_v23  ;;  %v2519_v26 = vpop.f32.mrb[118].mxu0  ;;  %v2813_v34 = vadd.f32 %v6326_v28, %v6322_v7  ;;  %v4771_v62 = vpop.eup %4770 }
 0x580   : > { %v2716_v49 = vmul.f32 1.442695, %v2608_v6  ;;  %v2610_v30 = vmul.f32 0.25, %v2519_v26  ;;  %v2521_v54 = vpop.f32.mrb[119].mxu0  ;;  %2811 = vadd.xlane.f32.xlu1 %v2810_v16  ;;  %v1901_v46 = vpop.xlane.xlu1 %1900 }
 0x581   : > { %v2718_v12 = vmul.f32 1.442695, %v2609_v5  ;;  %v2611_v25 = vmul.f32 0.25, %v2521_v54  ;;  %2814 = vadd.xlane.f32.xlu0 %v2813_v34  ;;  %v6330_v19 = vpop.eup %4772 }
 0x582   : > { %4786 = vpow2.f32 %v2716_v49  ;;  %v2720_v1 = vmul.f32 1.442695, %v2610_v30 }
 0x583   : > { %4788 = vpow2.f32 %v2718_v12  ;;  %v2722_v48 = vmul.f32 1.442695, %v2611_v25  ;;  %v6332_v53 = vpop.eup %4774 }
 0x584   : > { %7107 = vst [vmem:[#allocation50_spill] sm:$0xff] %v6332_v53  ;;  %4790 = vpow2.f32 %v2720_v1  ;;  %v6334_v47 = vpop.eup %4776  ;;  %v1904_v6 = vpop.xlane.xlu1 %1903 }
 0x585   : > { %7108 = vst [vmem:[#allocation51_spill] sm:$0xff] %v6334_v47  ;;  %4792 = vpow2.f32 %v2722_v48  ;;  %v2525_v23 = vpop.f32.mrb[120].mxu0  ;;  %v6336_v16 = vpop.eup %4778  ;;  %v2816_v49 = vadd.f32 %v6334_v47, %v6332_v53  ;;  %v2004_v53 = vmul.f32 %v4771_v62, %v6049_v29  ;;  %v2007_v29 = vmul.f32 %v6330_v19, %v6061_v2 }
 0x586   : > { %7109 = vst [vmem:[#allocation52_spill] sm:$0xff] %v6336_v16  ;;  %4794 = vrcp.f32 %v1901_v46  ;;  %v2612_v5 = vmul.f32 0.25, %v2525_v23  ;;  %v2527_v26 = vpop.f32.mrb[121].mxu0  ;;  %v6340_v30 = vpop.eup %4780  ;;  %v2005_v46 = vmul.f32 %v4771_v62, %v6053_v4 }
 0x587   : > { %4796 = vrcp.f32 %v1898_v20  ;;  %v2613_v54 = vmul.f32 0.25, %v2527_v26  ;;  %v2529_v34 = vpop.f32.mrb[122].mxu0  ;;  %v4783_v12 = vpop.eup %4782  ;;  %2817 = vadd.xlane.f32.xlu1 %v2816_v49  ;;  %v2819_v48 = vadd.f32 %v6340_v30, %v6336_v16 }
 0x588   : > { %v2724_v25 = vmul.f32 1.442695, %v2612_v5  ;;  %v2614_v1 = vmul.f32 0.25, %v2529_v34  ;;  %v2531_v43 = vpop.f32.mrb[123].mxu0  ;;  %v4785_v23 = vpop.eup %4784  ;;  %v2009_v47 = vmul.f32 %v4783_v12, %v6067_v45 }
 0x589   : > { %v2726_v7 = vmul.f32 1.442695, %v2613_v54  ;;  %v2615_v61 = vmul.f32 0.25, %v2531_v43  ;;  %2820 = vadd.xlane.f32.xlu0 %v2819_v48  ;;  %v2003_v5 = vmul.f32 %v4785_v23, %v6071_v63  ;;  %v2002_v26 = vmul.f32 %v4785_v23, %v6069_v15  ;;  %v1907_v34 = vpop.xlane.xlu1 %1906 }
 0x58a   : > { %4798 = vpow2.f32 %v2724_v25  ;;  %v2728_v20 = vmul.f32 1.442695, %v2614_v1  ;;  %v2059_v63 = vpack.c.bf16 %v2009_v47, %v2007_v29  ;;  %v2006_v29 = vmul.f32 %v6330_v19, %v6059_v8 }
 0x58b   : > { %4800 = vpow2.f32 %v2726_v7  ;;  %v2730_v49 = vmul.f32 1.442695, %v2615_v61  ;;  %v2057_v4 = vpack.c.bf16 %v2005_v46, %v2003_v5  ;;  %v2056_v54 = vpack.c.bf16 %v2004_v53, %v2002_v26 }
 0x58c   : > { %v6349_v16 = vpop.eup %4786  ;;  %4802 = vpow2.f32 %v2728_v20  ;;  %v2535_v45 = vpop.f32.mrb[124].mxu0 }
 0x58d   : > { %v6353_v43 = vpop.eup %4788  ;;  %4804 = vpow2.f32 %v2730_v49  ;;  %2152 = vmatprep.mubr.bf16.mxu1 %v2057_v4  ;;  %v2616_v15 = vmul.f32 0.25, %v2535_v45  ;;  %v2537_v61 = vpop.f32.mrb[125].mxu0 }
 0x58e   : > { %v6355_v62 = vpop.eup %4790  ;;  %4806 = vrcp.f32 %v1907_v34  ;;  %v2822_v7 = vadd.f32 %v6353_v43, %v6349_v16  ;;  %2153 = vmatmul.mubr.bf16.gmra.mrb[36].mxu1 %v2056_v54  ;;  %v2617_v53 = vmul.f32 0.25, %v2537_v61  ;;  %v1913_v2 = vpop.xlane.xlu1 %1912  ;;  %v2008_v34 = vmul.f32 %v4783_v12, %v6063_v55 }
 0x58f   : > { %v6359_v25 = vpop.eup %4792  ;;  %4808 = vrcp.f32 %v1904_v6  ;;  %v2539_v1 = vpop.f32.mrb[126].mxu0  ;;  %v2732_v46 = vmul.f32 1.442695, %v2616_v15  ;;  %2160 = vmatprep.mubr.bf16.mxu1 %v2059_v63 }
 0x590   : > { %v4795_v48 = vpop.eup %4794  ;;  %v2618_v23 = vmul.f32 0.25, %v2539_v1  ;;  %v2541_v20 = vpop.f32.mrb[127].mxu0  ;;  %2823 = vadd.xlane.f32.xlu1 %v2822_v7  ;;  %v2825_v47 = vadd.f32 %v6359_v25, %v6355_v62  ;;  %v2734_v26 = vmul.f32 1.442695, %v2617_v53  ;;  %4810 = vrcp.f32 %v1913_v2 }
 0x591   : > { %v4797_v5 = vpop.eup %4796  ;;  %v2619_v49 = vmul.f32 0.25, %v2541_v20  ;;  %4812 = vpow2.f32 %v2732_v46  ;;  %v2013_v4 = vmul.f32 %v4795_v48, %v6085_v32  ;;  %v1910_v15 = vpop.xlane.xlu0 %1909  ;;  %v2058_v55 = vpack.c.bf16 %v2008_v34, %v2006_v29 }
 0x592   : > { %v2736_v6 = vmul.f32 1.442695, %v2618_v23  ;;  %2826 = vadd.xlane.f32.xlu0 %v2825_v47  ;;  %4814 = vpow2.f32 %v2734_v26  ;;  %v2011_v63 = vmul.f32 %v4797_v5, %v6077_v13 }
 0x593   : > { %v2738_v54 = vmul.f32 1.442695, %v2619_v49 }
 0x594   : > { %v6367_v45 = vpop.eup %4798  ;;  %4816 = vpow2.f32 %v2736_v6  ;;  %v2545_v12 = vpop.f32.mrb[128].mxu0  ;;  %v2061_v32 = vpack.c.bf16 %v2013_v4, %v2011_v63 }
 0x595   : > { %v6370_v61 = vpop.eup %4800  ;;  %4818 = vpow2.f32 %v2738_v54  ;;  %v2620_v53 = vmul.f32 0.25, %v2545_v12  ;;  %v2547_v2 = vpop.f32.mrb[129].mxu0  ;;  %v2012_v54 = vmul.f32 %v4795_v48, %v6081_v33  ;;  %v2010_v12 = vmul.f32 %v4797_v5, %v6075_v18 }
 0x596   : > { %v6372_v7 = vpop.eup %4802  ;;  %v2828_v1 = vadd.f32 %v6370_v61, %v6367_v45  ;;  %4820 = vrcp.f32 %v1910_v15  ;;  %2161 = vmatmul.mubr.bf16.gmra.mrb[40].mxu1 %v2058_v55  ;;  %v2621_v19 = vmul.f32 0.25, %v2547_v2  ;;  %v1919_v46 = vpop.xlane.xlu1 %1918 }
 0x597   : > { %v6376_v8 = vpop.eup %4804  ;;  %v2549_v13 = vpop.f32.mrb[130].mxu0  ;;  %v2740_v20 = vmul.f32 1.442695, %v2620_v53  ;;  %2168 = vmatprep.mubr.bf16.mxu1 %v2061_v32  ;;  %4822 = vrcp.f32 %v1919_v46  ;;  %v2060_v33 = vpack.c.bf16 %v2012_v54, %v2010_v12 }
 0x598   : > { %v4807_v23 = vpop.eup %4806  ;;  %v2622_v47 = vmul.f32 0.25, %v2549_v13  ;;  %v2551_v26 = vpop.f32.mrb[131].mxu0  ;;  %2829 = vadd.xlane.f32.xlu1 %v2828_v1  ;;  %v2831_v49 = vadd.f32 %v6376_v8, %v6372_v7  ;;  %v2742_v6 = vmul.f32 1.442695, %v2621_v19 }
 0x599   : > { %v4809_v34 = vpop.eup %4808  ;;  %v2623_v4 = vmul.f32 0.25, %v2551_v26  ;;  %4824 = vpow2.f32 %v2740_v20  ;;  %v2017_v15 = vmul.f32 %v4807_v23, %v6097_v56  ;;  %v1916_v32 = vpop.xlane.xlu0 %1915 }
 0x59a   : > { %v2744_v29 = vmul.f32 1.442695, %v2622_v47  ;;  %2832 = vadd.xlane.f32.xlu0 %v2831_v49  ;;  %v4811_v63 = vpop.eup %4810  ;;  %4826 = vpow2.f32 %v2742_v6  ;;  %v2015_v2 = vmul.f32 %v4809_v34, %v6091_v44 }
 0x59b   : > { %v2746_v55 = vmul.f32 1.442695, %v2623_v4  ;;  %v6383_v53 = vpop.eup %4812 }
 0x59c   : > { %4828 = vpow2.f32 %v2744_v29  ;;  %v6386_v1 = vpop.eup %4814  ;;  %v2555_v48 = vpop.f32.mrb[132].mxu0  ;;  %v2063_v56 = vpack.c.bf16 %v2017_v15, %v2015_v2 }
 0x59d   : > { %4830 = vpow2.f32 %v2746_v55  ;;  %v2624_v46 = vmul.f32 0.25, %v2555_v48  ;;  %v2557_v13 = vpop.f32.mrb[133].mxu0  ;;  %v2834_v20 = vadd.f32 %v6386_v1, %v6383_v53  ;;  %v2016_v55 = vmul.f32 %v4807_v23, %v6093_v9 }
 0x59e   : > { %v6388_v19 = vpop.eup %4816  ;;  %4832 = vrcp.f32 %v1916_v32  ;;  %2169 = vmatmul.mubr.bf16.gmra.mrb[44].mxu1 %v2060_v33  ;;  %v2625_v5 = vmul.f32 0.25, %v2557_v13  ;;  %v1925_v47 = vpop.xlane.xlu1 %1924  ;;  %v2021_v32 = vmul.f32 %v4811_v63, %v6109_v0  ;;  %v2014_v48 = vmul.f32 %v4809_v34, %v6089_v57 }
 0x59f   : > { %v6392_v18 = vpop.eup %4818  ;;  %v2559_v44 = vpop.f32.mrb[134].mxu0  ;;  %v2748_v26 = vmul.f32 1.442695, %v2624_v46  ;;  %2176 = vmatprep.mubr.bf16.mxu1 %v2063_v56  ;;  %2835 = vadd.xlane.f32.xlu1 %v2834_v20  ;;  %4834 = vrcp.f32 %v1925_v47  ;;  %v2020_v34 = vmul.f32 %v4811_v63, %v6105_v10 }
 0x5a0   : > { %v2626_v49 = vmul.f32 0.25, %v2559_v44  ;;  %v2561_v6 = vpop.f32.mrb[135].mxu0  ;;  %v2837_v4 = vadd.f32 %v6392_v18, %v6388_v19  ;;  %v4821_v54 = vpop.eup %4820  ;;  %v2750_v29 = vmul.f32 1.442695, %v2625_v5  ;;  %v2062_v9 = vpack.c.bf16 %v2016_v55, %v2014_v48  ;;  %v7113_v55 = vld [vmem:[#allocation22_spill] sm:$0xff] }
 0x5a1   : > { %v2627_v15 = vmul.f32 0.25, %v2561_v6  ;;  %4836 = vpow2.f32 %v2748_v26  ;;  %v4823_v2 = vpop.eup %4822  ;;  %v1922_v56 = vpop.xlane.xlu0 %1921  ;;  %v2019_v13 = vmul.f32 %v4821_v54, %v6103_v11  ;;  %v7111_v6 = vld [vmem:[#allocation26_spill] sm:$0xff] }
 0x5a2   : > { %v2752_v12 = vmul.f32 1.442695, %v2626_v49  ;;  %2838 = vadd.xlane.f32.xlu0 %v2837_v4  ;;  %4838 = vpow2.f32 %v2750_v29  ;;  %v2025_v26 = vmul.f32 %v4823_v2, %v6121_v3  ;;  %v2018_v4 = vmul.f32 %v4821_v54, %v7111_v6  ;;  %v7119_v6 = vld [vmem:[#allocation14_spill] sm:$0xff] }
 0x5a3   : > { %v2754_v33 = vmul.f32 1.442695, %v2627_v15  ;;  %v6399_v46 = vpop.eup %4824  ;;  %v2065_v5 = vpack.c.bf16 %v2021_v32, %v2019_v13  ;;  %v7116_v13 = vld [vmem:[#allocation8_spill] sm:$0xff] }
 0x5a4   : > { %7110 = vst [vmem:[#allocation53_spill] sm:$0xff] %v6399_v46  ;;  %4840 = vpow2.f32 %v2752_v12  ;;  %v6402_v20 = vpop.eup %4826 }
 0x5a5   : > { %4842 = vpow2.f32 %v2754_v33  ;;  %v2840_v0 = vadd.f32 %v6402_v20, %v6399_v46  ;;  %v1928_v15 = vpop.xlane.xlu0 %1927  ;;  %v2064_v33 = vpack.c.bf16 %v2020_v34, %v2018_v4  ;;  %v7118_v34 = vld [vmem:[#allocation28_spill] sm:$0xff] }
 0x5a6   : > { %v6404_v23 = vpop.eup %4828  ;;  %4844 = vrcp.f32 %v1922_v56  ;;  %2177 = vmatmul.mubr.bf16.gmra.mrb[48].mxu1 %v2062_v9  ;;  %v1931_v44 = vpop.xlane.xlu1 %1930  ;;  %v2024_v9 = vmul.f32 %v4823_v2, %v7116_v13  ;;  %v7121_v13 = vld [vmem:[#allocation16_spill] sm:$0xff] }
 0x5a7   : > { %v6408_v47 = vpop.eup %4830  ;;  %2184 = vmatprep.mubr.bf16.mxu1 %v2065_v5  ;;  %2841 = vadd.xlane.f32.xlu1 %v2840_v0  ;;  %4846 = vrcp.f32 %v1931_v44  ;;  %v7117_v0 = vld [vmem:[#allocation9_spill] sm:$0xff] }
 0x5a8   : > { %v2843_v57 = vadd.f32 %v6408_v47, %v6404_v23  ;;  %v4833_v11 = vpop.eup %4832  ;;  %4848 = vrcp.f32 %v1928_v15 }
 0x5a9   : > { %v4835_v49 = vpop.eup %4834  ;;  %v2023_v12 = vmul.f32 %v4833_v11, %v7113_v55  ;;  %v2022_v44 = vmul.f32 %v4833_v11, %v7118_v34  ;;  %v7123_v11 = vld [vmem:[#allocation12_spill] sm:$0xff] }
 0x5aa   : > { %2844 = vadd.xlane.f32.xlu0 %v2843_v57  ;;  %v2029_v57 = vmul.f32 %v4835_v49, %v7117_v0 }
 0x5ab   : > { %v6415_v29 = vpop.eup %4836  ;;  %v2067_v56 = vpack.c.bf16 %v2025_v26, %v2023_v12  ;;  %v2066_v15 = vpack.c.bf16 %v2024_v9, %v2022_v44  ;;  %v7124_v44 = vld [vmem:[#allocation31_spill] sm:$0xff] }
 0x5ac   : > { %7112 = vst [vmem:[#allocation26_spill] sm:$0xff] %v6415_v29  ;;  %v6418_v32 = vpop.eup %4838  ;;  %v1934_v26 = vpop.xlane.xlu0 %1933 }
 0x5ad   : > { %7114 = vst [vmem:[#allocation22_spill] sm:$0xff] %v6418_v32  ;;  %v2846_v10 = vadd.f32 %v6418_v32, %v6415_v29  ;;  %v7122_v29 = vld [vmem:[#allocation15_spill] sm:$0xff] }
 0x5ae   : > { %v6420_v48 = vpop.eup %4840  ;;  %2185 = vmatmul.mubr.bf16.gmra.mrb[52].mxu1 %v2064_v33  ;;  %v1937_v5 = vpop.xlane.xlu1 %1936 }
 0x5af   : > { %7115 = vst [vmem:[#allocation54_spill] sm:$0xff] %v6420_v48  ;;  %v6424_v63 = vpop.eup %4842  ;;  %2192 = vmatprep.mubr.bf16.mxu1 %v2067_v56  ;;  %2847 = vadd.xlane.f32.xlu1 %v2846_v10  ;;  %4850 = vrcp.f32 %v1937_v5  ;;  %v7120_v56 = vld [vmem:[#allocation29_spill] sm:$0xff] }
 0x5b0   : > { %v2849_v3 = vadd.f32 %v6424_v63, %v6420_v48  ;;  %v4845_v54 = vpop.eup %4844  ;;  %4852 = vrcp.f32 %v1934_v26  ;;  %v2028_v10 = vmul.f32 %v4835_v49, %v7120_v56  ;;  %v7125_v49 = vld [vmem:[#allocation24_spill] sm:$0xff] }
 0x5b1   : > { %v2027_v4 = vmul.f32 %v4845_v54, %v7119_v6  ;;  %v4847_v12 = vpop.eup %4846  ;;  %v2026_v0 = vmul.f32 %v4845_v54, %v7122_v29  ;;  %v7127_v29 = vld [vmem:[#allocation20_spill] sm:$0xff] }
 0x5b2   : > { %2850 = vadd.xlane.f32.xlu0 %v2849_v3  ;;  %v4849_v33 = vpop.eup %4848  ;;  %v2033_v3 = vmul.f32 %v4847_v12, %v7121_v13  ;;  %v2032_v26 = vmul.f32 %v4847_v12, %v7124_v44  ;;  %v7129_v12 = vld [vmem:[#allocation6_spill] sm:$0xff] }
 0x5b3   : > { %v2069_v55 = vpack.c.bf16 %v2029_v57, %v2027_v4  ;;  %v2031_v34 = vmul.f32 %v4849_v33, %v7123_v11  ;;  %v2068_v6 = vpack.c.bf16 %v2028_v10, %v2026_v0 }
 0x5b4   : > { %v1940_v48 = vpop.xlane.xlu0 %1939 }
 0x5b5   : > { %v2071_v5 = vpack.c.bf16 %v2033_v3, %v2031_v34  ;;  %v7128_v3 = vld [vmem:[#allocation23_spill] sm:$0xff] }
 0x5b6   : > { %2193 = vmatmul.mubr.bf16.gmra.mrb[56].mxu1 %v2066_v15  ;;  %v1943_v2 = vpop.xlane.xlu1 %1942 }
 0x5b7   : > { %2200 = vmatprep.mubr.bf16.mxu1 %v2069_v55  ;;  %4854 = vrcp.f32 %v1943_v2  ;;  %v7126_v55 = vld [vmem:[#allocation30_spill] sm:$0xff] }
 0x5b8   : > { %4856 = vrcp.f32 %v1940_v48  ;;  %v2030_v56 = vmul.f32 %v4849_v33, %v7126_v55  ;;  %v7131_v33 = vld [vmem:[#allocation18_spill] sm:$0xff] }
 0x5b9   : > { %v4851_v9 = vpop.eup %4850 }
 0x5ba   : > { %v4853_v57 = vpop.eup %4852  ;;  %v2037_v15 = vmul.f32 %v4851_v9, %v7125_v49  ;;  %v2070_v11 = vpack.c.bf16 %v2032_v26, %v2030_v56  ;;  %v2036_v0 = vmul.f32 %v4851_v9, %v7128_v3  ;;  %v7134_v3 = vld [vmem:[#allocation17_spill] sm:$0xff] }
 0x5bb   : > { %v2035_v54 = vmul.f32 %v4853_v57, %v7127_v29 }
 0x5bc   : > { %v1946_v13 = vpop.xlane.xlu0 %1945 }
 0x5bd   : > { %v2073_v2 = vpack.c.bf16 %v2037_v15, %v2035_v54  ;;  %v7132_v54 = vld [vmem:[#allocation2_spill] sm:$0xff] }
 0x5be   : > { %2201 = vmatmul.mubr.bf16.gmra.mrb[60].mxu1 %v2068_v6  ;;  %v1949_v4 = vpop.xlane.xlu1 %1948 }
 0x5bf   : > { %2208 = vmatprep.mubr.bf16.mxu1 %v2071_v5  ;;  %4858 = vrcp.f32 %v1949_v4  ;;  %v7130_v5 = vld [vmem:[#allocation13_spill] sm:$0xff] }
 0x5c0   : > { %4860 = vrcp.f32 %v1946_v13  ;;  %v2034_v44 = vmul.f32 %v4853_v57, %v7130_v5  ;;  %v7135_v57 = vld [vmem:[#allocation4_spill] sm:$0xff] }
 0x5c1   : > { %v4855_v10 = vpop.eup %4854 }
 0x5c2   : > { %v4857_v48 = vpop.eup %4856  ;;  %v2041_v6 = vmul.f32 %v4855_v10, %v7129_v12  ;;  %v2072_v29 = vpack.c.bf16 %v2036_v0, %v2034_v44  ;;  %v2040_v9 = vmul.f32 %v4855_v10, %v7132_v54 }
 0x5c3   : > { %v2039_v55 = vmul.f32 %v4857_v48, %v7131_v33  ;;  %v2038_v12 = vmul.f32 %v4857_v48, %v7134_v3  ;;  %v7138_v48 = vld [vmem:[#allocation7_spill] sm:$0xff] }
 0x5c4   : > { %v2758_v49 = vpop.xlane.xlu0 %2757 }
 0x5c5   : > { %v2075_v4 = vpack.c.bf16 %v2041_v6, %v2039_v55  ;;  %v2074_v33 = vpack.c.bf16 %v2040_v9, %v2038_v12  ;;  %v7136_v6 = vld [vmem:[#allocation19_spill] sm:$0xff] }
 0x5c6   : > { %2209 = vmatmul.mubr.bf16.gmra.mrb[64].mxu1 %v2070_v11  ;;  %v2761_v34 = vpop.xlane.xlu1 %2760  ;;  %v7133_v11 = vld [vmem:[#allocation5_spill] sm:$0xff]  ;;  %v7140_v12 = vld [vmem:[#allocation3_spill] sm:$0xff] }
 0x5c7   : > { %2216 = vmatprep.mubr.bf16.mxu1 %v2073_v2  ;;  %4862 = vrcp.f32 %v2761_v34 }
 0x5c8   : > { %4864 = vrcp.f32 %v2758_v49  ;;  %v7137_v49 = vld [vmem:[#allocation27_spill] sm:$0xff] }
 0x5c9   : > { %v4859_v26 = vpop.eup %4858 }
 0x5ca   : > { %v4861_v15 = vpop.eup %4860  ;;  %v2045_v2 = vmul.f32 %v4859_v26, %v7133_v11  ;;  %v2044_v3 = vmul.f32 %v4859_v26, %v7138_v48  ;;  %v7143_v26 = vld [vmem:[#allocation34_spill] sm:$0xff]  ;;  %v7146_v48 = vld [vmem:[#allocation37_spill] sm:$0xff] }
 0x5cb   : > { %v2043_v5 = vmul.f32 %v4861_v15, %v7135_v57  ;;  %v2042_v57 = vmul.f32 %v4861_v15, %v7140_v12 }
 0x5cc   : > { %v2764_v56 = vpop.xlane.xlu0 %2763 }
 0x5ce   : > { %2217 = vmatmul.mubr.bf16.gmra.mrb[68].mxu1 %v2072_v29  ;;  %v2767_v13 = vpop.xlane.xlu1 %2766  ;;  %v2077_v29 = vpack.c.bf16 %v2045_v2, %v2043_v5 }
 0x5cf   : > { %2224 = vmatprep.mubr.bf16.mxu1 %v2075_v4  ;;  %4866 = vrcp.f32 %v2767_v13  ;;  %v7139_v13 = vld [vmem:[#allocation35_spill] sm:$0xff] }
 0x5d0   : > { %4868 = vrcp.f32 %v2764_v56  ;;  %v2076_v56 = vpack.c.bf16 %v2044_v3, %v2042_v57 }
 0x5d1   : > { %v4863_v4 = vpop.eup %4862 }
 0x5d2   : > { %v4865_v54 = vpop.eup %4864  ;;  %v2887_v9 = vmul.f32 %v4863_v4, %v7139_v13 }
 0x5d4   : > { %v1248_v34 = vpop.permute.xlu0 %1247  ;;  %v2770_v0 = vpop.xlane.xlu1 %2769 }
 0x5d5   : > { %v1333_v44 = vadd.f32 %v7136_v6, %v1248_v34  ;;  %v1335_v55 = vadd.f32 %v7137_v49, %v1248_v34  ;;  %v7141_v6 = vld [vmem:[#allocation33_spill] sm:$0xff]  ;;  %v7142_v34 = vmov 0.0   ;;  %v2886_v49 = vmul.f32 %v4863_v4, %v7143_v26  ;;  %v7148_v4 = vld [vmem:[#allocation43_spill] sm:$0xff] }
 0x5d6   : > { %2225 = vmatmul.mubr.bf16.gmra.mrb[72].mxu1 %v2074_v33  ;;  %v2885_v46 = vmul.f32 %v4865_v54, %v7141_v6 }
 0x5d7   : > { %v2980_v32 = vpack.c.bf16 %v1333_v44, %v1333_v44  ;;  %v2981_v10 = vpack.c.bf16 %v1335_v55, %v1335_v55  ;;  %2232 = vmatprep.mubr.bf16.mxu1 %v2077_v29  ;;  %v7144_v29 = vld [vmem:[#allocation39_spill] sm:$0xff] }
 0x5d8   : > { %v2773_v11 = vpop.xlane.xlu1 %2772  ;;  %v2949_v5 = vpack.c.bf16 %v2887_v9, %v2885_v46 }
 0x5d9   : > { %2982 = vmatprep.subr.bf16.mxu1 %v2981_v10  ;;  %4870 = vrcp.f32 %v2773_v11  ;;  %v4867_v33 = vpop.eup %4866  ;;  %v7145_v10 = vld [vmem:[#allocation32_spill] sm:$0xff] }
 0x5da   : > { %2983 = vmatpush1.bf16.xpose.msra.mxu1 %v2980_v32  ;;  %4872 = vrcp.f32 %v2770_v0  ;;  %v4869_v44 = vpop.eup %4868  ;;  %v2891_v32 = vmul.f32 %v4867_v33, %v7144_v29  ;;  %v2884_v15 = vmul.f32 %v4865_v54, %v7145_v10  ;;  %v7147_v0 = vld [vmem:[#allocation38_spill] sm:$0xff]  ;;  %v7150_v29 = vld [vmem:[#allocation41_spill] sm:$0xff] }
 0x5db   : > { %4300 = vmatprep.subr.bf16.mxu1 %v7142_v34  ;;  %v2889_v13 = vmul.f32 %v4869_v44, %v7146_v48  ;;  %v2890_v9 = vmul.f32 %v4867_v33, %v7147_v0 }
 0x5dc   : > { %v2776_v2 = vpop.xlane.xlu1 %2775  ;;  %v2948_v12 = vpack.c.bf16 %v2886_v49, %v2884_v15  ;;  %v7151_v15 = vld [vmem:[#allocation42_spill] sm:$0xff] }
 0x5dd   : > { %v2951_v3 = vpack.c.bf16 %v2891_v32, %v2889_v13  ;;  %v7152_v13 = vld [vmem:[#allocation40_spill] sm:$0xff] }
 0x5de   : > { %2233 = vmatmul.mubr.bf16.gmra.mrb[76].mxu1 %v2076_v56 }
 0x5df   : > { %3014 = vmatprep.mubr.bf16.mxu1 %v2949_v5  ;;  %v7149_v5 = vld [vmem:[#allocation36_spill] sm:$0xff] }
 0x5e0   : > { %v2779_v55 = vpop.xlane.xlu1 %2778  ;;  %v2888_v26 = vmul.f32 %v4869_v44, %v7149_v5 }
 0x5e1   : > { %4874 = vrcp.f32 %v2779_v55 }
 0x5e2   : > { %4876 = vrcp.f32 %v2776_v2  ;;  %v2950_v10 = vpack.c.bf16 %v2890_v9, %v2888_v26 }
 0x5e3   : > { %v4871_v57 = vpop.eup %4870 }
 0x5e4   : > { %v4873_v46 = vpop.eup %4872  ;;  %v2895_v56 = vmul.f32 %v4871_v57, %v7148_v4  ;;  %v2894_v48 = vmul.f32 %v4871_v57, %v7151_v15 }
 0x5e5   : > { %v2782_v11 = vpop.xlane.xlu1 %2781  ;;  %v2893_v54 = vmul.f32 %v4873_v46, %v7150_v29  ;;  %v7154_v29 = vld [vmem:[#allocation44_spill] sm:$0xff] }
 0x5e6   : > { %3015 = vmatmul.mubr.bf16.vlgmr.msra.gmra.mrb[80].mxu1 %v2948_v12  ;;  %v2892_v12 = vmul.f32 %v4873_v46, %v7152_v13 }
 0x5e7   : > { %3022 = vmatprep.mubr.bf16.mxu1 %v2951_v3  ;;  %v2953_v55 = vpack.c.bf16 %v2895_v56, %v2893_v54  ;;  %v7153_v3 = vld [vmem:[#allocation45_spill] sm:$0xff] }
 0x5e8   : > { %v2952_v44 = vpack.c.bf16 %v2894_v48, %v2892_v12 }
 0x5e9   : > { %v2785_v6 = vpop.xlane.xlu1 %2784 }
 0x5ea   : > { %4878 = vrcp.f32 %v2785_v6 }
 0x5eb   : > { %v4875_v49 = vpop.eup %4874  ;;  %4880 = vrcp.f32 %v2782_v11 }
 0x5ec   : > { %v4877_v2 = vpop.eup %4876  ;;  %v2899_v33 = vmul.f32 %v4875_v49, %v6229_v60  ;;  %v2898_v56 = vmul.f32 %v4875_v49, %v6225_v22  ;;  %v7155_v22 = vld [vmem:[#allocation46_spill] sm:$0xff] }
 0x5ed   : > { %v2897_v0 = vmul.f32 %v4877_v2, %v7153_v3  ;;  %v2896_v57 = vmul.f32 %v4877_v2, %v7154_v29 }
 0x5ee   : > { %3023 = vmatmul.mubr.bf16.gmra.mrb[84].mxu1 %v2950_v10 }
 0x5ef   : > { %3030 = vmatprep.mubr.bf16.mxu1 %v2953_v55  ;;  %v2791_v32 = vpop.xlane.xlu1 %2790  ;;  %v2955_v5 = vpack.c.bf16 %v2899_v33, %v2897_v0  ;;  %v2954_v54 = vpack.c.bf16 %v2898_v56, %v2896_v57 }
 0x5f0   : > { %4882 = vrcp.f32 %v2791_v32 }
 0x5f4   : > { %v4879_v6 = vpop.eup %4878 }
 0x5f5   : > { %v2794_v4 = vpop.xlane.xlu1 %2793  ;;  %v4881_v9 = vpop.eup %4880  ;;  %v2903_v26 = vmul.f32 %v4879_v6, %v6249_v51  ;;  %v2902_v55 = vmul.f32 %v4879_v6, %v6245_v37 }
 0x5f6   : > { %3031 = vmatmul.mubr.bf16.gmra.mrb[88].mxu1 %v2952_v44  ;;  %v2901_v60 = vmul.f32 %v4881_v9, %v6242_v35  ;;  %v2900_v49 = vmul.f32 %v4881_v9, %v7155_v22 }
 0x5f7   : > { %3038 = vmatprep.mubr.bf16.mxu1 %v2955_v5 }
 0x5f8   : > { %v2957_v10 = vpack.c.bf16 %v2903_v26, %v2901_v60  ;;  %v2956_v51 = vpack.c.bf16 %v2902_v55, %v2900_v49 }
 0x5f9   : > { %v2797_v11 = vpop.xlane.xlu1 %2796 }
 0x5fa   : > { %4884 = vrcp.f32 %v2797_v11  ;;  %v4883_v35 = vpop.eup %4882 }
 0x5fb   : > { %4886 = vrcp.f32 %v2794_v4  ;;  %v2907_v32 = vmul.f32 %v4883_v35, %v6256_v50  ;;  %v2906_v44 = vmul.f32 %v4883_v35, %v6254_v58 }
 0x5fd   : > { %v2800_v46 = vpop.xlane.xlu1 %2799 }
 0x5fe   : > { %3039 = vmatmul.mubr.bf16.gmra.mrb[92].mxu1 %v2954_v54 }
 0x5ff   : > { %3046 = vmatprep.mubr.bf16.mxu1 %v2957_v10 }
 0x601   : > { %v2803_v15 = vpop.xlane.xlu1 %2802  ;;  %v2788_v48 = vpop.xlane.xlu0 %2787 }
 0x602   : > { %4888 = vrcp.f32 %v2788_v48 }
 0x603   : > { %4890 = vrcp.f32 %v2803_v15 }
 0x604   : > { %v4885_v33 = vpop.eup %4884  ;;  %4892 = vrcp.f32 %v2800_v46 }
 0x605   : > { %v2806_v2 = vpop.xlane.xlu1 %2805  ;;  %v4887_v13 = vpop.eup %4886  ;;  %v2911_v4 = vmul.f32 %v4885_v33, %v6276_v42 }
 0x606   : > { %3047 = vmatmul.mubr.bf16.gmra.mrb[96].mxu1 %v2956_v51  ;;  %v2909_v9 = vmul.f32 %v4887_v13, %v6268_v38  ;;  %v2908_v58 = vmul.f32 %v4887_v13, %v6266_v40 }
 0x608   : > { %v2961_v11 = vpack.c.bf16 %v2911_v4, %v2909_v9 }
 0x609   : > { %v2809_v3 = vpop.xlane.xlu1 %2808 }
 0x60a   : > { %4894 = vrcp.f32 %v2809_v3 }
 0x60b   : > { %4896 = vrcp.f32 %v2806_v2 }
 0x60c   : > { %v4889_v12 = vpop.eup %4888 }
 0x60d   : > { %v2905_v37 = vmul.f32 %v4889_v12, %v6279_v59  ;;  %v2904_v0 = vmul.f32 %v4889_v12, %v6263_v24  ;;  %v4891_v56 = vpop.eup %4890  ;;  %v2910_v59 = vmul.f32 %v4885_v33, %v6272_v31  ;;  %v2812_v42 = vpop.xlane.xlu1 %2811 }
 0x60e   : > { %v4893_v50 = vpop.eup %4892  ;;  %v2815_v26 = vpop.xlane.xlu0 %2814  ;;  %v2915_v24 = vmul.f32 %v4891_v56, %v6294_v36  ;;  %v2914_v46 = vmul.f32 %v4891_v56, %v6290_v21 }
 0x60f   : > { %v2959_v5 = vpack.c.bf16 %v2907_v32, %v2905_v37  ;;  %v2958_v6 = vpack.c.bf16 %v2906_v44, %v2904_v0  ;;  %v2913_v29 = vmul.f32 %v4893_v50, %v6286_v39  ;;  %4898 = vrcp.f32 %v2815_v26  ;;  %v7157_v32 = vld [vmem:[#allocation49_spill] sm:$0xff] }
 0x610   : > { %v2960_v38 = vpack.c.bf16 %v2910_v59, %v2908_v58  ;;  %4900 = vrcp.f32 %v2812_v42  ;;  %v2912_v36 = vmul.f32 %v4893_v50, %v6284_v27  ;;  %v7156_v27 = vld [vmem:[#allocation48_spill] sm:$0xff] }
 0x611   : > { %3054 = vmatprep.mubr.bf16.mxu1 %v2959_v5  ;;  %v2963_v57 = vpack.c.bf16 %v2915_v24, %v2913_v29  ;;  %v7159_v5 = vld [vmem:[#allocation51_spill] sm:$0xff]  ;;  %v7161_v29 = vld [vmem:[#allocation50_spill] sm:$0xff] }
 0x612   : > { %3055 = vmatmul.mubr.bf16.gmra.mrb[100].mxu1 %v2958_v6  ;;  %v2962_v39 = vpack.c.bf16 %v2914_v46, %v2912_v36 }
 0x613   : > { %3062 = vmatprep.mubr.bf16.mxu1 %v2961_v11 }
 0x614   : > { %v4895_v60 = vpop.eup %4894  ;;  %v2818_v55 = vpop.xlane.xlu1 %2817 }
 0x615   : > { %v4897_v54 = vpop.eup %4896  ;;  %v2919_v31 = vmul.f32 %v4895_v60, %v6312_v14  ;;  %v2918_v49 = vmul.f32 %v4895_v60, %v6308_v52 }
 0x616   : > { %v2821_v10 = vpop.xlane.xlu0 %2820  ;;  %v2917_v40 = vmul.f32 %v4897_v54, %v6304_v17  ;;  %v2916_v14 = vmul.f32 %v4897_v54, %v6302_v41 }
 0x617   : > { %4902 = vrcp.f32 %v2821_v10 }
 0x618   : > { %v2965_v15 = vpack.c.bf16 %v2919_v31, %v2917_v40  ;;  %4904 = vrcp.f32 %v2818_v55  ;;  %v2964_v17 = vpack.c.bf16 %v2918_v49, %v2916_v14 }
 0x619   : > { %v4899_v48 = vpop.eup %4898 }
 0x61a   : > { %3063 = vmatmul.mubr.bf16.gmra.mrb[104].mxu1 %v2960_v38  ;;  %v4901_v22 = vpop.eup %4900  ;;  %v2923_v21 = vmul.f32 %v4899_v48, %v6326_v28  ;;  %v2922_v3 = vmul.f32 %v4899_v48, %v7157_v32  ;;  %v7158_v28 = vld [vmem:[#allocation47_spill] sm:$0xff] }
 0x61b   : > { %3070 = vmatprep.mubr.bf16.mxu1 %v2963_v57  ;;  %v2921_v35 = vmul.f32 %v4901_v22, %v7156_v27  ;;  %v2920_v41 = vmul.f32 %v4901_v22, %v7158_v28 }
 0x61d   : > { %v2824_v2 = vpop.xlane.xlu1 %2823  ;;  %v2967_v33 = vpack.c.bf16 %v2923_v21, %v2921_v35  ;;  %v2966_v11 = vpack.c.bf16 %v2922_v3, %v2920_v41 }
 0x61f   : > { %v2827_v51 = vpop.xlane.xlu0 %2826 }
 0x620   : > { %4906 = vrcp.f32 %v2827_v51 }
 0x621   : > { %v4903_v13 = vpop.eup %4902  ;;  %4908 = vrcp.f32 %v2824_v2 }
 0x622   : > { %3071 = vmatmul.mubr.bf16.gmra.mrb[108].mxu1 %v2962_v39  ;;  %v4905_v12 = vpop.eup %4904  ;;  %v2927_v52 = vmul.f32 %v4903_v13, %v6340_v30  ;;  %v7160_v30 = vld [vmem:[#allocation52_spill] sm:$0xff] }
 0x623   : > { %3078 = vmatprep.mubr.bf16.mxu1 %v2965_v15  ;;  %v2925_v6 = vmul.f32 %v4905_v12, %v7159_v5  ;;  %v2926_v24 = vmul.f32 %v4903_v13, %v7160_v30  ;;  %v2924_v38 = vmul.f32 %v4905_v12, %v7161_v29 }
 0x625   : > { %v2830_v44 = vpop.xlane.xlu1 %2829  ;;  %v2969_v50 = vpack.c.bf16 %v2927_v52, %v2925_v6  ;;  %v2968_v46 = vpack.c.bf16 %v2926_v24, %v2924_v38  ;;  %v7162_v24 = vld [vmem:[#allocation53_spill] sm:$0xff]  ;;  %v7164_v38 = vld [vmem:[#allocation54_spill] sm:$0xff] }
 0x627   : > { %v2833_v37 = vpop.xlane.xlu0 %2832 }
 0x628   : > { %4910 = vrcp.f32 %v2833_v37 }
 0x629   : > { %4912 = vrcp.f32 %v2830_v44 }
 0x62a   : > { %3079 = vmatmul.mubr.bf16.gmra.mrb[112].mxu1 %v2964_v17  ;;  %v4907_v59 = vpop.eup %4906 }
 0x62b   : > { %3086 = vmatprep.mubr.bf16.mxu1 %v2967_v33  ;;  %v4909_v26 = vpop.eup %4908  ;;  %v2931_v42 = vmul.f32 %v4907_v59, %v6359_v25  ;;  %v2930_v25 = vmul.f32 %v4907_v59, %v6355_v62 }
 0x62c   : > { %v2836_v57 = vpop.xlane.xlu1 %2835  ;;  %v2929_v60 = vmul.f32 %v4909_v26, %v6353_v43  ;;  %v2928_v43 = vmul.f32 %v4909_v26, %v6349_v16 }
 0x62e   : > { %v2971_v31 = vpack.c.bf16 %v2931_v42, %v2929_v60  ;;  %v2970_v21 = vpack.c.bf16 %v2930_v25, %v2928_v43  ;;  %v7165_v60 = vld [vmem:[#allocation26_spill] sm:$0xff] }
 0x62f   : > { %v6493_v0 = vpop.f32.mrb[16].mxu1  ;;  %v2839_v58 = vpop.xlane.xlu0 %2838 }
 0x630   : > { %v2116_v4 = vpop.f32.mrb[17].mxu1  ;;  %4914 = vrcp.f32 %v2839_v58  ;;  %v7163_v58 = vld [vmem:[#allocation22_spill] sm:$0xff] }
 0x631   : > { %v6497_v9 = vpop.f32.mrb[18].mxu1  ;;  %4916 = vrcp.f32 %v2836_v57 }
 0x632   : > { %v2119_v56 = vpop.f32.mrb[19].mxu1  ;;  %3087 = vmatmul.mubr.bf16.gmra.mrb[116].mxu1 %v2966_v11  ;;  %v4911_v36 = vpop.eup %4910 }
 0x633   : > { %3094 = vmatprep.mubr.bf16.mxu1 %v2969_v50  ;;  %v4913_v39 = vpop.eup %4912  ;;  %v2935_v48 = vmul.f32 %v4911_v36, %v6376_v8  ;;  %v2934_v8 = vmul.f32 %v4911_v36, %v6372_v7 }
 0x634   : > { %v2842_v22 = vpop.xlane.xlu1 %2841  ;;  %v2933_v49 = vmul.f32 %v4913_v39, %v6370_v61  ;;  %v2932_v61 = vmul.f32 %v4913_v39, %v6367_v45 }
 0x636   : > { %v2973_v2 = vpack.c.bf16 %v2935_v48, %v2933_v49  ;;  %v2972_v3 = vpack.c.bf16 %v2934_v8, %v2932_v61 }
 0x637   : > { %v2845_v15 = vpop.xlane.xlu0 %2844 }
 0x638   : > { %4918 = vrcp.f32 %v2845_v15 }
 0x639   : > { %v6503_v54 = vpop.f32.mrb[20].mxu1  ;;  %4920 = vrcp.f32 %v2842_v22 }
 0x63a   : > { %v2124_v10 = vpop.f32.mrb[21].mxu1  ;;  %3095 = vmatmul.mubr.bf16.gmra.mrb[120].mxu1 %v2968_v46  ;;  %v4915_v27 = vpop.eup %4914 }
 0x63b   : > { %v6505_v55 = vpop.f32.mrb[22].mxu1  ;;  %3102 = vmatprep.mubr.bf16.mxu1 %v2971_v31  ;;  %v4917_v17 = vpop.eup %4916  ;;  %v2939_v33 = vmul.f32 %v4915_v27, %v6392_v18  ;;  %v2938_v18 = vmul.f32 %v4915_v27, %v6388_v19 }
 0x63c   : > { %v2127_v40 = vpop.f32.mrb[23].mxu1  ;;  %v2848_v13 = vpop.xlane.xlu1 %2847  ;;  %v2937_v12 = vmul.f32 %v4917_v17, %v6386_v1  ;;  %v2936_v1 = vmul.f32 %v4917_v17, %v6383_v53 }
 0x63e   : > { %v2975_v52 = vpack.c.bf16 %v2939_v33, %v2937_v12  ;;  %v2974_v6 = vpack.c.bf16 %v2938_v18, %v2936_v1 }
 0x63f   : > { %v2851_v16 = vpop.xlane.xlu0 %2850 }
 0x640   : > { %4922 = vrcp.f32 %v2851_v16 }
 0x641   : > { %v6511_v51 = vpop.f32.mrb[24].mxu1  ;;  %4924 = vrcp.f32 %v2848_v13 }
 0x642   : > { %v2132_v14 = vpop.f32.mrb[25].mxu1  ;;  %3103 = vmatmul.mubr.bf16.gmra.mrb[124].mxu1 %v2970_v21  ;;  %v4919_v28 = vpop.eup %4918 }
 0x643   : > { %v6513_v35 = vpop.f32.mrb[26].mxu1  ;;  %3110 = vmatprep.mubr.bf16.mxu1 %v2973_v2  ;;  %v4921_v44 = vpop.eup %4920  ;;  %v2943_v45 = vmul.f32 %v4919_v28, %v6408_v47  ;;  %v2942_v19 = vmul.f32 %v4919_v28, %v6404_v23 }
 0x644   : > { %v2135_v62 = vpop.f32.mrb[27].mxu1  ;;  %v2941_v4 = vmul.f32 %v4921_v44, %v6402_v20  ;;  %v2940_v53 = vmul.f32 %v4921_v44, %v7162_v24 }
 0x646   : > { %v2977_v56 = vpack.c.bf16 %v2943_v45, %v2941_v4  ;;  %v2976_v42 = vpack.c.bf16 %v2942_v19, %v2940_v53 }
 0x649   : > { %v6519_v32 = vpop.f32.mrb[28].mxu1 }
 0x64a   : > { %v2140_v37 = vpop.f32.mrb[29].mxu1  ;;  %3111 = vmatmul.mubr.bf16.gmra.mrb[128].mxu1 %v2972_v3  ;;  %v4923_v50 = vpop.eup %4922 }
 0x64b   : > { %v6521_v41 = vpop.f32.mrb[30].mxu1  ;;  %3118 = vmatprep.mubr.bf16.mxu1 %v2975_v52  ;;  %v4925_v30 = vpop.eup %4924  ;;  %v2947_v47 = vmul.f32 %v4923_v50, %v6424_v63  ;;  %v2946_v57 = vmul.f32 %v4923_v50, %v7164_v38 }
 0x64c   : > { %v2143_v7 = vpop.f32.mrb[31].mxu1  ;;  %v2945_v20 = vmul.f32 %v4925_v30, %v7163_v58  ;;  %v2944_v46 = vmul.f32 %v4925_v30, %v7165_v60 }
 0x64e   : > { %v2979_v29 = vpack.c.bf16 %v2947_v47, %v2945_v20  ;;  %v2978_v10 = vpack.c.bf16 %v2946_v57, %v2944_v46 }
 0x651   : > { %v6527_v5 = vpop.f32.mrb[32].mxu1 }
 0x652   : > { %v2148_v11 = vpop.f32.mrb[33].mxu1  ;;  %3119 = vmatmul.mubr.bf16.gmra.mrb[132].mxu1 %v2974_v6 }
 0x653   : > { %v6529_v59 = vpop.f32.mrb[34].mxu1  ;;  %3126 = vmatprep.mubr.bf16.mxu1 %v2977_v56 }
 0x654   : > { %v2151_v26 = vpop.f32.mrb[35].mxu1 }
 0x65a   : > { %3127 = vmatmul.mubr.bf16.gmra.mrb[136].mxu1 %v2976_v42 }
 0x65b   : > { %3134 = vmatprep.mubr.bf16.mxu1 %v2979_v29 }
 0x661   : > { %v6537_v31 = vpop.f32.mrb[36].mxu1 }
 0x662   : > { %v2156_v36 = vpop.f32.mrb[37].mxu1  ;;  %3135 = vmatmul.mubr.bf16.gmra.mrb[140].mxu1 %v2978_v10 }
 0x663   : > { %v6539_v23 = vpop.f32.mrb[38].mxu1  ;;  %4308 = vmatprep.mubr.msk.bf16.mxu1 %vm5029_vm3, %v7142_v34 }
 0x664   : > { %v2159_v63 = vpop.f32.mrb[39].mxu1 }
 0x669   : > { %v6541_v40 = vpop.f32.mrb[40].mxu1 }
 0x66a   : > { %v2164_v39 = vpop.f32.mrb[41].mxu1 }
 0x66b   : > { %v6543_v25 = vpop.f32.mrb[42].mxu1 }
 0x66c   : > { %v2167_v15 = vpop.f32.mrb[43].mxu1 }
 0x671   : > { %v6545_v48 = vpop.f32.mrb[44].mxu1 }
 0x672   : > { %v2172_v43 = vpop.f32.mrb[45].mxu1 }
 0x673   : > { %v6547_v22 = vpop.f32.mrb[46].mxu1 }
 0x674   : > { %v2175_v49 = vpop.f32.mrb[47].mxu1 }
 0x679   : > { %v6549_v21 = vpop.f32.mrb[48].mxu1 }
 0x67a   : > { %v2180_v14 = vpop.f32.mrb[49].mxu1 }
 0x67b   : > { %v6551_v2 = vpop.f32.mrb[50].mxu1 }
 0x67c   : > { %v2183_v27 = vpop.f32.mrb[51].mxu1 }
 0x681   : > { %v6553_v62 = vpop.f32.mrb[52].mxu1 }
 0x682   : > { %v2188_v17 = vpop.f32.mrb[53].mxu1 }
 0x683   : > { %v6555_v8 = vpop.f32.mrb[54].mxu1 }
 0x684   : > { %v2191_v16 = vpop.f32.mrb[55].mxu1 }
 0x689   : > { %v6557_v33 = vpop.f32.mrb[56].mxu1 }
 0x68a   : > { %v2196_v61 = vpop.f32.mrb[57].mxu1 }
 0x68b   : > { %v6559_v13 = vpop.f32.mrb[58].mxu1 }
 0x68c   : > { %v2199_v12 = vpop.f32.mrb[59].mxu1 }
 0x691   : > { %v6561_v3 = vpop.f32.mrb[60].mxu1 }
 0x692   : > { %v2204_v37 = vpop.f32.mrb[61].mxu1 }
 0x693   : > { %v6563_v52 = vpop.f32.mrb[62].mxu1 }
 0x694   : > { %v2207_v28 = vpop.f32.mrb[63].mxu1 }
 0x699   : > { %v6565_v7 = vpop.f32.mrb[64].mxu1 }
 0x69a   : > { %v2212_v44 = vpop.f32.mrb[65].mxu1 }
 0x69b   : > { %v6567_v18 = vpop.f32.mrb[66].mxu1 }
 0x69c   : > { %v2215_v45 = vpop.f32.mrb[67].mxu1 }
 0x6a1   : > { %v6569_v1 = vpop.f32.mrb[68].mxu1 }
 0x6a2   : > { %v2220_v4 = vpop.f32.mrb[69].mxu1 }
 0x6a3   : > { %v6571_v6 = vpop.f32.mrb[70].mxu1 }
 0x6a4   : > { %v2223_v11 = vpop.f32.mrb[71].mxu1 }
 0x6a9   : > { %v6573_v56 = vpop.f32.mrb[72].mxu1 }
 0x6aa   : > { %v2228_v50 = vpop.f32.mrb[73].mxu1 }
 0x6ab   : > { %v6575_v26 = vpop.f32.mrb[74].mxu1 }
 0x6ac   : > { %v2231_v30 = vpop.f32.mrb[75].mxu1 }
 0x6b1   : > { %v6577_v19 = vpop.f32.mrb[76].mxu1 }
 0x6b2   : > { %v2236_v47 = vpop.f32.mrb[77].mxu1 }
 0x6b3   : > { %v6579_v24 = vpop.f32.mrb[78].mxu1 }
 0x6b4   : > { %v2239_v53 = vpop.f32.mrb[79].mxu1 }
 0x6b9   : > { %v3016_v58 = vpop.f32.mrb[80].mxu1 }
 0x6ba   : > { %v3018_v20 = vpop.f32.mrb[81].mxu1 }
 0x6bb   : > { %v3019_v42 = vpop.f32.mrb[82].mxu1 }
 0x6bc   : > { %v4425_v29 = vpack.i.bf16 %v3019_v42, %v3016_v58  ;;  %v3021_v38 = vpop.f32.mrb[83].mxu1 }
 0x6be   : > { %4426 = vrot.lane.b32.xlu1 %v4425_v29, %s5028_s27 }
 0x6c1   : > { %v3024_v57 = vpop.f32.mrb[84].mxu1 }
 0x6c2   : > { %v3026_v60 = vpop.f32.mrb[85].mxu1 }
 0x6c3   : > { %v3027_v46 = vpop.f32.mrb[86].mxu1 }
 0x6c4   : > { %v4435_v10 = vpack.i.bf16 %v3027_v46, %v3024_v57  ;;  %v3029_v36 = vpop.f32.mrb[87].mxu1 }
 0x6c6   : > { %4436 = vrot.lane.b32.xlu1 %v4435_v10, %s5028_s27 }
 0x6c9   : > { %v3032_v63 = vpop.f32.mrb[88].mxu1 }
 0x6ca   : > { %v3034_v39 = vpop.f32.mrb[89].mxu1 }
 0x6cb   : > { %v3035_v15 = vpop.f32.mrb[90].mxu1 }
 0x6cc   : > { %v4445_v43 = vpack.i.bf16 %v3035_v15, %v3032_v63  ;;  %v3037_v49 = vpop.f32.mrb[91].mxu1 }
 0x6d1   : > { %v3040_v14 = vpop.f32.mrb[92].mxu1 }
 0x6d2   : > { %v3042_v27 = vpop.f32.mrb[93].mxu1 }
 0x6d3   : > { %v3043_v17 = vpop.f32.mrb[94].mxu1 }
 0x6d4   : > { %v4455_v16 = vpack.i.bf16 %v3043_v17, %v3040_v14  ;;  %v3045_v61 = vpop.f32.mrb[95].mxu1 }
 0x6d9   : > { %v3048_v12 = vpop.f32.mrb[96].mxu1 }
 0x6da   : > { %v3050_v37 = vpop.f32.mrb[97].mxu1 }
 0x6db   : > { %v3051_v28 = vpop.f32.mrb[98].mxu1 }
 0x6dc   : > { %v4465_v44 = vpack.i.bf16 %v3051_v28, %v3048_v12  ;;  %v3053_v45 = vpop.f32.mrb[99].mxu1 }
 0x6e5   : > { %v3056_v4 = vpop.f32.mrb[100].mxu1 }
 0x6e6   : > { %v3058_v11 = vpop.f32.mrb[101].mxu1 }
 0x6e7   : > { %v3059_v50 = vpop.f32.mrb[102].mxu1 }
 0x6e8   : > { %v4475_v30 = vpack.i.bf16 %v3059_v50, %v3056_v4  ;;  %v3061_v47 = vpop.f32.mrb[103].mxu1 }
 0x6ed   : > { %v3064_v53 = vpop.f32.mrb[104].mxu1 }
 0x6ee   : > { %v3066_v58 = vpop.f32.mrb[105].mxu1 }
 0x6ef   : > { %v3067_v20 = vpop.f32.mrb[106].mxu1 }
 0x6f0   : > { %v4485_v42 = vpack.i.bf16 %v3067_v20, %v3064_v53  ;;  %v3069_v29 = vpop.f32.mrb[107].mxu1 }
 0x6f5   : > { %v3072_v38 = vpop.f32.mrb[108].mxu1 }
 0x6f6   : > { %v3074_v57 = vpop.f32.mrb[109].mxu1 }
 0x6f7   : > { %v3075_v60 = vpop.f32.mrb[110].mxu1 }
 0x6f8   : > { %v4495_v46 = vpack.i.bf16 %v3075_v60, %v3072_v38  ;;  %v3077_v10 = vpop.f32.mrb[111].mxu1 }
 0x6fd   : > { %v3080_v36 = vpop.f32.mrb[112].mxu1 }
 0x6fe   : > { %v3082_v63 = vpop.f32.mrb[113].mxu1 }
 0x6ff   : > { %v3083_v39 = vpop.f32.mrb[114].mxu1 }
 0x700   : > { %v4430_v15 = vpack.i.bf16 %v3083_v39, %v3080_v36  ;;  %v3085_v49 = vpop.f32.mrb[115].mxu1 }
 0x702   : > { %4431 = vrot.lane.b32.xlu0 %v4430_v15, %s5028_s27 }
 0x705   : > { %v3088_v14 = vpop.f32.mrb[116].mxu1 }
 0x706   : > { %4446 = vrot.lane.b32.xlu0 %v4445_v43, %s5028_s27  ;;  %v3090_v27 = vpop.f32.mrb[117].mxu1 }
 0x707   : > { %v3091_v17 = vpop.f32.mrb[118].mxu1 }
 0x708   : > { %v4440_v61 = vpack.i.bf16 %v3091_v17, %v3088_v14  ;;  %v3093_v12 = vpop.f32.mrb[119].mxu1 }
 0x70a   : > { %4456 = vrot.lane.b32.xlu0 %v4455_v16, %s5028_s27  ;;  %4441 = vrot.lane.b32.xlu1 %v4440_v61, %s5028_s27 }
 0x70d   : > { %v3096_v37 = vpop.f32.mrb[120].mxu1 }
 0x70e   : > { %4466 = vrot.lane.b32.xlu0 %v4465_v44, %s5028_s27  ;;  %v3098_v28 = vpop.f32.mrb[121].mxu1  ;;  %v1141_v44 = vld [vmem:[%s6909_s2 + $0x40] sm:$0xff] }
 0x70f   : > { %v3099_v45 = vpop.f32.mrb[122].mxu1  ;;  %v6609_v28 = vld [vmem:[%s6908_s1 + $0x30] sm:$0xff]  }
 0x710   : > { %v4450_v4 = vpack.i.bf16 %v3099_v45, %v3096_v37  ;;  %v3101_v11 = vpop.f32.mrb[123].mxu1  ;;  %4270 = vmatprep.mubr.msk.bf16.mxu0 %vm270_vm0, %v6609_v28 }
 0x712   : > { %4476 = vrot.lane.b32.xlu0 %v4475_v30, %s5028_s27  ;;  %4451 = vrot.lane.b32.xlu1 %v4450_v4, %s5028_s27 }
 0x715   : > { %v3104_v43 = vpop.f32.mrb[124].mxu1 }
 0x716   : > { %4486 = vrot.lane.b32.xlu0 %v4485_v42, %s5028_s27  ;;  %v3106_v50 = vpop.f32.mrb[125].mxu1  ;;  %v3321_v42 = vld [vmem:[%s6909_s2 + $0x80] sm:$0xff] }
 0x717   : > { %v3107_v47 = vpop.f32.mrb[126].mxu1 }
 0x718   : > { %v4460_v53 = vpack.i.bf16 %v3107_v47, %v3104_v43  ;;  %v3109_v16 = vpop.f32.mrb[127].mxu1 }
 0x71a   : > { %4496 = vrot.lane.b32.xlu0 %v4495_v46, %s5028_s27  ;;  %4461 = vrot.lane.b32.xlu1 %v4460_v53, %s5028_s27 }
 0x71d   : > { %v3112_v58 = vpop.f32.mrb[128].mxu1 }
 0x71e   : > { %1147 = vperm.xlu0 %4423, %v1141_v44   ;;  %v3114_v30 = vpop.f32.mrb[129].mxu1 }
 0x71f   : > { %v3115_v20 = vpop.f32.mrb[130].mxu1 }
 0x720   : > { %v4470_v29 = vpack.i.bf16 %v3115_v20, %v3112_v58  ;;  %v3117_v38 = vpop.f32.mrb[131].mxu1  ;;  %v1142_v58 = vld [vmem:[%s6909_s2 + $0x48] sm:$0xff] }
 0x721   : > { %v3322_v20 = vld [vmem:[%s6909_s2 + $0x88] sm:$0xff] }
 0x722   : > { %3325 = vperm.xlu0 %4423, %v3321_v42   ;;  %4471 = vrot.lane.b32.xlu1 %v4470_v29, %s5028_s27 }
 0x725   : > { %v3120_v57 = vpop.f32.mrb[132].mxu1 }
 0x726   : > { %v3122_v60 = vpop.f32.mrb[133].mxu1 }
 0x727   : > { %v3123_v46 = vpop.f32.mrb[134].mxu1 }
 0x728   : > { %v4480_v10 = vpack.i.bf16 %v3123_v46, %v3120_v57  ;;  %v3125_v36 = vpop.f32.mrb[135].mxu1 }
 0x72a   : > { %4481 = vrot.lane.b32.xlu1 %v4480_v10, %s5028_s27 }
 0x72d   : > { %v3128_v63 = vpop.f32.mrb[136].mxu1 }
 0x72e   : > { %v3130_v39 = vpop.f32.mrb[137].mxu1 }
 0x72f   : > { %v3131_v15 = vpop.f32.mrb[138].mxu1 }
 0x730   : > { %v4427_v49 = vpop.permute.xlu1 %4426  ;;  %v4490_v14 = vpack.i.bf16 %v3131_v15, %v3128_v63  ;;  %v3133_v27 = vpop.f32.mrb[139].mxu1 }
 0x731   : > { %v4429_v17 = vunpack.i.h.bf16 %v4427_v49  ;;  %v4428_v61 = vunpack.i.l.bf16 %v4427_v49 }
 0x732   : > { %4491 = vrot.lane.b32.xlu1 %v4490_v14, %s5028_s27 }
 0x733   : > { %v3272_v12 = vsel %vm1413_vm2, %v6497_v9, %v4429_v17  ;;  %v3271_v37 = vsel %vm1413_vm2, %v6493_v0, %v4428_v61 }
 0x734   : > { %v3305_v45 = vpack.c.bf16 %v3272_v12, %v3271_v37 }
 0x735   : > { %v3136_v4 = vpop.f32.mrb[140].mxu1 }
 0x736   : > { %v3138_v11 = vpop.f32.mrb[141].mxu1  ;;  %v3342_v36 = vsel %vm270_vm0, %v3305_v45, 0 }
 0x737   : > { %v3139_v43 = vpop.f32.mrb[142].mxu1 }
 0x738   : > { %v4437_v50 = vpop.permute.xlu1 %4436  ;;  %v4500_v47 = vpack.i.bf16 %v3139_v43, %v3136_v4  ;;  %v3141_v53 = vpop.f32.mrb[143].mxu1 }
 0x739   : > { %v4439_v16 = vunpack.i.h.bf16 %v4437_v50  ;;  %v4438_v9 = vunpack.i.l.bf16 %v4437_v50 }
 0x73a   : > { %4501 = vrot.lane.b32.xlu1 %v4500_v47, %s5028_s27 }
 0x73b   : > { %v3274_v0 = vsel %vm1413_vm2, %v6505_v55, %v4439_v16  ;;  %v3273_v44 = vsel %vm1413_vm2, %v6503_v54, %v4438_v9 }
 0x73c   : > { %v3306_v30 = vpack.c.bf16 %v3274_v0, %v3273_v44 }
 0x73e   : > { %1152 = vperm.xlu1 %4424, %v1142_v58   ;;  %v3345_v50 = vsel %vm270_vm0, %v3306_v30, 0 }
 0x742   : > { %3330 = vperm.xlu1 %4424, %v3322_v20  }
 0x774   : > { %v4432_v42 = vpop.permute.xlu0 %4431 }
 0x775   : > { %v4434_v29 = vunpack.i.h.bf16 %v4432_v42  ;;  %v4433_v38 = vunpack.i.l.bf16 %v4432_v42 }
 0x777   : > { %v3288_v55 = vsel %vm1413_vm2, %v6551_v2, %v4434_v29  ;;  %v3287_v54 = vsel %vm1413_vm2, %v6549_v21, %v4433_v38 }
 0x778   : > { %v3313_v57 = vpack.c.bf16 %v3288_v55, %v3287_v54  ;;  %v4447_v60 = vpop.permute.xlu0 %4446 }
 0x779   : > { %v4449_v46 = vunpack.i.h.bf16 %v4447_v60  ;;  %v4448_v10 = vunpack.i.l.bf16 %v4447_v60 }
 0x77a   : > { %4324 = vmatprep.subr.msk.bf16.mxu0 %vm270_vm0, %v3313_v57 }
 0x77b   : > { %v3276_v63 = vsel %vm1413_vm2, %v6513_v35, %v4449_v46  ;;  %v3275_v39 = vsel %vm1413_vm2, %v6511_v51, %v4448_v10  ;;  %4255 = vmatpush3.bf16.xpose.msra.mxu0 %v3342_v36 }
 0x77c   : > { %v4457_v15 = vpop.permute.xlu0 %4456  ;;  %v4442_v2 = vpop.permute.xlu1 %4441  ;;  %v3307_v49 = vpack.c.bf16 %v3276_v63, %v3275_v39 }
 0x77d   : > { %v4459_v14 = vunpack.i.h.bf16 %v4457_v15  ;;  %v4458_v21 = vunpack.i.l.bf16 %v4457_v15  ;;  %v4444_v27 = vunpack.i.h.bf16 %v4442_v2  ;;  %v4443_v17 = vunpack.i.l.bf16 %v4442_v2 }
 0x77e   : > { %v3348_v55 = vsel %vm270_vm0, %v3307_v49, 0 }
 0x77f   : > { %v3278_v61 = vsel %vm1413_vm2, %v6521_v41, %v4459_v14  ;;  %v3277_v12 = vsel %vm1413_vm2, %v6519_v32, %v4458_v21  ;;  %v3290_v35 = vsel %vm1413_vm2, %v6555_v8, %v4444_v27  ;;  %v3289_v51 = vsel %vm1413_vm2, %v6553_v62, %v4443_v17 }
 0x780   : > { %v3314_v37 = vpack.c.bf16 %v3290_v35, %v3289_v51  ;;  %v4467_v45 = vpop.permute.xlu0 %4466  ;;  %v3308_v4 = vpack.c.bf16 %v3278_v61, %v3277_v12  ;;  %v7166_v35 = vld [vmem:[#allocation21_spill] sm:$0xff] }
 0x781   : > { %v4469_v11 = vunpack.i.h.bf16 %v4467_v45  ;;  %v4468_v43 = vunpack.i.l.bf16 %v4467_v45 }
 0x782   : > { %4325 = vmatprep.subr.msk.bf16.mxu0 %vm270_vm0, %v3314_v37  ;;  %v3351_v2 = vsel %vm270_vm0, %v3308_v4, 0  ;;  %v7167_v37 = vld [vmem:[#allocation10_spill] sm:$0xff] }
 0x783   : > { %v3280_v41 = vsel %vm1413_vm2, %v6529_v59, %v4469_v11  ;;  %v3279_v32 = vsel %vm1413_vm2, %v6527_v5, %v4468_v43  ;;  %4257 = vmatpush3.bf16.xpose.msra.mxu0 %v3345_v50 }
 0x784   : > { %v4477_v8 = vpop.permute.xlu0 %4476  ;;  %v4452_v47 = vpop.permute.xlu1 %4451  ;;  %v3309_v53 = vpack.c.bf16 %v3280_v41, %v3279_v32 }
 0x785   : > { %v4479_v62 = vunpack.i.h.bf16 %v4477_v8  ;;  %v4478_v16 = vunpack.i.l.bf16 %v4477_v8  ;;  %v4454_v9 = vunpack.i.h.bf16 %v4452_v47  ;;  %v4453_v0 = vunpack.i.l.bf16 %v4452_v47 }
 0x787   : > { %v3282_v44 = vsel %vm1413_vm2, %v6539_v23, %v4479_v62  ;;  %v3281_v58 = vsel %vm1413_vm2, %v6537_v31, %v4478_v16  ;;  %v3292_v59 = vsel %vm1413_vm2, %v6559_v13, %v4454_v9  ;;  %v3291_v5 = vsel %vm1413_vm2, %v6557_v33, %v4453_v0 }
 0x788   : > { %v3315_v30 = vpack.c.bf16 %v3292_v59, %v3291_v5  ;;  %v4487_v20 = vpop.permute.xlu0 %4486  ;;  %v3310_v42 = vpack.c.bf16 %v3282_v44, %v3281_v58  ;;  %v7168_v58 = vld [vmem:[#allocation25_spill] sm:$0xff]  ;;  %v7169_v5 = vld [vmem:[#allocation11_spill] sm:$0xff] }
 0x789   : > { %v4489_v29 = vunpack.i.h.bf16 %v4487_v20  ;;  %v4488_v38 = vunpack.i.l.bf16 %v4487_v20 }
 0x78a   : > { %4326 = vmatprep.subr.msk.bf16.mxu0 %vm270_vm0, %v3315_v30  ;;  %v3357_v43 = vsel %vm270_vm0, %v3310_v42, 0 }
 0x78b   : > { %v3284_v23 = vsel %vm1413_vm2, %v6543_v25, %v4489_v29  ;;  %v3283_v31 = vsel %vm1413_vm2, %v6541_v40, %v4488_v38  ;;  %4259 = vmatpush3.bf16.xpose.msra.mxu0 %v3348_v55 }
 0x78c   : > { %v4497_v13 = vpop.permute.xlu0 %4496  ;;  %v4462_v54 = vpop.permute.xlu1 %4461  ;;  %v3311_v57 = vpack.c.bf16 %v3284_v23, %v3283_v31 }
 0x78d   : > { %v4499_v33 = vunpack.i.h.bf16 %v4497_v13  ;;  %v4498_v60 = vunpack.i.l.bf16 %v4497_v13  ;;  %v4464_v46 = vunpack.i.h.bf16 %v4462_v54  ;;  %v4463_v10 = vunpack.i.l.bf16 %v4462_v54 }
 0x78e   : > { %v3360_v47 = vsel %vm270_vm0, %v3311_v57, 0 }
 0x78f   : > { %v3286_v36 = vsel %vm1413_vm2, %v6547_v22, %v4499_v33  ;;  %v3285_v63 = vsel %vm1413_vm2, %v6545_v48, %v4498_v60  ;;  %v3294_v25 = vsel %vm1413_vm2, %v6563_v52, %v4464_v46  ;;  %v3293_v40 = vsel %vm1413_vm2, %v6561_v3, %v4463_v10 }
 0x790   : > { %v3316_v39 = vpack.c.bf16 %v3294_v25, %v3293_v40  ;;  %v3312_v15 = vpack.c.bf16 %v3286_v36, %v3285_v63  ;;  %v3354_v3 = vsel %vm270_vm0, %v3309_v53, 0  ;;  %v4512_v63 = vld [vmem:[%s6908_s1 + $0x38] sm:$0xff]  }
 0x792   : > { %4327 = vmatprep.subr.msk.bf16.mxu0 %vm270_vm0, %v3316_v39 }
 0x793   : > { %4261 = vmatpush3.bf16.xpose.msra.mxu0 %v3351_v2 }
 0x794   : > { %v4472_v49 = vpop.permute.xlu1 %4471 }
 0x795   : > { %v4474_v14 = vunpack.i.h.bf16 %v4472_v49  ;;  %v4473_v21 = vunpack.i.l.bf16 %v4472_v49  ;;  %v4513_v49 = vld [vmem:[%s6908_s1 + $0x40] sm:$0xff]  }
 0x797   : > { %v3296_v22 = vsel %vm1413_vm2, %v6567_v18, %v4474_v14  ;;  %v3295_v48 = vsel %vm1413_vm2, %v6565_v7, %v4473_v21  ;;  %v4514_v14 = vld [vmem:[%s6908_s1 + $0x48] sm:$0xff]   ;;  %v4515_v21 = vld [vmem:[%s6908_s1 + $0x50] sm:$0xff]  }
 0x798   : > { %v3317_v52 = vpack.c.bf16 %v3296_v22, %v3295_v48 }
 0x79a   : > { %4328 = vmatprep.subr.msk.bf16.mxu0 %vm270_vm0, %v3317_v52 }
 0x79b   : > { %4263 = vmatpush3.bf16.xpose.msra.mxu0 %v3354_v3 }
 0x79c   : > { %v4482_v27 = vpop.permute.xlu1 %4481 }
 0x79d   : > { %v4484_v17 = vunpack.i.h.bf16 %v4482_v27  ;;  %v4483_v61 = vunpack.i.l.bf16 %v4482_v27  ;;  %v1148_v12 = vpop.permute.xlu0 %1147 }
 0x79e   : > { %v6679_v51 = vadd.f32 %v7166_v35, %v1148_v12  ;;  %v6682_v45 = vadd.f32 %v7167_v37, %v1148_v12 }
 0x79f   : > { %v3298_v18 = vsel %vm1413_vm2, %v6571_v6, %v4484_v17  ;;  %v3297_v7 = vsel %vm1413_vm2, %v6569_v1, %v4483_v61 }
 0x7a0   : > { %v3318_v4 = vpack.c.bf16 %v3298_v18, %v3297_v7  ;;  %v3432_v11 = vadd.f32 %v6682_v45, %v6679_v51 }
 0x7a2   : > { %3433 = vadd.xlane.f32.xlu0 %v3432_v11  ;;  %4329 = vmatprep.subr.msk.bf16.mxu0 %vm270_vm0, %v3318_v4 }
 0x7a3   : > { %4265 = vmatpush3.bf16.xpose.msra.mxu0 %v3357_v43 }
 0x7a4   : > { %v4492_v50 = vpop.permute.xlu1 %4491 }
 0x7a5   : > { %v4494_v41 = vunpack.i.h.bf16 %v4492_v50  ;;  %v4493_v32 = vunpack.i.l.bf16 %v4492_v50 }
 0x7a7   : > { %v3300_v8 = vsel %vm1413_vm2, %v6575_v26, %v4494_v41  ;;  %v3299_v6 = vsel %vm1413_vm2, %v6573_v56, %v4493_v32  ;;  %v3363_v56 = vsel %vm270_vm0, %v3312_v15, 0 }
 0x7a8   : > { %v3319_v1 = vpack.c.bf16 %v3300_v8, %v3299_v6 }
 0x7aa   : > { %4330 = vmatprep.subr.msk.bf16.mxu0 %vm270_vm0, %v3319_v1 }
 0x7ab   : > { %4267 = vmatpush3.bf16.xpose.msra.mxu0 %v3360_v47 }
 0x7ac   : > { %v4502_v53 = vpop.permute.xlu1 %4501 }
 0x7ad   : > { %v4504_v62 = vunpack.i.h.bf16 %v4502_v53  ;;  %v4503_v16 = vunpack.i.l.bf16 %v4502_v53 }
 0x7af   : > { %v3302_v9 = vsel %vm1413_vm2, %v6579_v24, %v4504_v62  ;;  %v3301_v0 = vsel %vm1413_vm2, %v6577_v19, %v4503_v16  ;;  %v3326_v19 = vpop.permute.xlu0 %3325 }
 0x7b0   : > { %v3320_v44 = vpack.c.bf16 %v3302_v9, %v3301_v0 }
 0x7b2   : > { %4331 = vmatprep.subr.msk.bf16.mxu0 %vm270_vm0, %v3320_v44 }
 0x7b3   : > { %4269 = vmatpush3.bf16.xpose.msra.mxu0 %v3363_v56  ;;  %v4516_v56 = vld [vmem:[%s6908_s1 + $0x58] sm:$0xff]  }
 0x7ba   : > { %4271 = vmatmul.mubr.msk.bf16.vlgmr.msra.gmra.mrb[136].mxu0 %vm270_vm0, %v6609_v28  ;;  %vm3479_vm0 = vcmask 261120  }
 0x7bb   : > { %4292 = vmatprep.mubr.msk.bf16.mxu0 %vm3479_vm0, %v4512_v63 }
 0x7bd   : > { %v1153_v26 = vpop.permute.xlu1 %1152 }
 0x7be   : > { %v6707_v59 = vadd.f32 %v7168_v58, %v1153_v26  ;;  %v6710_v30 = vadd.f32 %v7169_v5, %v1153_v26  ;;  %v4517_v26 = vld [vmem:[%s6908_s1 + $0x60] sm:$0xff]   ;;  %v7170_v58 = vmov 0  }
 0x7bf   : > { %v3661_v5 = vld [vmem:[%s6909_s2 + $0xa0] sm:$0xff] }
 0x7c0   : > { %v3435_v24 = vadd.f32 %v6710_v30, %v6707_v59 }
 0x7c1   : > { %v3331_v20 = vpop.permute.xlu1 %3330 }
 0x7c2   : > { %3436 = vadd.xlane.f32.xlu1 %v3435_v24 }
 0x82f   : > { %v3434_v42 = vpop.xlane.xlu0 %3433 }
 0x830   : > { %v3439_v38 = vmul.f32 0.00390625, %v3434_v42 }
 0x84f   : > { %v3437_v29 = vpop.xlane.xlu1 %3436 }
 0x850   : > { %v3440_v55 = vmul.f32 0.00390625, %v3437_v29 }
 0x852   : > { %v3457_v23 = vpack.c.bf16 %v3440_v55, %v3439_v38 }
 0x854   : > { %4288 = vmatprep.subr.bf16.mxu0 %v3457_v23 }
 0x855   : > { %4289 = vmatpush3.bf16.msra.mxu0 %v3457_v23  ;;  %v3662_v23 = vld [vmem:[%s6909_s2 + $0xa8] sm:$0xff] }
 0x88d   : > { %v3423_v28 = vpop.f32.mrb[136].mxu0 }
 0x88e   : > { %v6714_v31 = vadd.f32 %v3423_v28, %v3326_v19  ;;  %v3425_v13 = vpop.f32.mrb[137].mxu0 }
 0x88f   : > { %v6716_v54 = vadd.f32 %v3425_v13, %v3326_v19  ;;  %v3427_v57 = vpop.f32.mrb[138].mxu0  ;;  %v3584_v19 = vld [vmem:[%s6909_s2 + $0x98] sm:$0xff] }
 0x890   : > { %v3429_v33 = vpop.f32.mrb[139].mxu0  ;;  %v6720_v46 = vadd.f32 %v3427_v57, %v3331_v20 }
 0x891   : > { %v3441_v60 = vadd.f32 %v6716_v54, %v6714_v31  ;;  %v6722_v10 = vadd.f32 %v3429_v33, %v3331_v20 }
 0x893   : > { %3442 = vadd.xlane.f32.xlu0 %v3441_v60  ;;  %v3444_v36 = vadd.f32 %v6722_v10, %v6720_v46 }
 0x897   : > { %3445 = vadd.xlane.f32.xlu0 %v3444_v36 }
 0x920   : > { %v3443_v25 = vpop.xlane.xlu0 %3442 }
 0x921   : > { %v3447_v39 = vmul.f32 0.00390625, %v3443_v25 }
 0x924   : > { %v3446_v40 = vpop.xlane.xlu0 %3445 }
 0x925   : > { %v3448_v15 = vmul.f32 0.00390625, %v3446_v40 }
 0x927   : > { %v3458_v2 = vpack.c.bf16 %v3448_v15, %v3447_v39 }
 0x929   : > { %4290 = vmatprep.subr.bf16.mxu0 %v3458_v2 }
 0x92a   : > { %4291 = vmatpush3.bf16.msra.mxu0 %v3458_v2 }
 0x92b   : > { %4312 = vmatprep.subr.bf16.mxu0 %v7142_v34 }
 0x92d   : > { %4293 = vmatmul.mubr.msk.bf16.vlgmr.msra.gmra.mrb[140].mxu0 %vm3479_vm0, %v4513_v49 }
 0x92e   : > { %4296 = vmatprep.mubr.msk.bf16.mxu0 %vm3479_vm0, %v4514_v14 }
 0x935   : > { %4297 = vmatmul.mubr.msk.bf16.gmra.mrb[144].mxu0 %vm3479_vm0, %v4515_v21 }
 0x936   : > { %4320 = vmatprep.mubr.msk.bf16.mxu0 %vm5029_vm3, %v7142_v34 }
 0xa00   : > { %v4294_v22 = vpop.f32.mrb[140].mxu0 }
 0xa01   : > { %v3567_v48 = vmul.f32 0.01, %v4294_v22  ;;  %v3526_v52 = vpop.f32.mrb[141].mxu0  ;;  %vm3559_vm12 = vcmp.ge.f32.partialorder %v4294_v22, 0.0 }
 0xa02   : > { %v3565_v3 = vmul.f32 0.01, %v3526_v52  ;;  %v4295_v27 = vpop.f32.mrb[142].mxu0  ;;  %vm3557_vm5 = vcmp.ge.f32.partialorder %v3526_v52, 0.0 }
 0xa03   : > { %vm3560_vm7 = vcmp.ge.f32.partialorder %v4295_v27, 0.0  ;;  %v3568_v17 = vmul.f32 0.01, %v4295_v27  ;;  %v3529_v61 = vpop.f32.mrb[143].mxu0  ;;  %v3575_v35 = vsel %vm3559_vm12, %v4294_v22, %v3567_v48 }
 0xa04   : > { %vm3558_vm10 = vcmp.ge.f32.partialorder %v3529_v61, 0.0  ;;  %v3566_v12 = vmul.f32 0.01, %v3529_v61  ;;  %v3573_v18 = vsel %vm3557_vm5, %v3526_v52, %v3565_v3 }
 0xa05   : > { %v3576_v37 = vsel %vm3560_vm7, %v4295_v27, %v3568_v17 }
 0xa06   : > { %v3586_v7 = vpack.c.bf16 %v3576_v37, %v3575_v35  ;;  %v3574_v4 = vsel %vm3558_vm10, %v3529_v61, %v3566_v12 }
 0xa07   : > { %v3585_v11 = vpack.c.bf16 %v3574_v4, %v3573_v18 }
 0xa08   : > { %v4298_v43 = vpop.f32.mrb[144].mxu0 }
 0xa09   : > { %v3571_v50 = vmul.f32 0.01, %v4298_v43  ;;  %v3542_v41 = vpop.f32.mrb[145].mxu0  ;;  %4301 = vmatpush3.bf16.msra.mxu1 %v3585_v11  ;;  %4313 = vmatpush3.bf16.msra.mxu0 %v3585_v11  ;;  %vm3563_vm13 = vcmp.ge.f32.partialorder %v4298_v43, 0.0 }
 0xa0a   : > { %v3569_v32 = vmul.f32 0.01, %v3542_v41  ;;  %v4299_v8 = vpop.f32.mrb[146].mxu0  ;;  %4302 = vmatprep.subr.bf16.mxu1 %v7142_v34  ;;  %4314 = vmatprep.subr.bf16.mxu0 %v7142_v34  ;;  %vm3561_vm14 = vcmp.ge.f32.partialorder %v3542_v41, 0.0 }
 0xa0b   : > { %vm3564_vm4 = vcmp.ge.f32.partialorder %v4299_v8, 0.0  ;;  %v3572_v6 = vmul.f32 0.01, %v4299_v8  ;;  %v3545_v1 = vpop.f32.mrb[147].mxu0  ;;  %v3579_v53 = vsel %vm3563_vm13, %v4298_v43, %v3571_v50 }
 0xa0c   : > { %vm3562_vm6 = vcmp.ge.f32.partialorder %v3545_v1, 0.0  ;;  %v3570_v47 = vmul.f32 0.01, %v3545_v1  ;;  %v3577_v16 = vsel %vm3561_vm14, %v3542_v41, %v3569_v32 }
 0xa0d   : > { %v3580_v62 = vsel %vm3564_vm4, %v4299_v8, %v3572_v6  ;;  %4303 = vmatpush3.bf16.msra.mxu1 %v3586_v7  ;;  %4315 = vmatpush3.bf16.msra.mxu0 %v3586_v7 }
 0xa0e   : > { %v3588_v9 = vpack.c.bf16 %v3580_v62, %v3579_v53  ;;  %v3578_v0 = vsel %vm3562_vm6, %v3545_v1, %v3570_v47  ;;  %4304 = vmatprep.subr.bf16.mxu1 %v7142_v34  ;;  %4316 = vmatprep.subr.bf16.mxu0 %v7142_v34 }
 0xa0f   : > { %v3587_v44 = vpack.c.bf16 %v3578_v0, %v3577_v16  ;;  %v3844_v0 = vld [vmem:[%s6909_s2 + $0xb0] sm:$0xff] }
 0xa11   : > { %4305 = vmatpush3.bf16.msra.mxu1 %v3587_v44  ;;  %4317 = vmatpush3.bf16.msra.mxu0 %v3587_v44 }
 0xa12   : > { %4306 = vmatprep.subr.bf16.mxu1 %v7142_v34  ;;  %4318 = vmatprep.subr.bf16.mxu0 %v7142_v34  ;;  %v3583_v34 = vld [vmem:[%s6909_s2 + $0x90] sm:$0xff] }
 0xa15   : > { %4307 = vmatpush3.bf16.msra.mxu1 %v3588_v9  ;;  %4319 = vmatpush3.bf16.msra.mxu0 %v3588_v9 }
 0xa18   : > { %4309 = vmatmul.mubr.msk.bf16.vlgmr.msra.gmra.mrb[144].mxu1 %vm3594_vm8, %v4516_v56  ;;  %4321 = vmatmul.mubr.msk.bf16.vlgmr.msra.gmra.mrb[148].mxu0 %vm3594_vm8, %v4517_v26  ;;  %v3846_v56 = vld [vmem:[%s6909_s2 + $0xc0] sm:$0xff]  ;;  %v3845_v26 = vld [vmem:[%s6909_s2 + $0xb8] sm:$0xff] }
 0xa19   : > { %3920 = vmatprep.mubr.bf16.mxu1 %v7170_v58  ;;  %4069 = vmatprep.mubr.bf16.mxu0 %v7170_v58 }
 0xaeb   : > { %v3632_v24 = vpop.f32.mrb[144].mxu1  ;;  %v3705_v20 = vpop.f32.mrb[148].mxu0 }
 0xaec   : > { %v3633_v42 = vadd.f32 %v3632_v24, %v3583_v34  ;;  %v4310_v29 = vpop.f32.mrb[145].mxu1  ;;  %v3706_v38 = vadd.f32 %v3705_v20, %v3661_v5  ;;  %v4322_v55 = vpop.f32.mrb[149].mxu0  ;;  %v3847_v34 = vld [vmem:[%s6909_s2 + $0xc8] sm:$0xff] }
 0xaed   : > { %v3635_v28 = vpop.f32.mrb[146].mxu1  ;;  %v3708_v13 = vpop.f32.mrb[150].mxu0 }
 0xaee   : > { %v3639_v57 = vand.u32 2147483647, %v3633_v42  ;;  %v3636_v33 = vadd.f32 %v3635_v28, %v3584_v19  ;;  %v3712_v60 = vand.u32 2147483647, %v3706_v38  ;;  %v4311_v36 = vpop.f32.mrb[147].mxu1  ;;  %v3709_v63 = vadd.f32 %v3708_v13, %v3662_v23  ;;  %v4323_v25 = vpop.f32.mrb[151].mxu0 }
 0xaef   : > { %vm3647_vm9 = vcmp.ge.f32.partialorder %v3633_v42, 0.0  ;;  %vm3720_vm15 = vcmp.ge.f32.partialorder %v3706_v38, 0.0  ;;  %v4962_v38 = vld [vmem:[%s5082_s23] sm:$0xff]  ;;  %v4963_v23 = vld [vmem:[%s5082_s23 + $0x8] sm:$0xff] }
 0xaf0   : > { %v3641_v40 = vsub.f32 0.0, %v3639_v57  ;;  %v3640_v39 = vand.u32 2147483647, %v3636_v33  ;;  %v3714_v15 = vsub.f32 0.0, %v3712_v60  ;;  %v3713_v2 = vand.u32 2147483647, %v3709_v63 }
 0xaf1   : > { %vm3648_vm11 = vcmp.ge.f32.partialorder %v3636_v33, 0.0  ;;  %vm3721_vm1 = vcmp.ge.f32.partialorder %v3709_v63, 0.0  ;;  %v4964_v57 = vld [vmem:[%s5082_s23 + $0x10] sm:$0xff]  ;;  %v4966_v63 = vld [vmem:[%s5082_s23 + $0x20] sm:$0xff] }
 0xaf2   : > { %v3643_v49 = vmul.f32 1.442695, %v3641_v40  ;;  %v3642_v14 = vsub.f32 0.0, %v3640_v39  ;;  %v3716_v21 = vmul.f32 1.442695, %v3714_v15  ;;  %v3715_v22 = vsub.f32 0.0, %v3713_v2 }
 0xaf3   : > { %v4967_v40 = vld [vmem:[%s5082_s23 + $0x28] sm:$0xff] }
 0xaf4   : > { %4926 = vpow2.f32 %v3643_v49  ;;  %v3645_v48 = vmul.f32 1.442695, %v3642_v14  ;;  %v3718_v52 = vmul.f32 1.442695, %v3715_v22  ;;  %v4968_v14 = vld [vmem:[%s5082_s23 + $0x30] sm:$0xff]  ;;  %v4969_v22 = vld [vmem:[%s5082_s23 + $0x38] sm:$0xff] }
 0xaf5   : > { %4928 = vpow2.f32 %v3716_v21 }
 0xaf6   : > { %4930 = vpow2.f32 %v3645_v48 }
 0xaf7   : > { %4932 = vpow2.f32 %v3718_v52 }
 0xafe   : > { %v4927_v3 = vpop.eup %4926 }
 0xaff   : > { %v4929_v27 = vpop.eup %4928  ;;  %v3649_v17 = vadd.f32 1.0, %v4927_v3 }
 0xb00   : > { %v4931_v61 = vpop.eup %4930  ;;  %v3722_v12 = vadd.f32 1.0, %v4929_v27 }
 0xb01   : > { %v4933_v35 = vpop.eup %4932  ;;  %4934 = vrcp.f32 %v3649_v17  ;;  %v3650_v37 = vadd.f32 1.0, %v4931_v61 }
 0xb02   : > { %4936 = vrcp.f32 %v3722_v12  ;;  %v3723_v18 = vadd.f32 1.0, %v4933_v35 }
 0xb03   : > { %4938 = vrcp.f32 %v3650_v37 }
 0xb04   : > { %4940 = vrcp.f32 %v3723_v18 }
 0xb0b   : > { %v4935_v7 = vpop.eup %4934 }
 0xb0c   : > { %v4937_v4 = vpop.eup %4936  ;;  %v3655_v11 = vmul.f32 %v4935_v7, %v4927_v3 }
 0xb0d   : > { %v4939_v43 = vpop.eup %4938  ;;  %v3728_v50 = vmul.f32 %v4937_v4, %v4929_v27 }
 0xb0e   : > { %v4941_v41 = vpop.eup %4940  ;;  %v3657_v32 = vsel %vm3647_vm9, %v4935_v7, %v3655_v11  ;;  %v3656_v8 = vmul.f32 %v4939_v43, %v4931_v61 }
 0xb0f   : > { %v3732_v6 = vadd.f32 1.0, %v3657_v32  ;;  %v3730_v47 = vsel %vm3720_vm15, %v4937_v4, %v3728_v50  ;;  %v3729_v53 = vmul.f32 %v4941_v41, %v4933_v35 }
 0xb10   : > { %v3658_v1 = vsel %vm3648_vm11, %v4939_v43, %v3656_v8  ;;  %v3752_v16 = vadd.f32 1.0, %v3730_v47 }
 0xb11   : > { %v3733_v62 = vadd.f32 1.0, %v3658_v1  ;;  %3736 = vperm.xlu1 %4424, %v3732_v6   ;;  %v3731_v9 = vsel %vm3721_vm1, %v4941_v41, %v3729_v53 }
 0xb12   : > { %v3753_v44 = vadd.f32 1.0, %v3731_v9 }
 0xb13   : > { %3741 = vperm.xlu0 %4423, %v3733_v62  }
 0xb15   : > { %3756 = vperm.xlu1 %4424, %v3752_v16  }
 0xb17   : > { %3854 = vperm.xlu0 %4423, %v3844_v0  }
 0xb19   : > { %3761 = vperm.xlu1 %4424, %v3753_v44  }
 0xb1b   : > { %3864 = vperm.xlu0 %4423, %v3846_v56  }
 0xb1d   : > { %3859 = vperm.xlu1 %4424, %v3845_v26  }
 0xb21   : > { %3869 = vperm.xlu1 %4424, %v3847_v34  }
 0xb90   : > { %v3737_v5 = vpop.permute.xlu1 %3736 }
 0xb91   : > { %v3744_v24 = vmul.f32 %v3737_v5, %v6679_v51  ;;  %v3745_v19 = vmul.f32 %v3737_v5, %v6682_v45  ;;  %v4965_v51 = vld [vmem:[%s5082_s23 + $0x18] sm:$0xff] }
 0xb92   : > { %v3742_v20 = vpop.permute.xlu0 %3741 }
 0xb93   : > { %v3746_v42 = vmul.f32 %v3742_v20, %v6707_v59  ;;  %v3747_v29 = vmul.f32 %v3742_v20, %v6710_v30  ;;  %v6788_v55 = vadd.f32 %v4962_v38, %v3744_v24  ;;  %v6791_v28 = vadd.f32 %v4963_v23, %v3745_v19 }
 0xb94   : > { %v3757_v13 = vpop.permute.xlu1 %3756 }
 0xb95   : > { %v6794_v33 = vadd.f32 %v4964_v57, %v3746_v42  ;;  %v6797_v45 = vadd.f32 %v4965_v51, %v3747_v29  ;;  %v3764_v59 = vmul.f32 %v3757_v13, %v6714_v31  ;;  %v3765_v30 = vmul.f32 %v3757_v13, %v6716_v54 }
 0xb97   : > { %v3772_v60 = vadd.f32 %v6794_v33, %v6788_v55  ;;  %v3781_v36 = vadd.f32 %v6797_v45, %v6791_v28  ;;  %v6806_v25 = vadd.f32 %v4966_v63, %v3764_v59  ;;  %v6809_v39 = vadd.f32 %v4967_v40, %v3765_v30 }
 0xb98   : > { %v3762_v15 = vpop.permute.xlu1 %3761 }
 0xb99   : > { %v3766_v2 = vmul.f32 %v3762_v15, %v6720_v46  ;;  %v3767_v49 = vmul.f32 %v3762_v15, %v6722_v10  ;;  %v3773_v31 = vadd.f32 %v3772_v60, %v6806_v25  ;;  %v3782_v54 = vadd.f32 %v3781_v36, %v6809_v39 }
 0xb9b   : > { %v6816_v21 = vadd.f32 %v4968_v14, %v3766_v2  ;;  %v6819_v48 = vadd.f32 %v4969_v22, %v3767_v49 }
 0xb9d   : > { %v3774_v52 = vadd.f32 %v3773_v31, %v6816_v21  ;;  %v3783_v3 = vadd.f32 %v3782_v54, %v6819_v48 }
 0xb9f   : > { %v3775_v27 = vrot.slane %v3774_v52, 4  ;;  %v3784_v17 = vrot.slane %v3783_v3, 4 }
 0xba1   : > { %v3776_v61 = vadd.f32 %v3775_v27, %v3774_v52  ;;  %v3785_v46 = vadd.f32 %v3784_v17, %v3783_v3 }
 0xba3   : > { %v3777_v12 = vrot.slane %v3776_v61, 2  ;;  %v3786_v10 = vrot.slane %v3785_v46, 2 }
 0xba5   : > { %v3778_v35 = vadd.f32 %v3777_v12, %v3776_v61  ;;  %v3787_v37 = vadd.f32 %v3786_v10, %v3785_v46 }
 0xba7   : > { %v3779_v18 = vrot.slane %v3778_v35, 1  ;;  %v3788_v7 = vrot.slane %v3787_v37, 1 }
 0xba9   : > { %v3780_v4 = vadd.f32 %v3779_v18, %v3778_v35  ;;  %v3789_v11 = vadd.f32 %v3788_v7, %v3787_v37 }
 0xbab   : > { %v3790_v43 = vmul.f32 0.03125, %v3780_v4  ;;  %v3791_v50 = vmul.f32 0.03125, %v3789_v11  ;;  %v4518_v11 = vld [vmem:[%s6908_s1 + $0x68] sm:$0xff]  }
 0xbad   : > { %v3793_v41 = vsub.f32 %v6791_v28, %v3791_v50  ;;  %v3795_v32 = vsub.f32 %v6797_v45, %v3791_v50  ;;  %v3797_v8 = vsub.f32 %v6809_v39, %v3791_v50  ;;  %v3792_v6 = vsub.f32 %v6788_v55, %v3790_v43 }
 0xbae   : > { %v3794_v1 = vsub.f32 %v6794_v33, %v3790_v43  ;;  %v3796_v47 = vsub.f32 %v6806_v25, %v3790_v43  ;;  %v3799_v53 = vsub.f32 %v6819_v48, %v3791_v50  ;;  %v3798_v9 = vsub.f32 %v6816_v21, %v3790_v43  ;;  %v4519_v43 = vld [vmem:[%s6908_s1 + $0x70] sm:$0xff]   ;;  %v3855_v50 = vpop.permute.xlu0 %3854 }
 0xbaf   : > { %v3801_v62 = vmul.f32 %v3793_v41, %v3793_v41  ;;  %v3803_v16 = vmul.f32 %v3795_v32, %v3795_v32  ;;  %v3800_v0 = vmul.f32 %v3792_v6, %v3792_v6  ;;  %v3805_v56 = vmul.f32 %v3797_v8, %v3797_v8 }
 0xbb0   : > { %v3802_v44 = vmul.f32 %v3794_v1, %v3794_v1  ;;  %v3804_v34 = vmul.f32 %v3796_v47, %v3796_v47  ;;  %v3807_v24 = vmul.f32 %v3799_v53, %v3799_v53  ;;  %v3806_v20 = vmul.f32 %v3798_v9, %v3798_v9 }
 0xbb1   : > { %v3817_v26 = vadd.f32 %v3803_v16, %v3801_v62 }
 0xbb2   : > { %v3808_v5 = vadd.f32 %v3802_v44, %v3800_v0 }
 0xbb3   : > { %v3818_v19 = vadd.f32 %v3817_v26, %v3805_v56 }
 0xbb4   : > { %v3809_v42 = vadd.f32 %v3808_v5, %v3804_v34 }
 0xbb5   : > { %v3819_v29 = vadd.f32 %v3818_v19, %v3807_v24  ;;  %v3865_v19 = vpop.permute.xlu0 %3864 }
 0xbb6   : > { %v3810_v38 = vadd.f32 %v3809_v42, %v3806_v20 }
 0xbb7   : > { %v3820_v23 = vrot.slane %v3819_v29, 4 }
 0xbb8   : > { %v3811_v13 = vrot.slane %v3810_v38, 4 }
 0xbb9   : > { %v3821_v57 = vadd.f32 %v3820_v23, %v3819_v29 }
 0xbba   : > { %v3812_v51 = vadd.f32 %v3811_v13, %v3810_v38 }
 0xbbb   : > { %v3822_v59 = vrot.slane %v3821_v57, 2 }
 0xbbc   : > { %v3813_v30 = vrot.slane %v3812_v51, 2 }
 0xbbd   : > { %v3823_v60 = vadd.f32 %v3822_v59, %v3821_v57 }
 0xbbe   : > { %v3814_v36 = vadd.f32 %v3813_v30, %v3812_v51 }
 0xbbf   : > { %v3824_v63 = vrot.slane %v3823_v60, 1 }
 0xbc0   : > { %v3815_v40 = vrot.slane %v3814_v36, 1 }
 0xbc1   : > { %v3825_v15 = vadd.f32 %v3824_v63, %v3823_v60 }
 0xbc2   : > { %v3816_v2 = vadd.f32 %v3815_v40, %v3814_v36 }
 0xbc3   : > { %v3827_v49 = vmul.f32 0.03125, %v3825_v15 }
 0xbc4   : > { %v3826_v31 = vmul.f32 0.03125, %v3816_v2 }
 0xbc5   : > { %v3829_v54 = vadd.f32 1e-05, %v3827_v49 }
 0xbc6   : > { %v3828_v14 = vadd.f32 1e-05, %v3826_v31 }
 0xbc7   : > { %4942 = vrsqrt.f32 %v3829_v54 }
 0xbc8   : > { %4944 = vrsqrt.f32 %v3828_v14 }
 0xbd1   : > { %v4943_v22 = vpop.eup %4942 }
 0xbd2   : > { %v4945_v52 = vpop.eup %4944  ;;  %v3833_v3 = vmul.f32 %v4943_v22, %v3793_v41  ;;  %v3835_v27 = vmul.f32 %v4943_v22, %v3795_v32  ;;  %v3837_v17 = vmul.f32 %v4943_v22, %v3797_v8  ;;  %v3839_v61 = vmul.f32 %v4943_v22, %v3799_v53 }
 0xbd3   : > { %v3832_v46 = vmul.f32 %v4945_v52, %v3792_v6  ;;  %v3834_v12 = vmul.f32 %v4945_v52, %v3794_v1  ;;  %v3836_v37 = vmul.f32 %v4945_v52, %v3796_v47  ;;  %v3838_v18 = vmul.f32 %v4945_v52, %v3798_v9  ;;  %v3860_v6 = vpop.permute.xlu1 %3859 }
 0xbd4   : > { %v3849_v10 = vpack.c.bf16 %v3835_v27, %v3833_v3  ;;  %v3851_v7 = vpack.c.bf16 %v3839_v61, %v3837_v17 }
 0xbd5   : > { %v3848_v35 = vpack.c.bf16 %v3834_v12, %v3832_v46  ;;  %v3850_v4 = vpack.c.bf16 %v3838_v18, %v3836_v37 }
 0xbd6   : > { %3888 = vmatprep.subr.bf16.mxu1 %v3849_v10 }
 0xbd7   : > { %3889 = vmatpush1.bf16.msra.mxu1 %v3848_v35  ;;  %v3870_v51 = vpop.permute.xlu1 %3869 }
 0xbd8   : > { %3890 = vmatprep.subr.bf16.mxu1 %v3851_v7 }
 0xbdb   : > { %3891 = vmatpush1.bf16.msra.mxu1 %v3850_v4 }
 0xbde   : > { %4244 = vmatmul.mubr.msk.bf16.vlgmr.msra.gmra.mrb[148].mxu1 %vm3479_vm0, %v4518_v11 }
 0xbdf   : > { %3930 = vmatprep.mubr.bf16.mxu1 %v7170_v58 }
 0xbe6   : > { %4245 = vmatmul.mubr.msk.bf16.gmra.mrb[152].mxu1 %vm3479_vm0, %v4519_v43 }
 0xcb1   : > { %v3922_v41 = vpop.f32.mrb[148].mxu1 }
 0xcb2   : > { %v6840_v32 = vadd.f32 %v3922_v41, %v3855_v50  ;;  %v3924_v8 = vpop.f32.mrb[149].mxu1 }
 0xcb3   : > { %v6842_v1 = vadd.f32 %v3924_v8, %v3855_v50  ;;  %v3926_v47 = vpop.f32.mrb[150].mxu1 }
 0xcb4   : > { %v3949_v53 = vmul.f32 0.044715, %v6840_v32  ;;  %v6845_v62 = vadd.f32 %v3926_v47, %v3860_v6  ;;  %v3928_v16 = vpop.f32.mrb[151].mxu1 }
 0xcb5   : > { %v3950_v9 = vmul.f32 0.044715, %v6842_v1  ;;  %v6848_v0 = vadd.f32 %v3928_v16, %v3860_v6 }
 0xcb6   : > { %v3957_v44 = vmul.f32 %v3949_v53, %v6840_v32  ;;  %v3951_v56 = vmul.f32 0.044715, %v6845_v62 }
 0xcb7   : > { %v3958_v26 = vmul.f32 %v3950_v9, %v6842_v1  ;;  %v3952_v34 = vmul.f32 0.044715, %v6848_v0 }
 0xcb8   : > { %v3965_v5 = vmul.f32 %v3957_v44, %v6840_v32  ;;  %v3959_v24 = vmul.f32 %v3951_v56, %v6845_v62 }
 0xcb9   : > { %v3966_v20 = vmul.f32 %v3958_v26, %v6842_v1  ;;  %v3960_v42 = vmul.f32 %v3952_v34, %v6848_v0  ;;  %v3932_v29 = vpop.f32.mrb[152].mxu1  ;;  %v3941_v34 = vmul.f32 0.5, %v6840_v32 }
 0xcba   : > { %v3973_v38 = vadd.f32 %v3965_v5, %v6840_v32  ;;  %v3967_v23 = vmul.f32 %v3959_v24, %v6845_v62  ;;  %v6860_v13 = vadd.f32 %v3932_v29, %v3865_v19  ;;  %v3934_v57 = vpop.f32.mrb[153].mxu1  ;;  %v3943_v5 = vmul.f32 0.5, %v6845_v62 }
 0xcbb   : > { %v3968_v59 = vmul.f32 %v3960_v42, %v6848_v0  ;;  %v6863_v30 = vadd.f32 %v3934_v57, %v3865_v19  ;;  %v3936_v60 = vpop.f32.mrb[154].mxu1  ;;  %v3974_v36 = vadd.f32 %v3966_v20, %v6842_v1  ;;  %v3942_v19 = vmul.f32 0.5, %v6842_v1 }
 0xcbc   : > { %v3981_v63 = vmul.f32 0.7978846, %v3973_v38  ;;  %v3975_v40 = vadd.f32 %v3967_v23, %v6845_v62  ;;  %v3953_v15 = vmul.f32 0.044715, %v6860_v13  ;;  %v3937_v2 = vadd.f32 %v3936_v60, %v3870_v51  ;;  %v3938_v49 = vpop.f32.mrb[155].mxu1 }
 0xcbd   : > { %v3954_v31 = vmul.f32 0.044715, %v6863_v30  ;;  %v3939_v54 = vadd.f32 %v3938_v49, %v3870_v51  ;;  %v3976_v14 = vadd.f32 %v3968_v59, %v6848_v0  ;;  %v3982_v22 = vmul.f32 0.7978846, %v3974_v36 }
 0xcbe   : > { %4946 = vtanh.f32 %v3981_v63  ;;  %v3983_v52 = vmul.f32 0.7978846, %v3975_v40  ;;  %v3961_v3 = vmul.f32 %v3953_v15, %v6860_v13  ;;  %v3955_v27 = vmul.f32 0.044715, %v3937_v2 }
 0xcbf   : > { %v3962_v17 = vmul.f32 %v3954_v31, %v6863_v30  ;;  %v3956_v61 = vmul.f32 0.044715, %v3939_v54  ;;  %v3984_v46 = vmul.f32 0.7978846, %v3976_v14  ;;  %4948 = vtanh.f32 %v3982_v22 }
 0xcc0   : > { %4950 = vtanh.f32 %v3983_v52  ;;  %v3969_v12 = vmul.f32 %v3961_v3, %v6860_v13  ;;  %v3963_v10 = vmul.f32 %v3955_v27, %v3937_v2  ;;  %v3944_v20 = vmul.f32 0.5, %v6848_v0 }
 0xcc1   : > { %v3970_v35 = vmul.f32 %v3962_v17, %v6863_v30  ;;  %v3964_v37 = vmul.f32 %v3956_v61, %v3939_v54  ;;  %4952 = vtanh.f32 %v3984_v46  ;;  %v3945_v62 = vmul.f32 0.5, %v6860_v13  ;;  %v4520_v46 = vld [vmem:[%s6908_s1 + $0x78] sm:$0xff]  }
 0xcc2   : > { %v3977_v18 = vadd.f32 %v3969_v12, %v6860_v13  ;;  %v3971_v7 = vmul.f32 %v3963_v10, %v3937_v2  ;;  %v3947_v1 = vmul.f32 0.5, %v3937_v2  ;;  %v3946_v0 = vmul.f32 0.5, %v6863_v30  ;;  %v4521_v13 = vld [vmem:[%s6908_s1 + $0x80] sm:$0xff]  }
 0xcc3   : > { %v3972_v4 = vmul.f32 %v3964_v37, %v3939_v54  ;;  %v3978_v11 = vadd.f32 %v3970_v35, %v6863_v30  ;;  %v3948_v31 = vmul.f32 0.5, %v3939_v54 }
 0xcc4   : > { %v3985_v43 = vmul.f32 0.7978846, %v3977_v18  ;;  %v3979_v50 = vadd.f32 %v3971_v7, %v3937_v2 }
 0xcc5   : > { %v3980_v41 = vadd.f32 %v3972_v4, %v3939_v54  ;;  %v3986_v8 = vmul.f32 0.7978846, %v3978_v11 }
 0xcc6   : > { %4954 = vtanh.f32 %v3985_v43  ;;  %v3987_v6 = vmul.f32 0.7978846, %v3979_v50 }
 0xcc7   : > { %v3988_v47 = vmul.f32 0.7978846, %v3980_v41  ;;  %4956 = vtanh.f32 %v3986_v8 }
 0xcc8   : > { %v4947_v53 = vpop.eup %4946  ;;  %4958 = vtanh.f32 %v3987_v6 }
 0xcc9   : > { %v4949_v16 = vpop.eup %4948  ;;  %v3997_v9 = vadd.f32 1.0, %v4947_v53  ;;  %4960 = vtanh.f32 %v3988_v47 }
 0xcca   : > { %v4951_v44 = vpop.eup %4950  ;;  %v3998_v56 = vadd.f32 1.0, %v4949_v16 }
 0xccb   : > { %v4953_v26 = vpop.eup %4952  ;;  %v3999_v24 = vadd.f32 1.0, %v4951_v44  ;;  %v4005_v29 = vmul.f32 %v3997_v9, %v3941_v34 }
 0xccc   : > { %v4000_v42 = vadd.f32 1.0, %v4953_v26  ;;  %v4006_v23 = vmul.f32 %v3998_v56, %v3942_v19 }
 0xccd   : > { %v4007_v38 = vmul.f32 %v3999_v24, %v3943_v5 }
 0xcce   : > { %v4008_v57 = vmul.f32 %v4000_v42, %v3944_v20 }
 0xccf   : > { %v4017_v51 = vpack.c.bf16 %v4007_v38, %v4005_v29 }
 0xcd0   : > { %v4955_v59 = vpop.eup %4954  ;;  %v4018_v60 = vpack.c.bf16 %v4008_v57, %v4006_v23 }
 0xcd1   : > { %v4957_v36 = vpop.eup %4956  ;;  %v4001_v63 = vadd.f32 1.0, %v4955_v59 }
 0xcd2   : > { %v4959_v40 = vpop.eup %4958  ;;  %4037 = vmatprep.subr.bf16.mxu0 %v4018_v60  ;;  %v4002_v32 = vadd.f32 1.0, %v4957_v36 }
 0xcd3   : > { %v4961_v15 = vpop.eup %4960  ;;  %4038 = vmatpush1.bf16.msra.mxu0 %v4017_v51  ;;  %v4003_v49 = vadd.f32 1.0, %v4959_v40  ;;  %v4009_v22 = vmul.f32 %v4001_v63, %v3945_v62 }
 0xcd4   : > { %v4004_v14 = vadd.f32 1.0, %v4961_v15  ;;  %v4010_v3 = vmul.f32 %v4002_v32, %v3946_v0 }
 0xcd5   : > { %v4011_v52 = vmul.f32 %v4003_v49, %v3947_v1 }
 0xcd6   : > { %v4012_v27 = vmul.f32 %v4004_v14, %v3948_v31 }
 0xcd7   : > { %v4019_v17 = vpack.c.bf16 %v4011_v52, %v4009_v22 }
 0xcd8   : > { %v4020_v61 = vpack.c.bf16 %v4012_v27, %v4010_v3 }
 0xcda   : > { %4039 = vmatprep.subr.bf16.mxu0 %v4020_v61 }
 0xcdb   : > { %4040 = vmatpush1.bf16.msra.mxu0 %v4019_v17 }
 0xcde   : > { %4248 = vmatmul.mubr.msk.bf16.vlgmr.msra.gmra.mrb[152].mxu0 %vm3479_vm0, %v4520_v46 }
 0xcdf   : > { %4079 = vmatprep.mubr.bf16.mxu0 %v7170_v58 }
 0xce6   : > { %4249 = vmatmul.mubr.msk.bf16.gmra.mrb[156].mxu0 %vm3479_vm0, %v4521_v13 }
 0xdb1   : > { %v4071_v30 = vpop.f32.mrb[152].mxu0 }
 0xdb2   : > { %v4090_v2 = vadd.f32 %v4071_v30, %v6788_v55  ;;  %v4073_v54 = vpop.f32.mrb[153].mxu0 }
 0xdb3   : > { %v4091_v12 = vadd.f32 %v4073_v54, %v6791_v28  ;;  %v4075_v10 = vpop.f32.mrb[154].mxu0 }
 0xdb4   : > { %4098 = vst [vmem:[%s170_s6] sm:$0xff] %v4090_v2  ;;  %v4092_v58 = vadd.f32 %v4075_v10, %v6794_v33  ;;  %v4077_v35 = vpop.f32.mrb[155].mxu0 }
 0xdb5   : > { %4099 = vst [vmem:[%s170_s6 + $0x8] sm:$0xff] %v4091_v12  ;;  %v4093_v37 = vadd.f32 %v4077_v35, %v6797_v45 }
 0xdb6   : > { %4100 = vst [vmem:[%s170_s6 + $0x10] sm:$0xff] %v4092_v58 }
 0xdb7   : > { %4101 = vst [vmem:[%s170_s6 + $0x18] sm:$0xff] %v4093_v37 }
 0xdb9   : > { %v4081_v18 = vpop.f32.mrb[156].mxu0 }
 0xdba   : > { %v4094_v7 = vadd.f32 %v4081_v18, %v6806_v25  ;;  %v4083_v4 = vpop.f32.mrb[157].mxu0 }
 0xdbb   : > { %v4095_v11 = vadd.f32 %v4083_v4, %v6809_v39  ;;  %v4085_v55 = vpop.f32.mrb[158].mxu0 }
 0xdbc   : > { %4102 = vst [vmem:[%s170_s6 + $0x20] sm:$0xff] %v4094_v7  ;;  %v4096_v28 = vadd.f32 %v4085_v55, %v6816_v21  ;;  %v4087_v43 = vpop.f32.mrb[159].mxu0 }
 0xdbd   : > { %4103 = vst [vmem:[%s170_s6 + $0x28] sm:$0xff] %v4095_v11  ;;  %v4097_v33 = vadd.f32 %v4087_v43, %v6819_v48 }
 0xdbe   : > { %4104 = vst [vmem:[%s170_s6 + $0x30] sm:$0xff] %v4096_v28 }
 0xdbf   : > { %4105 = vst [vmem:[%s170_s6 + $0x38] sm:$0xff] %v4097_v33 }
 0xdc0 PF: > { %s13_s12 = sadd.s32 1, %s4976_s12  }
 0xdc1   : > { %p10_p4 = scmp.ge.s32.totalorder %s13_s12, 4  }
 0xdc3   :  { %12 = sbr.rel (!%p10_p4) target bundleno = 1 (0x1), region = 62 }

</bundles_post_ra>
